<compile_context>
chip_gen: v5e
topology: v5e:2x2
jax: 0.10.0
libtpu: 0.0.40
codegen_flags: <defaults>
</compile_context>

<pallas_src>
import functools

import jax
import jax.numpy as jnp
from jax.experimental import pallas as pl
from jax.experimental.pallas import tpu as pltpu


# ----------------------------- Pallas kernels -----------------------------

def _matmul_kernel(*refs, n_pairs, bn, relu, eps):
    """out = [BN][ReLU]( sum_i W_i @ X_i + bias ); whole output in one block."""
    o_ref = refs[-1]
    acc = None
    for i in range(n_pairs):
        w = refs[2 * i][...]                               # (Cout, K_i) bf16
        x = refs[2 * i + 1][...].astype(jnp.bfloat16)      # (K_i, M)
        d = jnp.dot(w, x, preferred_element_type=jnp.float32)
        acc = d if acc is None else acc + d
    bias = refs[2 * n_pairs][...]                          # (Cout, 1) f32
    acc = acc + bias
    if bn:
        gamma = refs[2 * n_pairs + 1][...]                 # (Cout, 1)
        beta = refs[2 * n_pairs + 2][...]                  # (Cout, 1)
        mean = jnp.mean(acc, axis=1, keepdims=True)        # batch stats over M=B*H*W
        var = jnp.mean(jnp.square(acc - mean), axis=1, keepdims=True)  # biased
        acc = (acc - mean) * jax.lax.rsqrt(var + eps) * gamma + beta
    if relu:
        acc = jnp.maximum(acc, 0.0)
    o_ref[...] = acc.astype(o_ref.dtype)


def fused_conv1x1(pairs, bias, gamma=None, beta=None, relu=False, eps=1e-5):
    """sum_i W_i(Cout,K_i) @ X_i(K_i,M) + bias, optional fused BN(batch-stats)+ReLU.

    Single block (grid=(1,)): M is the lane-dense output axis.
    """
    Cout = pairs[0][0].shape[0]
    M = pairs[0][1].shape[1]
    bn = gamma is not None

    args, in_specs = [], []
    for (w, x) in pairs:
        args += [w, x]
        in_specs += [pl.BlockSpec(w.shape, lambda i: (0, 0)),
                     pl.BlockSpec(x.shape, lambda i: (0, 0))]
    args.append(bias.reshape(Cout, 1))
    in_specs.append(pl.BlockSpec((Cout, 1), lambda i: (0, 0)))
    if bn:
        args += [gamma.reshape(Cout, 1), beta.reshape(Cout, 1)]
        in_specs += [pl.BlockSpec((Cout, 1), lambda i: (0, 0)),
                     pl.BlockSpec((Cout, 1), lambda i: (0, 0))]

    kernel = functools.partial(_matmul_kernel, n_pairs=len(pairs),
                               bn=bn, relu=relu, eps=eps)
    return pl.pallas_call(
        kernel,
        out_shape=jax.ShapeDtypeStruct((Cout, M), jnp.float32),
        grid_spec=pltpu.PrefetchScalarGridSpec(
            num_scalar_prefetch=0,
            grid=(1,),
            in_specs=in_specs,
            out_specs=pl.BlockSpec((Cout, M), lambda i: (0, 0)),
        ),
        compiler_params=pltpu.CompilerParams(dimension_semantics=("arbitrary",)),
    )(*args)


def _spp_combine_kernel(a1_ref, a2_ref, t_ref, d3t_ref, w_ref, b_ref, o_ref):
    """relu(a1) + relu(W@a2+b) + relu(W@t+b) + relu(W@d3t+b); shared 1x1 weight."""
    w = w_ref[...]                                         # (kc, kc) bf16
    b = b_ref[...]                                         # (kc, 1) f32

    def conv_relu(x_ref):
        x = x_ref[...].astype(jnp.bfloat16)                # (kc, M)
        return jnp.maximum(
            jnp.dot(w, x, preferred_element_type=jnp.float32) + b, 0.0)

    o_ref[...] = (jnp.maximum(a1_ref[...], 0.0)
                  + conv_relu(a2_ref) + conv_relu(t_ref) + conv_relu(d3t_ref))


def spp_combine(a1, a2, t, d3t, c11_w_bf16, c11_b):
    kc, M = a1.shape
    full = lambda shape: pl.BlockSpec(shape, lambda i: (0, 0))
    return pl.pallas_call(
        _spp_combine_kernel,
        out_shape=jax.ShapeDtypeStruct((kc, M), jnp.float32),
        grid_spec=pltpu.PrefetchScalarGridSpec(
            num_scalar_prefetch=0,
            grid=(1,),
            in_specs=[full((kc, M))] * 4 + [full((kc, kc)), full((kc, 1))],
            out_specs=full((kc, M)),
        ),
        compiler_params=pltpu.CompilerParams(dimension_semantics=("arbitrary",)),
    )(a1, a2, t, d3t, c11_w_bf16, c11_b.reshape(kc, 1))


def _attn_kernel(q_ref, k_ref, v_ref, ww_ref, wb_ref, o_ref, *, scale):
    """Per-batch: att^T = Ww @ (softmax(scale * q^T k) applied to v)^T + Wb."""
    q = (q_ref[0] * scale).astype(jnp.bfloat16)            # (kc, HW)  scale on q
    k = k_ref[0].astype(jnp.bfloat16)                      # (kc, L)
    v = v_ref[0].astype(jnp.bfloat16)                      # (kc, L)

    # scores (HW, L) = q^T @ k
    s = jax.lax.dot_general(q, k, (((0,), (0,)), ((), ())),
                            preferred_element_type=jnp.float32)
    s = s - jnp.max(s, axis=-1, keepdims=True)
    p = jnp.exp(s)
    denom = jnp.sum(p, axis=-1, keepdims=True)
    p = (p * pl.reciprocal(denom, approx=True)).astype(jnp.bfloat16)

    # context^T (kc, HW) = v @ p^T   (lane-dense HW axis)
    ctxT = jax.lax.dot_general(v, p, (((1,), (1,)), ((), ())),
                               preferred_element_type=jnp.float32)

    # fused W projection (kc -> C): att^T (C, HW)
    att = jnp.dot(ww_ref[...], ctxT.astype(jnp.bfloat16),
                  preferred_element_type=jnp.float32) + wb_ref[...]
    o_ref[0] = att.astype(o_ref.dtype)


def pallas_attention(q3, k3, v3, ww_bf16, wb, scale):
    """q3:(B,kc,HW) k3,v3:(B,kc,L) -> (B,C,HW); batch axis parallel across cores."""
    B, kc, HW = q3.shape
    L = k3.shape[2]
    C = ww_bf16.shape[0]
    return pl.pallas_call(
        functools.partial(_attn_kernel, scale=scale),
        out_shape=jax.ShapeDtypeStruct((B, C, HW), jnp.float32),
        grid_spec=pltpu.PrefetchScalarGridSpec(
            num_scalar_prefetch=0,
            grid=(B,),
            in_specs=[
                pl.BlockSpec((1, kc, HW), lambda b: (b, 0, 0)),
                pl.BlockSpec((1, kc, L), lambda b: (b, 0, 0)),
                pl.BlockSpec((1, kc, L), lambda b: (b, 0, 0)),
                pl.BlockSpec((C, kc), lambda b: (0, 0)),
                pl.BlockSpec((C, 1), lambda b: (0, 0)),
            ],
            out_specs=pl.BlockSpec((1, C, HW), lambda b: (b, 0, 0)),
        ),
        compiler_params=pltpu.CompilerParams(dimension_semantics=("parallel",)),
    )(q3, k3, v3, ww_bf16, wb.reshape(C, 1))


# ----------------------------- JAX glue ops --------------------------------
# Max-pools, im2col patch extraction and a few tiny layout transposes stay in
# plain XLA (cheap at these sizes).

def dilated_conv3x3(x4, w_mat_bf16, b, dilation):
    """'same' 3x3 dilated conv.  x4: (Cin,B,H,W) f32; w_mat: (Cout,9*Cin) bf16."""
    Cin, B, H, W = x4.shape
    d = dilation
    xp = jnp.pad(x4, ((0, 0), (0, 0), (d, d), (d, d)))
    patches = [xp[:, :, kh * d:kh * d + H, kw * d:kw * d + W]
               for kh in range(3) for kw in range(3)]
    cols = jnp.stack(patches, axis=0).reshape(9 * Cin, B * H * W)   # tap-major rows
    out = fused_conv1x1([(w_mat_bf16, cols)], b)                    # (Cout, B*H*W)
    return out.reshape(-1, B, H, W)


def maxpool4(x4, k):
    """MaxPool2d(kernel=k, stride=k), floor output size.  x4: (C,B,H,W)."""
    C, B, H, W = x4.shape
    Ho, Wo = H // k, W // k
    xc = x4[:, :, :Ho * k, :Wo * k]
    return xc.reshape(C, B, Ho, k, Wo, k).max(axis=(3, 5)).reshape(C, B, Ho * Wo)


def spp_inception(x4, p):
    """SPP_inception_block on (kc,B,H,W) -> (B, kc, L), L = sum(pools) + H*W.

    Returned layout is the *transposed* (value^T / permuted-key) layout the
    attention kernel consumes directly.
    """
    kc, B, H, W = x4.shape
    pools = [maxpool4(x4, k) for k in (2, 3, 5, 6)]                 # (kc,B,n_k)

    a1 = dilated_conv3x3(x4, p["d1_wm"], p["d1_b"], 1)              # dilate1(x), pre-ReLU
    # dilate2 applied to both x and dilate1(x) with shared weights: one matmul.
    both = dilated_conv3x3(jnp.concatenate([x4, a1], axis=1),
                           p["d2_wm"], p["d2_b"], 3)                # (kc,2B,H,W)
    a2, t = both[:, :B], both[:, B:]                                # d2(x), d2(d1(x))
    d3t = dilated_conv3x3(t, p["d3_wm"], p["d3_b"], 5)              # d3(d2(d1(x)))

    flat = lambda y: y.reshape(kc, B * H * W)
    cnn = spp_combine(flat(a1), flat(a2), flat(t), flat(d3t),
                      p["c11_wm"], p["c11_b"])                      # (kc, B*H*W)

    out = jnp.concatenate(pools + [cnn.reshape(kc, B, H * W)], axis=2)  # (kc,B,L)
    return jnp.transpose(out, (1, 0, 2))                                # (B,kc,L)


# ----------------------------- HIFA forward --------------------------------

def hifa_forward(feats_nchw, P):
    B, C, H, W = feats_nchw.shape
    kc = C // 2
    M = B * H * W
    featsT = jnp.transpose(feats_nchw, (1, 0, 2, 3)).reshape(C, M)   # (C, M)

    # f_value -> SPP(value)
    xvT = fused_conv1x1([(P["fv_wm"], featsT)], P["fv_b"])           # (kc, M)
    value = spp_inception(xvT.reshape(kc, B, H, W), P["spp_v"])      # (B,kc,L)

    # f_key == f_query: conv + BN(batch stats) + ReLU fused in one kernel
    fkT = fused_conv1x1([(P["fk_wm"], featsT)], P["fk_b"],
                        gamma=P["fk_gamma"], beta=P["fk_beta"], relu=True)  # (kc,M)
    q3 = jnp.transpose(fkT.reshape(kc, B, H * W), (1, 0, 2))         # (B,kc,HW)
    key = spp_inception(fkT.reshape(kc, B, H, W), P["spp_k"])        # (B,kc,L)

    # non-local attention + W projection, fused (Pallas kernel)
    att3 = pallas_attention(q3, key, value, P["W_wm"], P["W_b"],
                            float(kc) ** (-0.5))                     # (B,C,HW)
    attT = jnp.transpose(att3, (1, 0, 2)).reshape(C, M)              # (C, M)

    # conv_bn_dropout on cat([att, feats], channels): split weight, fuse BN+ReLU
    outT = fused_conv1x1([(P["out_wm_att"], attT), (P["out_wm_x"], featsT)],
                         P["out_b"], gamma=P["out_gamma"], beta=P["out_beta"],
                         relu=True)                                  # (C, M)
    return jnp.transpose(outT.reshape(C, B, H, W), (1, 0, 2, 3))     # NCHW


# ----------------------------- parameters -----------------------------------

def init_params(key, C):
    kc = C // 2
    keys = iter(jax.random.split(key, 32))

    def w(shape, scale=0.1):
        return jax.random.normal(next(keys), shape, jnp.float32) * scale

    def spp_raw():
        # __init__ zeroes conv biases inside SPP_inception_block.
        return dict(
            d1_w=w((kc, kc, 3, 3)), d1_b=jnp.zeros((kc,), jnp.float32),
            d2_w=w((kc, kc, 3, 3)), d2_b=jnp.zeros((kc,), jnp.float32),
            d3_w=w((kc, kc, 3, 3)), d3_b=jnp.zeros((kc,), jnp.float32),
            c11_w=w((kc, kc)),      c11_b=jnp.zeros((kc,), jnp.float32),
        )

    return dict(
        fv_w=w((kc, C)), fv_b=w((kc,)),
        fk_w=w((kc, C)), fk_b=w((kc,)),
        fk_gamma=jnp.ones((kc,), jnp.float32), fk_beta=jnp.zeros((kc,), jnp.float32),
        spp_v=spp_raw(), spp_k=spp_raw(),
        # Original module zero-inits W (att == 0); use small random to exercise path.
        W_w=w((C, kc)), W_b=w((C,)),
        out_w=w((C, 2 * C)), out_b=w((C,)),
        out_gamma=jnp.ones((C,), jnp.float32), out_beta=jnp.zeros((C,), jnp.float32),
    )


def prepare_params(raw):
    """Pre-cast weights to bf16 and pre-arrange 3x3 kernels as (Cout, 9*Cin) tap-major."""
    C = raw["W_w"].shape[0]

    def conv3x3_mat(w):
        Cout, Cin = w.shape[:2]
        return jnp.transpose(w, (0, 2, 3, 1)).reshape(Cout, 9 * Cin).astype(jnp.bfloat16)

    def spp_prep(p):
        return dict(
            d1_wm=conv3x3_mat(p["d1_w"]), d1_b=p["d1_b"],
            d2_wm=conv3x3_mat(p["d2_w"]), d2_b=p["d2_b"],
            d3_wm=conv3x3_mat(p["d3_w"]), d3_b=p["d3_b"],
            c11_wm=p["c11_w"].astype(jnp.bfloat16), c11_b=p["c11_b"],
        )

    return dict(
        fv_wm=raw["fv_w"].astype(jnp.bfloat16), fv_b=raw["fv_b"],
        fk_wm=raw["fk_w"].astype(jnp.bfloat16), fk_b=raw["fk_b"],
        fk_gamma=raw["fk_gamma"], fk_beta=raw["fk_beta"],
        spp_v=spp_prep(raw["spp_v"]), spp_k=spp_prep(raw["spp_k"]),
        W_wm=raw["W_w"].astype(jnp.bfloat16), W_b=raw["W_b"],
        out_wm_att=raw["out_w"][:, :C].astype(jnp.bfloat16),
        out_wm_x=raw["out_w"][:, C:].astype(jnp.bfloat16),
        out_b=raw["out_b"],
        out_gamma=raw["out_gamma"], out_beta=raw["out_beta"],
    )


# ----------------------------- main ------------------------------------------

if __name__ == "__main__":
    B, C, H, W = 2, 16, 16, 16          # small HIFA(in_channels=16, ratio=2)
    key = jax.random.PRNGKey(0)
    k_x, k_p = jax.random.split(key)
    feats = jax.random.normal(k_x, (B, C, H, W), jnp.float32)
    params = prepare_params(init_params(k_p, C))

    out = jax.jit(hifa_forward)(feats, params)
    out = jax.block_until_ready(out)
    assert out.shape == (B, C, H, W), out.shape
    assert jnp.all(jnp.isfinite(out))
    print("KERNEL_OK")
</pallas_src>

<mosaic_0001>
module attributes {stable_mosaic.version = 11 : i64} {
  func.func @_matmul_kernel(%arg0: i32, %arg1: memref<8x16xbf16, #tpu.memory_space<vmem>>, %arg2: memref<16x512xf32, #tpu.memory_space<vmem>>, %arg3: memref<8x1xf32, #tpu.memory_space<vmem>>, %arg4: memref<8x1xf32, #tpu.memory_space<vmem>>, %arg5: memref<8x1xf32, #tpu.memory_space<vmem>>, %arg6: memref<8x512xf32, #tpu.memory_space<vmem>>) attributes {dimension_semantics = [#tpu.dimension_semantics<arbitrary>], iteration_bounds = array<i64: 1>, scalar_prefetch = 0 : i64, scratch_operands = 0 : i64, tpu.core_type = #tpu.core_type<tc>, window_params = [{pipeline_mode = #tpu.pipeline_mode<synchronous>, transform_indices = @transform_0, window_bounds = array<i64: 8, 16>}, {pipeline_mode = #tpu.pipeline_mode<synchronous>, transform_indices = @transform_1, window_bounds = array<i64: 16, 512>}, {pipeline_mode = #tpu.pipeline_mode<synchronous>, transform_indices = @transform_2, window_bounds = array<i64: 8, 1>}, {pipeline_mode = #tpu.pipeline_mode<synchronous>, transform_indices = @transform_3, window_bounds = array<i64: 8, 1>}, {pipeline_mode = #tpu.pipeline_mode<synchronous>, transform_indices = @transform_4, window_bounds = array<i64: 8, 1>}, {pipeline_mode = #tpu.pipeline_mode<synchronous>, transform_indices = @transform_5, window_bounds = array<i64: 8, 512>}]} {
    %c0 = arith.constant 0 : index
    %c0_0 = arith.constant 0 : index
    %0 = vector.load %arg1[%c0, %c0_0] : memref<8x16xbf16, #tpu.memory_space<vmem>>, vector<8x16xbf16>
    %c0_1 = arith.constant 0 : index
    %c0_2 = arith.constant 0 : index
    %1 = vector.load %arg2[%c0_1, %c0_2] : memref<16x512xf32, #tpu.memory_space<vmem>>, vector<16x512xf32>
    %2 = arith.truncf %1 : vector<16x512xf32> to vector<16x512xbf16>
    %cst = arith.constant dense<0.000000e+00> : vector<8x512xf32>
    %3 = tpu.matmul %0, %2, %cst {dimension_numbers = #tpu.dot_dimension_numbers<[1], [0], [0], [1], [0, 0, 1, 1], [], []>} : vector<8x16xbf16>, vector<16x512xbf16>, vector<8x512xf32> -> vector<8x512xf32>
    %c0_3 = arith.constant 0 : index
    %c0_4 = arith.constant 0 : index
    %4 = vector.load %arg3[%c0_3, %c0_4] : memref<8x1xf32, #tpu.memory_space<vmem>>, vector<8x1xf32>
    %5 = vector.broadcast %4 : vector<8x1xf32> to vector<8x512xf32>
    %6 = arith.addf %3, %5 : vector<8x512xf32>
    %c0_5 = arith.constant 0 : index
    %c0_6 = arith.constant 0 : index
    %7 = vector.load %arg4[%c0_5, %c0_6] : memref<8x1xf32, #tpu.memory_space<vmem>>, vector<8x1xf32>
    %c0_7 = arith.constant 0 : index
    %c0_8 = arith.constant 0 : index
    %8 = vector.load %arg5[%c0_7, %c0_8] : memref<8x1xf32, #tpu.memory_space<vmem>>, vector<8x1xf32>
    %cst_9 = arith.constant dense<0.000000e+00> : vector<8xf32>
    %9 = vector.multi_reduction <add>, %6, %cst_9 [1] : vector<8x512xf32> to vector<8xf32>
    %10 = vector.shape_cast %9 : vector<8xf32> to vector<8x1xf32>
    %cst_10 = arith.constant 5.120000e+02 : f32
    %11 = vector.broadcast %cst_10 : f32 to vector<8x1xf32>
    %12 = arith.divf %10, %11 : vector<8x1xf32>
    %13 = vector.broadcast %12 : vector<8x1xf32> to vector<8x512xf32>
    %14 = arith.subf %6, %13 : vector<8x512xf32>
    %15 = arith.mulf %14, %14 : vector<8x512xf32>
    %cst_11 = arith.constant dense<0.000000e+00> : vector<8xf32>
    %16 = vector.multi_reduction <add>, %15, %cst_11 [1] : vector<8x512xf32> to vector<8xf32>
    %17 = vector.shape_cast %16 : vector<8xf32> to vector<8x1xf32>
    %cst_12 = arith.constant 5.120000e+02 : f32
    %18 = vector.broadcast %cst_12 : f32 to vector<8x1xf32>
    %19 = arith.divf %17, %18 : vector<8x1xf32>
    %20 = vector.broadcast %12 : vector<8x1xf32> to vector<8x512xf32>
    %21 = arith.subf %6, %20 : vector<8x512xf32>
    %cst_13 = arith.constant 9.99999974E-6 : f32
    %22 = vector.broadcast %cst_13 : f32 to vector<8x1xf32>
    %23 = arith.addf %19, %22 : vector<8x1xf32>
    %24 = math.rsqrt %23 : vector<8x1xf32>
    %25 = vector.broadcast %24 : vector<8x1xf32> to vector<8x512xf32>
    %26 = arith.mulf %21, %25 : vector<8x512xf32>
    %27 = vector.broadcast %7 : vector<8x1xf32> to vector<8x512xf32>
    %28 = arith.mulf %26, %27 : vector<8x512xf32>
    %29 = vector.broadcast %8 : vector<8x1xf32> to vector<8x512xf32>
    %30 = arith.addf %28, %29 : vector<8x512xf32>
    %cst_14 = arith.constant 0.000000e+00 : f32
    %31 = vector.broadcast %cst_14 : f32 to vector<8x512xf32>
    %32 = arith.maximumf %30, %31 : vector<8x512xf32>
    %c0_15 = arith.constant 0 : index
    %c0_16 = arith.constant 0 : index
    %33 = vector.load %arg6[%c0_15, %c0_16] : memref<8x512xf32, #tpu.memory_space<vmem>>, vector<8x512xf32>
    tpu.vector_store %arg6[%c0_15, %c0_16], %32 {strides = array<i32>} : memref<8x512xf32, #tpu.memory_space<vmem>>, vector<8x512xf32>,
    return
  }
  func.func @transform_0(%arg0: i32) -> (i32, i32) {
    %c0_i32 = arith.constant 0 : i32
    %c0_i32_0 = arith.constant 0 : i32
    %c0_i32_1 = arith.constant 0 : i32
    return %c0_i32, %c0_i32_0 : i32, i32
  }
  func.func @transform_1(%arg0: i32) -> (i32, i32) {
    %c0_i32 = arith.constant 0 : i32
    %c0_i32_0 = arith.constant 0 : i32
    %c0_i32_1 = arith.constant 0 : i32
    return %c0_i32, %c0_i32_0 : i32, i32
  }
  func.func @transform_2(%arg0: i32) -> (i32, i32) {
    %c0_i32 = arith.constant 0 : i32
    %c0_i32_0 = arith.constant 0 : i32
    %c0_i32_1 = arith.constant 0 : i32
    return %c0_i32, %c0_i32_0 : i32, i32
  }
  func.func @transform_3(%arg0: i32) -> (i32, i32) {
    %c0_i32 = arith.constant 0 : i32
    %c0_i32_0 = arith.constant 0 : i32
    %c0_i32_1 = arith.constant 0 : i32
    return %c0_i32, %c0_i32_0 : i32, i32
  }
  func.func @transform_4(%arg0: i32) -> (i32, i32) {
    %c0_i32 = arith.constant 0 : i32
    %c0_i32_0 = arith.constant 0 : i32
    %c0_i32_1 = arith.constant 0 : i32
    return %c0_i32, %c0_i32_0 : i32, i32
  }
  func.func @transform_5(%arg0: i32) -> (i32, i32) {
    %c0_i32 = arith.constant 0 : i32
    %c0_i32_0 = arith.constant 0 : i32
    %c0_i32_1 = arith.constant 0 : i32
    return %c0_i32, %c0_i32_0 : i32, i32
  }
}

module attributes {stable_mosaic.version = 11 : i64} {
  func.func @_matmul_kernel(%arg0: i32, %arg1: memref<8x72xbf16, #tpu.memory_space<vmem>>, %arg2: memref<72x512xf32, #tpu.memory_space<vmem>>, %arg3: memref<8x1xf32, #tpu.memory_space<vmem>>, %arg4: memref<8x512xf32, #tpu.memory_space<vmem>>) attributes {dimension_semantics = [#tpu.dimension_semantics<arbitrary>], iteration_bounds = array<i64: 1>, scalar_prefetch = 0 : i64, scratch_operands = 0 : i64, tpu.core_type = #tpu.core_type<tc>, window_params = [{pipeline_mode = #tpu.pipeline_mode<synchronous>, transform_indices = @transform_0, window_bounds = array<i64: 8, 72>}, {pipeline_mode = #tpu.pipeline_mode<synchronous>, transform_indices = @transform_1, window_bounds = array<i64: 72, 512>}, {pipeline_mode = #tpu.pipeline_mode<synchronous>, transform_indices = @transform_2, window_bounds = array<i64: 8, 1>}, {pipeline_mode = #tpu.pipeline_mode<synchronous>, transform_indices = @transform_3, window_bounds = array<i64: 8, 512>}]} {
    %c0 = arith.constant 0 : index
    %c0_0 = arith.constant 0 : index
    %0 = vector.load %arg1[%c0, %c0_0] : memref<8x72xbf16, #tpu.memory_space<vmem>>, vector<8x72xbf16>
    %c0_1 = arith.constant 0 : index
    %c0_2 = arith.constant 0 : index
    %1 = vector.load %arg2[%c0_1, %c0_2] : memref<72x512xf32, #tpu.memory_space<vmem>>, vector<72x512xf32>
    %2 = arith.truncf %1 : vector<72x512xf32> to vector<72x512xbf16>
    %cst = arith.constant dense<0.000000e+00> : vector<8x512xf32>
    %3 = tpu.matmul %0, %2, %cst {dimension_numbers = #tpu.dot_dimension_numbers<[1], [0], [0], [1], [0, 0, 1, 1], [], []>} : vector<8x72xbf16>, vector<72x512xbf16>, vector<8x512xf32> -> vector<8x512xf32>
    %c0_3 = arith.constant 0 : index
    %c0_4 = arith.constant 0 : index
    %4 = vector.load %arg3[%c0_3, %c0_4] : memref<8x1xf32, #tpu.memory_space<vmem>>, vector<8x1xf32>
    %5 = vector.broadcast %4 : vector<8x1xf32> to vector<8x512xf32>
    %6 = arith.addf %3, %5 : vector<8x512xf32>
    %c0_5 = arith.constant 0 : index
    %c0_6 = arith.constant 0 : index
    %7 = vector.load %arg4[%c0_5, %c0_6] : memref<8x512xf32, #tpu.memory_space<vmem>>, vector<8x512xf32>
    tpu.vector_store %arg4[%c0_5, %c0_6], %6 {strides = array<i32>} : memref<8x512xf32, #tpu.memory_space<vmem>>, vector<8x512xf32>,
    return
  }
  func.func @transform_0(%arg0: i32) -> (i32, i32) {
    %c0_i32 = arith.constant 0 : i32
    %c0_i32_0 = arith.constant 0 : i32
    %c0_i32_1 = arith.constant 0 : i32
    return %c0_i32, %c0_i32_0 : i32, i32
  }
  func.func @transform_1(%arg0: i32) -> (i32, i32) {
    %c0_i32 = arith.constant 0 : i32
    %c0_i32_0 = arith.constant 0 : i32
    %c0_i32_1 = arith.constant 0 : i32
    return %c0_i32, %c0_i32_0 : i32, i32
  }
  func.func @transform_2(%arg0: i32) -> (i32, i32) {
    %c0_i32 = arith.constant 0 : i32
    %c0_i32_0 = arith.constant 0 : i32
    %c0_i32_1 = arith.constant 0 : i32
    return %c0_i32, %c0_i32_0 : i32, i32
  }
  func.func @transform_3(%arg0: i32) -> (i32, i32) {
    %c0_i32 = arith.constant 0 : i32
    %c0_i32_0 = arith.constant 0 : i32
    %c0_i32_1 = arith.constant 0 : i32
    return %c0_i32, %c0_i32_0 : i32, i32
  }
}

module attributes {stable_mosaic.version = 11 : i64} {
  func.func @_matmul_kernel(%arg0: i32, %arg1: memref<8x72xbf16, #tpu.memory_space<vmem>>, %arg2: memref<72x1024xf32, #tpu.memory_space<vmem>>, %arg3: memref<8x1xf32, #tpu.memory_space<vmem>>, %arg4: memref<8x1024xf32, #tpu.memory_space<vmem>>) attributes {dimension_semantics = [#tpu.dimension_semantics<arbitrary>], iteration_bounds = array<i64: 1>, scalar_prefetch = 0 : i64, scratch_operands = 0 : i64, tpu.core_type = #tpu.core_type<tc>, window_params = [{pipeline_mode = #tpu.pipeline_mode<synchronous>, transform_indices = @transform_0, window_bounds = array<i64: 8, 72>}, {pipeline_mode = #tpu.pipeline_mode<synchronous>, transform_indices = @transform_1, window_bounds = array<i64: 72, 1024>}, {pipeline_mode = #tpu.pipeline_mode<synchronous>, transform_indices = @transform_2, window_bounds = array<i64: 8, 1>}, {pipeline_mode = #tpu.pipeline_mode<synchronous>, transform_indices = @transform_3, window_bounds = array<i64: 8, 1024>}]} {
    %c0 = arith.constant 0 : index
    %c0_0 = arith.constant 0 : index
    %0 = vector.load %arg1[%c0, %c0_0] : memref<8x72xbf16, #tpu.memory_space<vmem>>, vector<8x72xbf16>
    %c0_1 = arith.constant 0 : index
    %c0_2 = arith.constant 0 : index
    %1 = vector.load %arg2[%c0_1, %c0_2] : memref<72x1024xf32, #tpu.memory_space<vmem>>, vector<72x1024xf32>
    %2 = arith.truncf %1 : vector<72x1024xf32> to vector<72x1024xbf16>
    %cst = arith.constant dense<0.000000e+00> : vector<8x1024xf32>
    %3 = tpu.matmul %0, %2, %cst {dimension_numbers = #tpu.dot_dimension_numbers<[1], [0], [0], [1], [0, 0, 1, 1], [], []>} : vector<8x72xbf16>, vector<72x1024xbf16>, vector<8x1024xf32> -> vector<8x1024xf32>
    %c0_3 = arith.constant 0 : index
    %c0_4 = arith.constant 0 : index
    %4 = vector.load %arg3[%c0_3, %c0_4] : memref<8x1xf32, #tpu.memory_space<vmem>>, vector<8x1xf32>
    %5 = vector.broadcast %4 : vector<8x1xf32> to vector<8x1024xf32>
    %6 = arith.addf %3, %5 : vector<8x1024xf32>
    %c0_5 = arith.constant 0 : index
    %c0_6 = arith.constant 0 : index
    %7 = vector.load %arg4[%c0_5, %c0_6] : memref<8x1024xf32, #tpu.memory_space<vmem>>, vector<8x1024xf32>
    tpu.vector_store %arg4[%c0_5, %c0_6], %6 {strides = array<i32>} : memref<8x1024xf32, #tpu.memory_space<vmem>>, vector<8x1024xf32>,
    return
  }
  func.func @transform_0(%arg0: i32) -> (i32, i32) {
    %c0_i32 = arith.constant 0 : i32
    %c0_i32_0 = arith.constant 0 : i32
    %c0_i32_1 = arith.constant 0 : i32
    return %c0_i32, %c0_i32_0 : i32, i32
  }
  func.func @transform_1(%arg0: i32) -> (i32, i32) {
    %c0_i32 = arith.constant 0 : i32
    %c0_i32_0 = arith.constant 0 : i32
    %c0_i32_1 = arith.constant 0 : i32
    return %c0_i32, %c0_i32_0 : i32, i32
  }
  func.func @transform_2(%arg0: i32) -> (i32, i32) {
    %c0_i32 = arith.constant 0 : i32
    %c0_i32_0 = arith.constant 0 : i32
    %c0_i32_1 = arith.constant 0 : i32
    return %c0_i32, %c0_i32_0 : i32, i32
  }
  func.func @transform_3(%arg0: i32) -> (i32, i32) {
    %c0_i32 = arith.constant 0 : i32
    %c0_i32_0 = arith.constant 0 : i32
    %c0_i32_1 = arith.constant 0 : i32
    return %c0_i32, %c0_i32_0 : i32, i32
  }
}

module attributes {stable_mosaic.version = 11 : i64} {
  func.func @_spp_combine_kernel(%arg0: i32, %arg1: memref<8x512xf32, #tpu.memory_space<vmem>>, %arg2: memref<8x512xf32, #tpu.memory_space<vmem>>, %arg3: memref<8x512xf32, #tpu.memory_space<vmem>>, %arg4: memref<8x512xf32, #tpu.memory_space<vmem>>, %arg5: memref<8x8xbf16, #tpu.memory_space<vmem>>, %arg6: memref<8x1xf32, #tpu.memory_space<vmem>>, %arg7: memref<8x512xf32, #tpu.memory_space<vmem>>) attributes {dimension_semantics = [#tpu.dimension_semantics<arbitrary>], iteration_bounds = array<i64: 1>, scalar_prefetch = 0 : i64, scratch_operands = 0 : i64, tpu.core_type = #tpu.core_type<tc>, window_params = [{pipeline_mode = #tpu.pipeline_mode<synchronous>, transform_indices = @transform_0, window_bounds = array<i64: 8, 512>}, {pipeline_mode = #tpu.pipeline_mode<synchronous>, transform_indices = @transform_1, window_bounds = array<i64: 8, 512>}, {pipeline_mode = #tpu.pipeline_mode<synchronous>, transform_indices = @transform_2, window_bounds = array<i64: 8, 512>}, {pipeline_mode = #tpu.pipeline_mode<synchronous>, transform_indices = @transform_3, window_bounds = array<i64: 8, 512>}, {pipeline_mode = #tpu.pipeline_mode<synchronous>, transform_indices = @transform_4, window_bounds = array<i64: 8, 8>}, {pipeline_mode = #tpu.pipeline_mode<synchronous>, transform_indices = @transform_5, window_bounds = array<i64: 8, 1>}, {pipeline_mode = #tpu.pipeline_mode<synchronous>, transform_indices = @transform_6, window_bounds = array<i64: 8, 512>}]} {
    %c0 = arith.constant 0 : index
    %c0_0 = arith.constant 0 : index
    %0 = vector.load %arg5[%c0, %c0_0] : memref<8x8xbf16, #tpu.memory_space<vmem>>, vector<8x8xbf16>
    %c0_1 = arith.constant 0 : index
    %c0_2 = arith.constant 0 : index
    %1 = vector.load %arg6[%c0_1, %c0_2] : memref<8x1xf32, #tpu.memory_space<vmem>>, vector<8x1xf32>
    %c0_3 = arith.constant 0 : index
    %c0_4 = arith.constant 0 : index
    %2 = vector.load %arg1[%c0_3, %c0_4] : memref<8x512xf32, #tpu.memory_space<vmem>>, vector<8x512xf32>
    %cst = arith.constant 0.000000e+00 : f32
    %3 = vector.broadcast %cst : f32 to vector<8x512xf32>
    %4 = arith.maximumf %2, %3 : vector<8x512xf32>
    %c0_5 = arith.constant 0 : index
    %c0_6 = arith.constant 0 : index
    %5 = vector.load %arg2[%c0_5, %c0_6] : memref<8x512xf32, #tpu.memory_space<vmem>>, vector<8x512xf32>
    %6 = arith.truncf %5 : vector<8x512xf32> to vector<8x512xbf16>
    %cst_7 = arith.constant dense<0.000000e+00> : vector<8x512xf32>
    %7 = tpu.matmul %0, %6, %cst_7 {dimension_numbers = #tpu.dot_dimension_numbers<[1], [0], [0], [1], [0, 0, 1, 1], [], []>} : vector<8x8xbf16>, vector<8x512xbf16>, vector<8x512xf32> -> vector<8x512xf32>
    %8 = vector.broadcast %1 : vector<8x1xf32> to vector<8x512xf32>
    %9 = arith.addf %7, %8 : vector<8x512xf32>
    %cst_8 = arith.constant 0.000000e+00 : f32
    %10 = vector.broadcast %cst_8 : f32 to vector<8x512xf32>
    %11 = arith.maximumf %9, %10 : vector<8x512xf32>
    %12 = arith.addf %4, %11 : vector<8x512xf32>
    %c0_9 = arith.constant 0 : index
    %c0_10 = arith.constant 0 : index
    %13 = vector.load %arg3[%c0_9, %c0_10] : memref<8x512xf32, #tpu.memory_space<vmem>>, vector<8x512xf32>
    %14 = arith.truncf %13 : vector<8x512xf32> to vector<8x512xbf16>
    %cst_11 = arith.constant dense<0.000000e+00> : vector<8x512xf32>
    %15 = tpu.matmul %0, %14, %cst_11 {dimension_numbers = #tpu.dot_dimension_numbers<[1], [0], [0], [1], [0, 0, 1, 1], [], []>} : vector<8x8xbf16>, vector<8x512xbf16>, vector<8x512xf32> -> vector<8x512xf32>
    %16 = vector.broadcast %1 : vector<8x1xf32> to vector<8x512xf32>
    %17 = arith.addf %15, %16 : vector<8x512xf32>
    %cst_12 = arith.constant 0.000000e+00 : f32
    %18 = vector.broadcast %cst_12 : f32 to vector<8x512xf32>
    %19 = arith.maximumf %17, %18 : vector<8x512xf32>
    %20 = arith.addf %12, %19 : vector<8x512xf32>
    %c0_13 = arith.constant 0 : index
    %c0_14 = arith.constant 0 : index
    %21 = vector.load %arg4[%c0_13, %c0_14] : memref<8x512xf32, #tpu.memory_space<vmem>>, vector<8x512xf32>
    %22 = arith.truncf %21 : vector<8x512xf32> to vector<8x512xbf16>
    %cst_15 = arith.constant dense<0.000000e+00> : vector<8x512xf32>
    %23 = tpu.matmul %0, %22, %cst_15 {dimension_numbers = #tpu.dot_dimension_numbers<[1], [0], [0], [1], [0, 0, 1, 1], [], []>} : vector<8x8xbf16>, vector<8x512xbf16>, vector<8x512xf32> -> vector<8x512xf32>
    %24 = vector.broadcast %1 : vector<8x1xf32> to vector<8x512xf32>
    %25 = arith.addf %23, %24 : vector<8x512xf32>
    %cst_16 = arith.constant 0.000000e+00 : f32
    %26 = vector.broadcast %cst_16 : f32 to vector<8x512xf32>
    %27 = arith.maximumf %25, %26 : vector<8x512xf32>
    %28 = arith.addf %20, %27 : vector<8x512xf32>
    %c0_17 = arith.constant 0 : index
    %c0_18 = arith.constant 0 : index
    %29 = vector.load %arg7[%c0_17, %c0_18] : memref<8x512xf32, #tpu.memory_space<vmem>>, vector<8x512xf32>
    tpu.vector_store %arg7[%c0_17, %c0_18], %28 {strides = array<i32>} : memref<8x512xf32, #tpu.memory_space<vmem>>, vector<8x512xf32>,
    return
  }
  func.func @transform_0(%arg0: i32) -> (i32, i32) {
    %c0_i32 = arith.constant 0 : i32
    %c0_i32_0 = arith.constant 0 : i32
    %c0_i32_1 = arith.constant 0 : i32
    return %c0_i32, %c0_i32_0 : i32, i32
  }
  func.func @transform_1(%arg0: i32) -> (i32, i32) {
    %c0_i32 = arith.constant 0 : i32
    %c0_i32_0 = arith.constant 0 : i32
    %c0_i32_1 = arith.constant 0 : i32
    return %c0_i32, %c0_i32_0 : i32, i32
  }
  func.func @transform_2(%arg0: i32) -> (i32, i32) {
    %c0_i32 = arith.constant 0 : i32
    %c0_i32_0 = arith.constant 0 : i32
    %c0_i32_1 = arith.constant 0 : i32
    return %c0_i32, %c0_i32_0 : i32, i32
  }
  func.func @transform_3(%arg0: i32) -> (i32, i32) {
    %c0_i32 = arith.constant 0 : i32
    %c0_i32_0 = arith.constant 0 : i32
    %c0_i32_1 = arith.constant 0 : i32
    return %c0_i32, %c0_i32_0 : i32, i32
  }
  func.func @transform_4(%arg0: i32) -> (i32, i32) {
    %c0_i32 = arith.constant 0 : i32
    %c0_i32_0 = arith.constant 0 : i32
    %c0_i32_1 = arith.constant 0 : i32
    return %c0_i32, %c0_i32_0 : i32, i32
  }
  func.func @transform_5(%arg0: i32) -> (i32, i32) {
    %c0_i32 = arith.constant 0 : i32
    %c0_i32_0 = arith.constant 0 : i32
    %c0_i32_1 = arith.constant 0 : i32
    return %c0_i32, %c0_i32_0 : i32, i32
  }
  func.func @transform_6(%arg0: i32) -> (i32, i32) {
    %c0_i32 = arith.constant 0 : i32
    %c0_i32_0 = arith.constant 0 : i32
    %c0_i32_1 = arith.constant 0 : i32
    return %c0_i32, %c0_i32_0 : i32, i32
  }
}

module attributes {stable_mosaic.version = 11 : i64} {
  func.func @_matmul_kernel(%arg0: i32, %arg1: memref<8x16xbf16, #tpu.memory_space<vmem>>, %arg2: memref<16x512xf32, #tpu.memory_space<vmem>>, %arg3: memref<8x1xf32, #tpu.memory_space<vmem>>, %arg4: memref<8x512xf32, #tpu.memory_space<vmem>>) attributes {dimension_semantics = [#tpu.dimension_semantics<arbitrary>], iteration_bounds = array<i64: 1>, scalar_prefetch = 0 : i64, scratch_operands = 0 : i64, tpu.core_type = #tpu.core_type<tc>, window_params = [{pipeline_mode = #tpu.pipeline_mode<synchronous>, transform_indices = @transform_0, window_bounds = array<i64: 8, 16>}, {pipeline_mode = #tpu.pipeline_mode<synchronous>, transform_indices = @transform_1, window_bounds = array<i64: 16, 512>}, {pipeline_mode = #tpu.pipeline_mode<synchronous>, transform_indices = @transform_2, window_bounds = array<i64: 8, 1>}, {pipeline_mode = #tpu.pipeline_mode<synchronous>, transform_indices = @transform_3, window_bounds = array<i64: 8, 512>}]} {
    %c0 = arith.constant 0 : index
    %c0_0 = arith.constant 0 : index
    %0 = vector.load %arg1[%c0, %c0_0] : memref<8x16xbf16, #tpu.memory_space<vmem>>, vector<8x16xbf16>
    %c0_1 = arith.constant 0 : index
    %c0_2 = arith.constant 0 : index
    %1 = vector.load %arg2[%c0_1, %c0_2] : memref<16x512xf32, #tpu.memory_space<vmem>>, vector<16x512xf32>
    %2 = arith.truncf %1 : vector<16x512xf32> to vector<16x512xbf16>
    %cst = arith.constant dense<0.000000e+00> : vector<8x512xf32>
    %3 = tpu.matmul %0, %2, %cst {dimension_numbers = #tpu.dot_dimension_numbers<[1], [0], [0], [1], [0, 0, 1, 1], [], []>} : vector<8x16xbf16>, vector<16x512xbf16>, vector<8x512xf32> -> vector<8x512xf32>
    %c0_3 = arith.constant 0 : index
    %c0_4 = arith.constant 0 : index
    %4 = vector.load %arg3[%c0_3, %c0_4] : memref<8x1xf32, #tpu.memory_space<vmem>>, vector<8x1xf32>
    %5 = vector.broadcast %4 : vector<8x1xf32> to vector<8x512xf32>
    %6 = arith.addf %3, %5 : vector<8x512xf32>
    %c0_5 = arith.constant 0 : index
    %c0_6 = arith.constant 0 : index
    %7 = vector.load %arg4[%c0_5, %c0_6] : memref<8x512xf32, #tpu.memory_space<vmem>>, vector<8x512xf32>
    tpu.vector_store %arg4[%c0_5, %c0_6], %6 {strides = array<i32>} : memref<8x512xf32, #tpu.memory_space<vmem>>, vector<8x512xf32>,
    return
  }
  func.func @transform_0(%arg0: i32) -> (i32, i32) {
    %c0_i32 = arith.constant 0 : i32
    %c0_i32_0 = arith.constant 0 : i32
    %c0_i32_1 = arith.constant 0 : i32
    return %c0_i32, %c0_i32_0 : i32, i32
  }
  func.func @transform_1(%arg0: i32) -> (i32, i32) {
    %c0_i32 = arith.constant 0 : i32
    %c0_i32_0 = arith.constant 0 : i32
    %c0_i32_1 = arith.constant 0 : i32
    return %c0_i32, %c0_i32_0 : i32, i32
  }
  func.func @transform_2(%arg0: i32) -> (i32, i32) {
    %c0_i32 = arith.constant 0 : i32
    %c0_i32_0 = arith.constant 0 : i32
    %c0_i32_1 = arith.constant 0 : i32
    return %c0_i32, %c0_i32_0 : i32, i32
  }
  func.func @transform_3(%arg0: i32) -> (i32, i32) {
    %c0_i32 = arith.constant 0 : i32
    %c0_i32_0 = arith.constant 0 : i32
    %c0_i32_1 = arith.constant 0 : i32
    return %c0_i32, %c0_i32_0 : i32, i32
  }
}

module attributes {stable_mosaic.version = 11 : i64} {
  func.func @_attn_kernel(%arg0: i32, %arg1: memref<1x8x256xf32, #tpu.memory_space<vmem>>, %arg2: memref<1x8x358xf32, #tpu.memory_space<vmem>>, %arg3: memref<1x8x358xf32, #tpu.memory_space<vmem>>, %arg4: memref<16x8xbf16, #tpu.memory_space<vmem>>, %arg5: memref<16x1xf32, #tpu.memory_space<vmem>>, %arg6: memref<1x16x256xf32, #tpu.memory_space<vmem>>) attributes {dimension_semantics = [#tpu.dimension_semantics<parallel>], iteration_bounds = array<i64: 2>, scalar_prefetch = 0 : i64, scratch_operands = 0 : i64, tpu.core_type = #tpu.core_type<tc>, window_params = [{transform_indices = @transform_0, window_bounds = array<i64: 1, 8, 256>}, {transform_indices = @transform_1, window_bounds = array<i64: 1, 8, 358>}, {transform_indices = @transform_2, window_bounds = array<i64: 1, 8, 358>}, {pipeline_mode = #tpu.pipeline_mode<synchronous>, transform_indices = @transform_3, window_bounds = array<i64: 16, 8>}, {pipeline_mode = #tpu.pipeline_mode<synchronous>, transform_indices = @transform_4, window_bounds = array<i64: 16, 1>}, {transform_indices = @transform_5, window_bounds = array<i64: 1, 16, 256>}]} {
    %c0 = arith.constant 0 : index
    %c0_0 = arith.constant 0 : index
    %c0_1 = arith.constant 0 : index
    %0 = vector.load %arg1[%c0, %c0_0, %c0_1] : memref<1x8x256xf32, #tpu.memory_space<vmem>>, vector<1x8x256xf32>
    %1 = vector.shape_cast %0 : vector<1x8x256xf32> to vector<8x256xf32>
    %cst = arith.constant 0.353553385 : f32
    %2 = vector.broadcast %cst : f32 to vector<8x256xf32>
    %3 = arith.mulf %1, %2 : vector<8x256xf32>
    %4 = arith.truncf %3 : vector<8x256xf32> to vector<8x256xbf16>
    %c0_2 = arith.constant 0 : index
    %c0_3 = arith.constant 0 : index
    %c0_4 = arith.constant 0 : index
    %5 = vector.load %arg2[%c0_2, %c0_3, %c0_4] : memref<1x8x358xf32, #tpu.memory_space<vmem>>, vector<1x8x358xf32>
    %6 = vector.shape_cast %5 : vector<1x8x358xf32> to vector<8x358xf32>
    %7 = arith.truncf %6 : vector<8x358xf32> to vector<8x358xbf16>
    %c0_5 = arith.constant 0 : index
    %c0_6 = arith.constant 0 : index
    %c0_7 = arith.constant 0 : index
    %8 = vector.load %arg3[%c0_5, %c0_6, %c0_7] : memref<1x8x358xf32, #tpu.memory_space<vmem>>, vector<1x8x358xf32>
    %9 = vector.shape_cast %8 : vector<1x8x358xf32> to vector<8x358xf32>
    %10 = arith.truncf %9 : vector<8x358xf32> to vector<8x358xbf16>
    %cst_8 = arith.constant dense<0.000000e+00> : vector<256x358xf32>
    %11 = tpu.matmul %4, %7, %cst_8 {dimension_numbers = #tpu.dot_dimension_numbers<[0], [0], [1], [1], [0, 1, 1, 1], [], []>} : vector<8x256xbf16>, vector<8x358xbf16>, vector<256x358xf32> -> vector<256x358xf32>
    %cst_9 = arith.constant dense<0xFF800000> : vector<256xf32>
    %12 = vector.multi_reduction <maximumf>, %11, %cst_9 [1] : vector<256x358xf32> to vector<256xf32>
    %13 = vector.shape_cast %12 : vector<256xf32> to vector<256x1xf32>
    %14 = vector.broadcast %13 : vector<256x1xf32> to vector<256x358xf32>
    %15 = arith.subf %11, %14 : vector<256x358xf32>
    %16 = math.exp %15 : vector<256x358xf32>
    %cst_10 = arith.constant dense<0.000000e+00> : vector<256xf32>
    %17 = vector.multi_reduction <add>, %16, %cst_10 [1] : vector<256x358xf32> to vector<256xf32>
    %18 = vector.shape_cast %17 : vector<256xf32> to vector<256x1xf32>
    %19 = tpu.reciprocal %18 {approx = true} : vector<256x1xf32> -> vector<256x1xf32>
    %20 = vector.broadcast %19 : vector<256x1xf32> to vector<256x358xf32>
    %21 = arith.mulf %16, %20 : vector<256x358xf32>
    %22 = arith.truncf %21 : vector<256x358xf32> to vector<256x358xbf16>
    %cst_11 = arith.constant dense<0.000000e+00> : vector<8x256xf32>
    %23 = tpu.matmul %10, %22, %cst_11 {dimension_numbers = #tpu.dot_dimension_numbers<[1], [1], [0], [0], [0, 0, 1, 0], [], []>} : vector<8x358xbf16>, vector<256x358xbf16>, vector<8x256xf32> -> vector<8x256xf32>
    %c0_12 = arith.constant 0 : index
    %c0_13 = arith.constant 0 : index
    %24 = vector.load %arg4[%c0_12, %c0_13] : memref<16x8xbf16, #tpu.memory_space<vmem>>, vector<16x8xbf16>
    %25 = arith.truncf %23 : vector<8x256xf32> to vector<8x256xbf16>
    %cst_14 = arith.constant dense<0.000000e+00> : vector<16x256xf32>
    %26 = tpu.matmul %24, %25, %cst_14 {dimension_numbers = #tpu.dot_dimension_numbers<[1], [0], [0], [1], [0, 0, 1, 1], [], []>} : vector<16x8xbf16>, vector<8x256xbf16>, vector<16x256xf32> -> vector<16x256xf32>
    %c0_15 = arith.constant 0 : index
    %c0_16 = arith.constant 0 : index
    %27 = vector.load %arg5[%c0_15, %c0_16] : memref<16x1xf32, #tpu.memory_space<vmem>>, vector<16x1xf32>
    %28 = vector.broadcast %27 : vector<16x1xf32> to vector<16x256xf32>
    %29 = arith.addf %26, %28 : vector<16x256xf32>
    %c0_17 = arith.constant 0 : index
    %c0_18 = arith.constant 0 : index
    %c0_19 = arith.constant 0 : index
    %30 = vector.load %arg6[%c0_17, %c0_18, %c0_19] : memref<1x16x256xf32, #tpu.memory_space<vmem>>, vector<1x16x256xf32>
    %31 = vector.shape_cast %30 : vector<1x16x256xf32> to vector<16x256xf32>
    %32 = vector.shape_cast %29 : vector<16x256xf32> to vector<1x16x256xf32>
    tpu.vector_store %arg6[%c0_17, %c0_18, %c0_19], %32 {strides = array<i32>} : memref<1x16x256xf32, #tpu.memory_space<vmem>>, vector<1x16x256xf32>,
    return
  }
  func.func @transform_0(%arg0: i32) -> (i32, i32, i32) {
    %c0_i32 = arith.constant 0 : i32
    %c0_i32_0 = arith.constant 0 : i32
    %c0_i32_1 = arith.constant 0 : i32
    return %arg0, %c0_i32, %c0_i32_0 : i32, i32, i32
  }
  func.func @transform_1(%arg0: i32) -> (i32, i32, i32) {
    %c0_i32 = arith.constant 0 : i32
    %c0_i32_0 = arith.constant 0 : i32
    %c0_i32_1 = arith.constant 0 : i32
    return %arg0, %c0_i32, %c0_i32_0 : i32, i32, i32
  }
  func.func @transform_2(%arg0: i32) -> (i32, i32, i32) {
    %c0_i32 = arith.constant 0 : i32
    %c0_i32_0 = arith.constant 0 : i32
    %c0_i32_1 = arith.constant 0 : i32
    return %arg0, %c0_i32, %c0_i32_0 : i32, i32, i32
  }
  func.func @transform_3(%arg0: i32) -> (i32, i32) {
    %c0_i32 = arith.constant 0 : i32
    %c0_i32_0 = arith.constant 0 : i32
    %c0_i32_1 = arith.constant 0 : i32
    return %c0_i32, %c0_i32_0 : i32, i32
  }
  func.func @transform_4(%arg0: i32) -> (i32, i32) {
    %c0_i32 = arith.constant 0 : i32
    %c0_i32_0 = arith.constant 0 : i32
    %c0_i32_1 = arith.constant 0 : i32
    return %c0_i32, %c0_i32_0 : i32, i32
  }
  func.func @transform_5(%arg0: i32) -> (i32, i32, i32) {
    %c0_i32 = arith.constant 0 : i32
    %c0_i32_0 = arith.constant 0 : i32
    %c0_i32_1 = arith.constant 0 : i32
    return %arg0, %c0_i32, %c0_i32_0 : i32, i32, i32
  }
}

module attributes {stable_mosaic.version = 11 : i64} {
  func.func @_matmul_kernel(%arg0: i32, %arg1: memref<16x16xbf16, #tpu.memory_space<vmem>>, %arg2: memref<16x512xf32, #tpu.memory_space<vmem>>, %arg3: memref<16x16xbf16, #tpu.memory_space<vmem>>, %arg4: memref<16x512xf32, #tpu.memory_space<vmem>>, %arg5: memref<16x1xf32, #tpu.memory_space<vmem>>, %arg6: memref<16x1xf32, #tpu.memory_space<vmem>>, %arg7: memref<16x1xf32, #tpu.memory_space<vmem>>, %arg8: memref<16x512xf32, #tpu.memory_space<vmem>>) attributes {dimension_semantics = [#tpu.dimension_semantics<arbitrary>], iteration_bounds = array<i64: 1>, scalar_prefetch = 0 : i64, scratch_operands = 0 : i64, tpu.core_type = #tpu.core_type<tc>, window_params = [{pipeline_mode = #tpu.pipeline_mode<synchronous>, transform_indices = @transform_0, window_bounds = array<i64: 16, 16>}, {pipeline_mode = #tpu.pipeline_mode<synchronous>, transform_indices = @transform_1, window_bounds = array<i64: 16, 512>}, {pipeline_mode = #tpu.pipeline_mode<synchronous>, transform_indices = @transform_2, window_bounds = array<i64: 16, 16>}, {pipeline_mode = #tpu.pipeline_mode<synchronous>, transform_indices = @transform_3, window_bounds = array<i64: 16, 512>}, {pipeline_mode = #tpu.pipeline_mode<synchronous>, transform_indices = @transform_4, window_bounds = array<i64: 16, 1>}, {pipeline_mode = #tpu.pipeline_mode<synchronous>, transform_indices = @transform_5, window_bounds = array<i64: 16, 1>}, {pipeline_mode = #tpu.pipeline_mode<synchronous>, transform_indices = @transform_6, window_bounds = array<i64: 16, 1>}, {pipeline_mode = #tpu.pipeline_mode<synchronous>, transform_indices = @transform_7, window_bounds = array<i64: 16, 512>}]} {
    %c0 = arith.constant 0 : index
    %c0_0 = arith.constant 0 : index
    %0 = vector.load %arg1[%c0, %c0_0] : memref<16x16xbf16, #tpu.memory_space<vmem>>, vector<16x16xbf16>
    %c0_1 = arith.constant 0 : index
    %c0_2 = arith.constant 0 : index
    %1 = vector.load %arg2[%c0_1, %c0_2] : memref<16x512xf32, #tpu.memory_space<vmem>>, vector<16x512xf32>
    %2 = arith.truncf %1 : vector<16x512xf32> to vector<16x512xbf16>
    %cst = arith.constant dense<0.000000e+00> : vector<16x512xf32>
    %3 = tpu.matmul %0, %2, %cst {dimension_numbers = #tpu.dot_dimension_numbers<[1], [0], [0], [1], [0, 0, 1, 1], [], []>} : vector<16x16xbf16>, vector<16x512xbf16>, vector<16x512xf32> -> vector<16x512xf32>
    %c0_3 = arith.constant 0 : index
    %c0_4 = arith.constant 0 : index
    %4 = vector.load %arg3[%c0_3, %c0_4] : memref<16x16xbf16, #tpu.memory_space<vmem>>, vector<16x16xbf16>
    %c0_5 = arith.constant 0 : index
    %c0_6 = arith.constant 0 : index
    %5 = vector.load %arg4[%c0_5, %c0_6] : memref<16x512xf32, #tpu.memory_space<vmem>>, vector<16x512xf32>
    %6 = arith.truncf %5 : vector<16x512xf32> to vector<16x512xbf16>
    %cst_7 = arith.constant dense<0.000000e+00> : vector<16x512xf32>
    %7 = tpu.matmul %4, %6, %cst_7 {dimension_numbers = #tpu.dot_dimension_numbers<[1], [0], [0], [1], [0, 0, 1, 1], [], []>} : vector<16x16xbf16>, vector<16x512xbf16>, vector<16x512xf32> -> vector<16x512xf32>
    %8 = arith.addf %3, %7 : vector<16x512xf32>
    %c0_8 = arith.constant 0 : index
    %c0_9 = arith.constant 0 : index
    %9 = vector.load %arg5[%c0_8, %c0_9] : memref<16x1xf32, #tpu.memory_space<vmem>>, vector<16x1xf32>
    %10 = vector.broadcast %9 : vector<16x1xf32> to vector<16x512xf32>
    %11 = arith.addf %8, %10 : vector<16x512xf32>
    %c0_10 = arith.constant 0 : index
    %c0_11 = arith.constant 0 : index
    %12 = vector.load %arg6[%c0_10, %c0_11] : memref<16x1xf32, #tpu.memory_space<vmem>>, vector<16x1xf32>
    %c0_12 = arith.constant 0 : index
    %c0_13 = arith.constant 0 : index
    %13 = vector.load %arg7[%c0_12, %c0_13] : memref<16x1xf32, #tpu.memory_space<vmem>>, vector<16x1xf32>
    %cst_14 = arith.constant dense<0.000000e+00> : vector<16xf32>
    %14 = vector.multi_reduction <add>, %11, %cst_14 [1] : vector<16x512xf32> to vector<16xf32>
    %15 = vector.shape_cast %14 : vector<16xf32> to vector<16x1xf32>
    %cst_15 = arith.constant 5.120000e+02 : f32
    %16 = vector.broadcast %cst_15 : f32 to vector<16x1xf32>
    %17 = arith.divf %15, %16 : vector<16x1xf32>
    %18 = vector.broadcast %17 : vector<16x1xf32> to vector<16x512xf32>
    %19 = arith.subf %11, %18 : vector<16x512xf32>
    %20 = arith.mulf %19, %19 : vector<16x512xf32>
    %cst_16 = arith.constant dense<0.000000e+00> : vector<16xf32>
    %21 = vector.multi_reduction <add>, %20, %cst_16 [1] : vector<16x512xf32> to vector<16xf32>
    %22 = vector.shape_cast %21 : vector<16xf32> to vector<16x1xf32>
    %cst_17 = arith.constant 5.120000e+02 : f32
    %23 = vector.broadcast %cst_17 : f32 to vector<16x1xf32>
    %24 = arith.divf %22, %23 : vector<16x1xf32>
    %25 = vector.broadcast %17 : vector<16x1xf32> to vector<16x512xf32>
    %26 = arith.subf %11, %25 : vector<16x512xf32>
    %cst_18 = arith.constant 9.99999974E-6 : f32
    %27 = vector.broadcast %cst_18 : f32 to vector<16x1xf32>
    %28 = arith.addf %24, %27 : vector<16x1xf32>
    %29 = math.rsqrt %28 : vector<16x1xf32>
    %30 = vector.broadcast %29 : vector<16x1xf32> to vector<16x512xf32>
    %31 = arith.mulf %26, %30 : vector<16x512xf32>
    %32 = vector.broadcast %12 : vector<16x1xf32> to vector<16x512xf32>
    %33 = arith.mulf %31, %32 : vector<16x512xf32>
    %34 = vector.broadcast %13 : vector<16x1xf32> to vector<16x512xf32>
    %35 = arith.addf %33, %34 : vector<16x512xf32>
    %cst_19 = arith.constant 0.000000e+00 : f32
    %36 = vector.broadcast %cst_19 : f32 to vector<16x512xf32>
    %37 = arith.maximumf %35, %36 : vector<16x512xf32>
    %c0_20 = arith.constant 0 : index
    %c0_21 = arith.constant 0 : index
    %38 = vector.load %arg8[%c0_20, %c0_21] : memref<16x512xf32, #tpu.memory_space<vmem>>, vector<16x512xf32>
    tpu.vector_store %arg8[%c0_20, %c0_21], %37 {strides = array<i32>} : memref<16x512xf32, #tpu.memory_space<vmem>>, vector<16x512xf32>,
    return
  }
  func.func @transform_0(%arg0: i32) -> (i32, i32) {
    %c0_i32 = arith.constant 0 : i32
    %c0_i32_0 = arith.constant 0 : i32
    %c0_i32_1 = arith.constant 0 : i32
    return %c0_i32, %c0_i32_0 : i32, i32
  }
  func.func @transform_1(%arg0: i32) -> (i32, i32) {
    %c0_i32 = arith.constant 0 : i32
    %c0_i32_0 = arith.constant 0 : i32
    %c0_i32_1 = arith.constant 0 : i32
    return %c0_i32, %c0_i32_0 : i32, i32
  }
  func.func @transform_2(%arg0: i32) -> (i32, i32) {
    %c0_i32 = arith.constant 0 : i32
    %c0_i32_0 = arith.constant 0 : i32
    %c0_i32_1 = arith.constant 0 : i32
    return %c0_i32, %c0_i32_0 : i32, i32
  }
  func.func @transform_3(%arg0: i32) -> (i32, i32) {
    %c0_i32 = arith.constant 0 : i32
    %c0_i32_0 = arith.constant 0 : i32
    %c0_i32_1 = arith.constant 0 : i32
    return %c0_i32, %c0_i32_0 : i32, i32
  }
  func.func @transform_4(%arg0: i32) -> (i32, i32) {
    %c0_i32 = arith.constant 0 : i32
    %c0_i32_0 = arith.constant 0 : i32
    %c0_i32_1 = arith.constant 0 : i32
    return %c0_i32, %c0_i32_0 : i32, i32
  }
  func.func @transform_5(%arg0: i32) -> (i32, i32) {
    %c0_i32 = arith.constant 0 : i32
    %c0_i32_0 = arith.constant 0 : i32
    %c0_i32_1 = arith.constant 0 : i32
    return %c0_i32, %c0_i32_0 : i32, i32
  }
  func.func @transform_6(%arg0: i32) -> (i32, i32) {
    %c0_i32 = arith.constant 0 : i32
    %c0_i32_0 = arith.constant 0 : i32
    %c0_i32_1 = arith.constant 0 : i32
    return %c0_i32, %c0_i32_0 : i32, i32
  }
  func.func @transform_7(%arg0: i32) -> (i32, i32) {
    %c0_i32 = arith.constant 0 : i32
    %c0_i32_0 = arith.constant 0 : i32
    %c0_i32_1 = arith.constant 0 : i32
    return %c0_i32, %c0_i32_0 : i32, i32
  }
}

</mosaic_0001>

<bundles_post_ra>
// kernel: hifa_forward.17
= control target key start
LH: loop header
LB: loop body
LE: loop exit
PB: predicated region body
PF: predicated region fallthrough
CT: control target
= control target key end

     0   :  { %10 = vsyncpa [#allocation3], 0  ;;  %s225_s21 = smov [#allocation2]   ;;  %s306_s0 = inlined_call_operand.hbm [shape: bf16[8,16], index: 0, kind: input, shape index: {}]   ;;  %s307_s1 = inlined_call_operand.vmem [shape: f32[16,512], index: 1, kind: input, shape index: {}]   ;;  %s308_s2 = inlined_call_operand.vmem [shape: f32[8,1], index: 2, kind: input, shape index: {}]   ;;  %s309_s3 = inlined_call_operand.vmem [shape: f32[8,1], index: 3, kind: input, shape index: {}]   ;;  %s310_s4 = inlined_call_operand.vmem [shape: f32[8,1], index: 4, kind: input, shape index: {}]   ;;  %s311_s5 = inlined_call_operand.vmem [shape: f32[8,512], index: 5, kind: output, shape index: {}]  }
   0x1   :  { %s16_s20 = sshll.u32 %s306_s0, 4  ;;  %s18_s22 = sshll.u32 %s225_s21, 4  ;;  %s17_s20 = int_to_ptr.hbm [resolvable:$true] %s16_s20  ;;  %s19_s22 = int_to_ptr.vmem [resolvable:$true] %s18_s22 }
   0x2   :  { %21 = dma.hbm_to_vmem [thread:$0]  %s17_s20, 64, %s19_s22, [#allocation3]  }
   0x3   :  { %223 = dma.done.wait [#allocation3], 64  }
   0x4   :  { %224 = vsyncadd [#allocation3], 4294967232  ;;  %v226_v0 = vmov 0   ;;  %v36_v1 = vld [vmem:[%s307_s1] sm:$0xff]  ;;  %v37_v3 = vld [vmem:[%s307_s1 + $0x8] sm:$0xff]  ;;  %vm54_vm0 = vcmask 130048  }
   0x5   :  { %192 = vset.pattern.permute.xlu0 %v226_v0  ;;  %193 = vset.pattern.permute.xlu1 %v226_v0  ;;  %v40_v2 = vld [vmem:[%s307_s1 + $0x20] sm:$0xff]  ;;  %v41_v5 = vld [vmem:[%s307_s1 + $0x28] sm:$0xff]  ;;  %v38_v6 = vld [vmem:[%s307_s1 + $0x10] sm:$0xff]  ;;  %v227_v31 = vmov 512.0  }
   0x6   :  { %194 = vset.pattern.permute.xlu2 %v226_v0  ;;  %v44_v4 = vpack.c.bf16 %v40_v2, %v36_v1  ;;  %v42_v7 = vld [vmem:[%s307_s1 + $0x30] sm:$0xff]  ;;  %v45_v8 = vpack.c.bf16 %v41_v5, %v37_v3  ;;  %v39_v10 = vld [vmem:[%s307_s1 + $0x18] sm:$0xff]  ;;  %v35_v13 = vld [vmem:[#allocation2] sm:$0xf]  ;;  %195 = vrcp.f32 %v227_v31 }
   0x7   :  { %v46_v9 = vpack.c.bf16 %v42_v7, %v38_v6  ;;  %v43_v11 = vld [vmem:[%s307_s1 + $0x38] sm:$0xff]  ;;  %v48_v14 = vld [vmem:[%s308_s2] sm:$0xff] }
   0x8   :  { %65 = vmatpush.bf16.msra.mxu0 %v44_v4  ;;  %v47_v12 = vpack.c.bf16 %v43_v11, %v39_v10  ;;  %78 = vmatpush.bf16.msra.mxu1 %v45_v8  ;;  %v111_v46 = vld [vmem:[%s310_s4] sm:$0xff] }
   0x9   :  { %91 = vmatpush.bf16.msra.mxu2 %v46_v9  ;;  %51 = vperm.xlu0 %192, %v48_v14   ;;  %v110_v52 = vld [vmem:[%s309_s3] sm:$0xff] }
   0xa   :  { %104 = vmatpush.bf16.msra.mxu3 %v47_v12  ;;  %165 = vperm.xlu2 %194, %v111_v46  }
   0xb   :  { %185 = vmatmul.msk.bf16.vlgmr.msra.gmra.mxu0 %vm54_vm0, %v35_v13  ;;  %186 = vmatmul.msk.bf16.vlgmr.msra.gmra.mxu1 %vm54_vm0, %v35_v13 }
   0xc   :  { %187 = vmatmul.msk.bf16.vlgmr.msra.gmra.mxu2 %vm54_vm0, %v35_v13  ;;  %v196_v32 = vpop.eup %195 }
   0xd   :  { %188 = vmatmul.msk.bf16.vlgmr.msra.gmra.mxu3 %vm54_vm0, %v35_v13  ;;  %v118_v33 = vmul.f32 512.0, %v196_v32  ;;  %vm122_vm1 = vweird.f32 %v196_v32 }
   0xf   :  { %v119_v34 = vsub.f32 1.0, %v118_v33 }
  0x11   :  { %v120_v35 = vmul.f32 %v196_v32, %v119_v34 }
  0x13   :  { %v121_v36 = vadd.f32 %v196_v32, %v120_v35 }
  0x15   :  { %v123_v37 = vsel %vm122_vm1, %v196_v32, %v121_v36 }
  0x64   :  { %v166_v4 = vpop.permute.xlu2 %165 }
  0x7b   :  { %v52_v15 = vpop.permute.xlu0 %51 }
  0x88   :  { %v67_v16 = vpop.f32.mrf.mxu0  ;;  %v80_v17 = vpop.f32.mrf.mxu1 }
  0x89   :  { %v68_v18 = vadd.f32 %v67_v16, %v52_v15  ;;  %v81_v19 = vadd.f32 %v80_v17, %v52_v15 }
  0x8b   :  { %v112_v20 = vadd.f32 %v81_v19, %v68_v18 }
  0x8f   :  { %v93_v21 = vpop.f32.mrf.mxu2 }
  0x90   :  { %v94_v22 = vadd.f32 %v93_v21, %v52_v15  ;;  %v106_v23 = vpop.f32.mrf.mxu3  ;;  %v69_v24 = vpop.f32.mrf.mxu0 }
  0x91   :  { %v82_v25 = vpop.f32.mrf.mxu1  ;;  %v107_v27 = vadd.f32 %v106_v23, %v52_v15 }
  0x92   :  { %v113_v26 = vadd.f32 %v112_v20, %v94_v22 }
  0x94   :  { %v114_v28 = vadd.f32 %v113_v26, %v107_v27 }
  0x96   :  { %115 = vadd.xlane.f32.xlu0 %v114_v28 }
  0x97   :  { %v95_v29 = vpop.f32.mrf.mxu2 }
  0x98   :  { %v108_v30 = vpop.f32.mrf.mxu3 }
 0x109   :  { %v116_v38 = vpop.xlane.xlu0 %115 }
 0x10a   :  { %v124_v39 = vmul.f32 %v123_v37, %v116_v38 }
 0x10c   :  { %v125_v40 = vsub.f32 %v68_v18, %v124_v39  ;;  %v126_v41 = vsub.f32 %v81_v19, %v124_v39  ;;  %v127_v42 = vsub.f32 %v94_v22, %v124_v39  ;;  %v128_v43 = vsub.f32 %v107_v27, %v124_v39 }
 0x10e   :  { %v129_v44 = vmul.f32 %v125_v40, %v125_v40  ;;  %v130_v45 = vmul.f32 %v126_v41, %v126_v41  ;;  %v131_v47 = vmul.f32 %v127_v42, %v127_v42  ;;  %v132_v49 = vmul.f32 %v128_v43, %v128_v43 }
 0x110   :  { %v133_v48 = vadd.f32 %v130_v45, %v129_v44 }
 0x112   :  { %v134_v50 = vadd.f32 %v133_v48, %v131_v47 }
 0x114   :  { %v135_v51 = vadd.f32 %v134_v50, %v132_v49 }
 0x116   :  { %136 = vadd.xlane.f32.xlu1 %v135_v51 }
 0x12f   :  { %156 = vperm.xlu1 %193, %v110_v52  }
 0x189   :  { %v137_v53 = vpop.xlane.xlu1 %136 }
 0x18a   :  { %v138_v54 = vmul.f32 %v137_v53, %v123_v37 }
 0x18c   :  { %v139_v55 = vadd.f32 1e-05, %v138_v54 }
 0x18e   :  { %197 = vrsqrt.f32 %v139_v55  ;;  %vm146_vm3 = vweird.f32 %v139_v55 }
 0x194   :  { %v198_v56 = vpop.eup %197 }
 0x195   :  { %v141_v57 = vmul.f32 %v198_v56, %v139_v55  ;;  %vm147_vm2 = vweird.f32 %v198_v56 }
 0x196   :  { %vm148_vm4 = vmor %vm146_vm3, %vm147_vm2 }
 0x197   :  { %v142_v58 = vmul.f32 %v198_v56, %v141_v57 }
 0x199   :  { %v143_v59 = vmul.f32 0.5, %v142_v58 }
 0x19b   :  { %v144_v60 = vsub.f32 1.5, %v143_v59 }
 0x19d   :  { %v145_v61 = vmul.f32 %v198_v56, %v144_v60 }
 0x19f   :  { %v149_v62 = vsel %vm148_vm4, %v198_v56, %v145_v61 }
 0x1a0   :  { %v150_v63 = vmul.f32 %v149_v62, %v125_v40  ;;  %v151_v0 = vmul.f32 %v149_v62, %v126_v41  ;;  %v152_v1 = vmul.f32 %v149_v62, %v127_v42  ;;  %v153_v2 = vmul.f32 %v149_v62, %v128_v43 }
 0x1a1   :  { %v157_v3 = vpop.permute.xlu1 %156 }
 0x1a2   :  { %v159_v5 = vmul.f32 %v157_v3, %v150_v63  ;;  %v160_v6 = vmul.f32 %v157_v3, %v151_v0  ;;  %v161_v7 = vmul.f32 %v157_v3, %v152_v1  ;;  %v162_v8 = vmul.f32 %v157_v3, %v153_v2 }
 0x1a4   :  { %v168_v9 = vadd.f32 %v166_v4, %v159_v5  ;;  %v169_v10 = vadd.f32 %v166_v4, %v160_v6  ;;  %v170_v11 = vadd.f32 %v166_v4, %v161_v7  ;;  %v171_v12 = vadd.f32 %v166_v4, %v162_v8 }
 0x1a6   :  { %v172_v13 = vmax.f32 %v168_v9, 0.0  ;;  %v173_v14 = vmax.f32 %v169_v10, 0.0  ;;  %v174_v15 = vmax.f32 %v170_v11, 0.0  ;;  %v175_v16 = vmax.f32 %v171_v12, 0.0 }
 0x1a8   :  { %176 = vst [vmem:[%s311_s5] sm:$0xff] %v172_v13 }
 0x1a9   :  { %177 = vst [vmem:[%s311_s5 + $0x8] sm:$0xff] %v173_v14 }
 0x1aa   :  { %178 = vst [vmem:[%s311_s5 + $0x10] sm:$0xff] %v174_v15 }
 0x1ab   :  { %179 = vst [vmem:[%s311_s5 + $0x18] sm:$0xff] %v175_v16 }
 0x1ac   :  { %184 = vsyncpa [#allocation3], 1 }

// kernel: hifa_forward.18
= control target key start
LH: loop header
LB: loop body
LE: loop exit
PB: predicated region body
PF: predicated region fallthrough
CT: control target
= control target key end

     0   :  { %vm82_vm0 = vcmask 1043456   ;;  %v161_v3 = vmov 0   ;;  %vm78_vm1 = vcmask 588800   ;;  %s312_s1 = inlined_call_operand.vmem [shape: f32[72,512], index: 1, kind: input, shape index: {}]   ;;  %s313_s2 = inlined_call_operand.vmem [shape: f32[8,1], index: 2, kind: input, shape index: {}]   ;;  %s314_s0 = inlined_call_operand.vmem [shape: bf16[8,72], index: 0, kind: input, shape index: {}]   ;;  %s315_s3 = inlined_call_operand.vmem [shape: f32[8,512], index: 3, kind: output, shape index: {}]  }
   0x1   :  { %v48_v0 = vld [vmem:[%s312_s1 + $0x100] sm:$0xff]  ;;  %v49_v1 = vld [vmem:[%s312_s1 + $0x108] sm:$0xff]  ;;  %v50_v2 = vld [vmem:[%s312_s1 + $0x110] sm:$0xff]  ;;  %160 = vset.pattern.permute.xlu0 %v161_v3 }
   0x2   :  { %v68_v4 = vpack.c.bf16 %v48_v0, %v48_v0  ;;  %v69_v5 = vpack.c.bf16 %v49_v1, %v49_v1  ;;  %v70_v6 = vpack.c.bf16 %v50_v2, %v50_v2  ;;  %v51_v7 = vld [vmem:[%s312_s1 + $0x118] sm:$0xff]  ;;  %v40_v8 = vld [vmem:[%s312_s1 + $0xc0] sm:$0xff]  ;;  %v41_v11 = vld [vmem:[%s312_s1 + $0xc8] sm:$0xff] }
   0x3   :  { %v44_v9 = vld [vmem:[%s312_s1 + $0xe0] sm:$0xff]  ;;  %v71_v10 = vpack.c.bf16 %v51_v7, %v51_v7  ;;  %v45_v12 = vld [vmem:[%s312_s1 + $0xe8] sm:$0xff]  ;;  %v42_v13 = vld [vmem:[%s312_s1 + $0xd0] sm:$0xff] }
   0x4   :  { %v84_v14 = vsel %vm82_vm0, %v68_v4, 0  ;;  %v87_v15 = vsel %vm82_vm0, %v69_v5, 0  ;;  %v90_v16 = vsel %vm82_vm0, %v70_v6, 0  ;;  %v46_v17 = vld [vmem:[%s312_s1 + $0xf0] sm:$0xff]  ;;  %v43_v18 = vld [vmem:[%s312_s1 + $0xd8] sm:$0xff]  ;;  %v64_v21 = vpack.c.bf16 %v44_v9, %v40_v8  ;;  %v32_v23 = vld [vmem:[%s312_s1 + $0x80] sm:$0xff] }
   0x5   :  { %v47_v19 = vld [vmem:[%s312_s1 + $0xf8] sm:$0xff]  ;;  %98 = vmatpush.bf16.msra.mxu0 %v84_v14  ;;  %111 = vmatpush.bf16.msra.mxu1 %v87_v15  ;;  %v93_v20 = vsel %vm82_vm0, %v71_v10, 0  ;;  %v65_v22 = vpack.c.bf16 %v45_v12, %v41_v11  ;;  %v36_v24 = vld [vmem:[%s312_s1 + $0xa0] sm:$0xff]  ;;  %v66_v25 = vpack.c.bf16 %v46_v17, %v42_v13  ;;  %v33_v27 = vld [vmem:[%s312_s1 + $0x88] sm:$0xff] }
   0x6   :  { %124 = vmatpush.bf16.msra.mxu2 %v90_v16  ;;  %137 = vmatpush.bf16.msra.mxu3 %v93_v20  ;;  %v67_v26 = vpack.c.bf16 %v47_v19, %v43_v18  ;;  %v37_v28 = vld [vmem:[%s312_s1 + $0xa8] sm:$0xff]  ;;  %v34_v29 = vld [vmem:[%s312_s1 + $0x90] sm:$0xff]  ;;  %v35_v31 = vld [vmem:[%s312_s1 + $0x98] sm:$0xff]  ;;  %v60_v33 = vpack.c.bf16 %v36_v24, %v32_v23 }
   0x7   :  { %v38_v30 = vld [vmem:[%s312_s1 + $0xb0] sm:$0xff]  ;;  %v39_v32 = vld [vmem:[%s312_s1 + $0xb8] sm:$0xff]  ;;  %v61_v34 = vpack.c.bf16 %v37_v28, %v33_v27  ;;  %v24_v35 = vld [vmem:[%s312_s1 + $0x40] sm:$0xff] }
   0x8   :  { %v28_v36 = vld [vmem:[%s312_s1 + $0x60] sm:$0xff]  ;;  %v62_v37 = vpack.c.bf16 %v38_v30, %v34_v29  ;;  %v63_v38 = vpack.c.bf16 %v39_v32, %v35_v31  ;;  %v25_v39 = vld [vmem:[%s312_s1 + $0x48] sm:$0xff]  ;;  %v26_v41 = vld [vmem:[%s312_s1 + $0x50] sm:$0xff] }
   0x9   :  { %99 = vmatpush.bf16.msra.mxu0 %v64_v21  ;;  %112 = vmatpush.bf16.msra.mxu1 %v65_v22  ;;  %v29_v40 = vld [vmem:[%s312_s1 + $0x68] sm:$0xff]  ;;  %v30_v42 = vld [vmem:[%s312_s1 + $0x70] sm:$0xff]  ;;  %v27_v43 = vld [vmem:[%s312_s1 + $0x58] sm:$0xff]  ;;  %v56_v45 = vpack.c.bf16 %v28_v36, %v24_v35 }
   0xa   :  { %125 = vmatpush.bf16.msra.mxu2 %v66_v25  ;;  %138 = vmatpush.bf16.msra.mxu3 %v67_v26  ;;  %v31_v44 = vld [vmem:[%s312_s1 + $0x78] sm:$0xff]  ;;  %v57_v46 = vpack.c.bf16 %v29_v40, %v25_v39  ;;  %v16_v47 = vld [vmem:[%s312_s1] sm:$0xff]  ;;  %v58_v50 = vpack.c.bf16 %v30_v42, %v26_v41  ;;  %v17_v52 = vld [vmem:[%s312_s1 + $0x8] sm:$0xff] }
   0xb   :  { %v20_v48 = vld [vmem:[%s312_s1 + $0x20] sm:$0xff]  ;;  %v59_v51 = vpack.c.bf16 %v31_v44, %v27_v43  ;;  %v21_v53 = vld [vmem:[%s312_s1 + $0x28] sm:$0xff]  ;;  %v18_v54 = vld [vmem:[%s312_s1 + $0x10] sm:$0xff] }
   0xc   :  { %v72_v49 = vld [vmem:[%s313_s2] sm:$0xff]  ;;  %v22_v55 = vld [vmem:[%s312_s1 + $0x30] sm:$0xff]  ;;  %v19_v56 = vld [vmem:[%s312_s1 + $0x18] sm:$0xff]  ;;  %v52_v58 = vpack.c.bf16 %v20_v48, %v16_v47  ;;  %v53_v59 = vpack.c.bf16 %v21_v53, %v17_v52 }
   0xd   :  { %100 = vmatpush.bf16.msra.mxu0 %v60_v33  ;;  %113 = vmatpush.bf16.msra.mxu1 %v61_v34  ;;  %v23_v57 = vld [vmem:[%s312_s1 + $0x38] sm:$0xff]  ;;  %v54_v60 = vpack.c.bf16 %v22_v55, %v18_v54  ;;  %v15_v62 = vld [vmem:[%s314_s0] sm:$0xf] }
   0xe   :  { %126 = vmatpush.bf16.msra.mxu2 %v62_v37  ;;  %139 = vmatpush.bf16.msra.mxu3 %v63_v38  ;;  %v55_v61 = vpack.c.bf16 %v23_v57, %v19_v56 }
   0xf   :  { %75 = vperm.xlu0 %160, %v72_v49  }
  0x11   :  { %101 = vmatpush.bf16.msra.mxu0 %v56_v45  ;;  %114 = vmatpush.bf16.msra.mxu1 %v57_v46 }
  0x12   :  { %127 = vmatpush.bf16.msra.mxu2 %v58_v50  ;;  %140 = vmatpush.bf16.msra.mxu3 %v59_v51 }
  0x15   :  { %102 = vmatpush.bf16.msra.mxu0 %v52_v58  ;;  %115 = vmatpush.bf16.msra.mxu1 %v53_v59 }
  0x16   :  { %128 = vmatpush.bf16.msra.mxu2 %v54_v60  ;;  %141 = vmatpush.bf16.msra.mxu3 %v55_v61 }
  0x18   :  { %155 = vmatmul.msk.bf16.vlgmr.msra.gmra.mxu0 %vm78_vm1, %v15_v62  ;;  %156 = vmatmul.msk.bf16.vlgmr.msra.gmra.mxu1 %vm78_vm1, %v15_v62 }
  0x19   :  { %157 = vmatmul.msk.bf16.vlgmr.msra.gmra.mxu2 %vm78_vm1, %v15_v62  ;;  %158 = vmatmul.msk.bf16.vlgmr.msra.gmra.mxu3 %vm78_vm1, %v15_v62 }
  0x81   :  { %v76_v63 = vpop.permute.xlu0 %75 }
  0x95   :  { %v104_v0 = vpop.f32.mrf.mxu0  ;;  %v117_v1 = vpop.f32.mrf.mxu1 }
  0x96   :  { %v105_v2 = vadd.f32 %v104_v0, %v76_v63  ;;  %v118_v3 = vadd.f32 %v117_v1, %v76_v63 }
  0x98   :  { %147 = vst [vmem:[%s315_s3] sm:$0xff] %v105_v2 }
  0x99   :  { %148 = vst [vmem:[%s315_s3 + $0x8] sm:$0xff] %v118_v3 }
  0x9c   :  { %v130_v4 = vpop.f32.mrf.mxu2  ;;  %v143_v5 = vpop.f32.mrf.mxu3 }
  0x9d   :  { %v131_v6 = vadd.f32 %v130_v4, %v76_v63  ;;  %v144_v7 = vadd.f32 %v143_v5, %v76_v63  ;;  %v106_v8 = vpop.f32.mrf.mxu0  ;;  %v119_v9 = vpop.f32.mrf.mxu1 }
  0x9f   :  { %149 = vst [vmem:[%s315_s3 + $0x10] sm:$0xff] %v131_v6 }
  0xa0   :  { %150 = vst [vmem:[%s315_s3 + $0x18] sm:$0xff] %v144_v7 }
  0xa4   :  { %v132_v10 = vpop.f32.mrf.mxu2  ;;  %v145_v11 = vpop.f32.mrf.mxu3 }

// kernel: hifa_forward.19
= control target key start
LH: loop header
LB: loop body
LE: loop exit
PB: predicated region body
PF: predicated region fallthrough
CT: control target
= control target key end

     0   :  { %vm138_vm0 = vcmask 1043456   ;;  %v289_v44 = vmov 0   ;;  %vm134_vm1 = vcmask 588800   ;;  %s582_s1 = inlined_call_operand.vmem [shape: f32[72,1024], index: 1, kind: input, shape index: {}]   ;;  %s583_s0 = inlined_call_operand.vmem [shape: bf16[8,72], index: 0, kind: input, shape index: {}]   ;;  %s584_s2 = inlined_call_operand.vmem [shape: f32[8,1], index: 2, kind: input, shape index: {}]   ;;  %s585_s3 = inlined_call_operand.vmem [shape: f32[8,1024], index: 3, kind: output, shape index: {}]  }
   0x1   :  { %v80_v0 = vld [vmem:[%s582_s1 + $0x200] sm:$0xff]  ;;  %v81_v1 = vld [vmem:[%s582_s1 + $0x208] sm:$0xff]  ;;  %v82_v2 = vld [vmem:[%s582_s1 + $0x210] sm:$0xff]  ;;  %288 = vset.pattern.permute.xlu0 %v289_v44 }
   0x2   :  { %v120_v3 = vpack.c.bf16 %v80_v0, %v80_v0  ;;  %v121_v4 = vpack.c.bf16 %v81_v1, %v81_v1  ;;  %v122_v5 = vpack.c.bf16 %v82_v2, %v82_v2  ;;  %v83_v6 = vld [vmem:[%s582_s1 + $0x218] sm:$0xff]  ;;  %v64_v7 = vld [vmem:[%s582_s1 + $0x180] sm:$0xff]  ;;  %v65_v10 = vld [vmem:[%s582_s1 + $0x188] sm:$0xff] }
   0x3   :  { %v72_v8 = vld [vmem:[%s582_s1 + $0x1c0] sm:$0xff]  ;;  %v123_v9 = vpack.c.bf16 %v83_v6, %v83_v6  ;;  %v73_v11 = vld [vmem:[%s582_s1 + $0x1c8] sm:$0xff]  ;;  %v66_v12 = vld [vmem:[%s582_s1 + $0x190] sm:$0xff] }
   0x4   :  { %v140_v13 = vsel %vm138_vm0, %v120_v3, 0  ;;  %v143_v14 = vsel %vm138_vm0, %v121_v4, 0  ;;  %v146_v15 = vsel %vm138_vm0, %v122_v5, 0  ;;  %v74_v16 = vld [vmem:[%s582_s1 + $0x1d0] sm:$0xff]  ;;  %v67_v17 = vld [vmem:[%s582_s1 + $0x198] sm:$0xff]  ;;  %v112_v20 = vpack.c.bf16 %v72_v8, %v64_v7  ;;  %v48_v22 = vld [vmem:[%s582_s1 + $0x100] sm:$0xff] }
   0x5   :  { %v75_v18 = vld [vmem:[%s582_s1 + $0x1d8] sm:$0xff]  ;;  %166 = vmatpush.bf16.msra.mxu0 %v140_v13  ;;  %179 = vmatpush.bf16.msra.mxu1 %v143_v14  ;;  %v149_v19 = vsel %vm138_vm0, %v123_v9, 0  ;;  %v113_v21 = vpack.c.bf16 %v73_v11, %v65_v10  ;;  %v56_v23 = vld [vmem:[%s582_s1 + $0x140] sm:$0xff]  ;;  %v114_v24 = vpack.c.bf16 %v74_v16, %v66_v12  ;;  %v49_v26 = vld [vmem:[%s582_s1 + $0x108] sm:$0xff] }
   0x6   :  { %192 = vmatpush.bf16.msra.mxu2 %v146_v15  ;;  %205 = vmatpush.bf16.msra.mxu3 %v149_v19  ;;  %v115_v25 = vpack.c.bf16 %v75_v18, %v67_v17  ;;  %v57_v27 = vld [vmem:[%s582_s1 + $0x148] sm:$0xff]  ;;  %v50_v28 = vld [vmem:[%s582_s1 + $0x110] sm:$0xff]  ;;  %v51_v30 = vld [vmem:[%s582_s1 + $0x118] sm:$0xff]  ;;  %v104_v32 = vpack.c.bf16 %v56_v23, %v48_v22 }
   0x7   :  { %v58_v29 = vld [vmem:[%s582_s1 + $0x150] sm:$0xff]  ;;  %v59_v31 = vld [vmem:[%s582_s1 + $0x158] sm:$0xff]  ;;  %v105_v33 = vpack.c.bf16 %v57_v27, %v49_v26  ;;  %v32_v34 = vld [vmem:[%s582_s1 + $0x80] sm:$0xff] }
   0x8   :  { %v40_v35 = vld [vmem:[%s582_s1 + $0xc0] sm:$0xff]  ;;  %v106_v36 = vpack.c.bf16 %v58_v29, %v50_v28  ;;  %v107_v37 = vpack.c.bf16 %v59_v31, %v51_v30  ;;  %v33_v38 = vld [vmem:[%s582_s1 + $0x88] sm:$0xff]  ;;  %v34_v40 = vld [vmem:[%s582_s1 + $0x90] sm:$0xff] }
   0x9   :  { %167 = vmatpush.bf16.msra.mxu0 %v112_v20  ;;  %180 = vmatpush.bf16.msra.mxu1 %v113_v21  ;;  %v41_v39 = vld [vmem:[%s582_s1 + $0xc8] sm:$0xff]  ;;  %v42_v41 = vld [vmem:[%s582_s1 + $0xd0] sm:$0xff]  ;;  %v35_v42 = vld [vmem:[%s582_s1 + $0x98] sm:$0xff]  ;;  %v96_v48 = vpack.c.bf16 %v40_v35, %v32_v34 }
   0xa   :  { %193 = vmatpush.bf16.msra.mxu2 %v114_v24  ;;  %206 = vmatpush.bf16.msra.mxu3 %v115_v25  ;;  %v43_v43 = vld [vmem:[%s582_s1 + $0xd8] sm:$0xff]  ;;  %v16_v45 = vld [vmem:[%s582_s1] sm:$0xff]  ;;  %v17_v47 = vld [vmem:[%s582_s1 + $0x8] sm:$0xff]  ;;  %v97_v49 = vpack.c.bf16 %v41_v39, %v33_v38  ;;  %v98_v53 = vpack.c.bf16 %v42_v41, %v34_v40 }
   0xb   :  { %v24_v46 = vld [vmem:[%s582_s1 + $0x40] sm:$0xff]  ;;  %v25_v50 = vld [vmem:[%s582_s1 + $0x48] sm:$0xff]  ;;  %v99_v54 = vpack.c.bf16 %v43_v43, %v35_v42  ;;  %v18_v55 = vld [vmem:[%s582_s1 + $0x10] sm:$0xff] }
   0xc   :  { %v84_v51 = vld [vmem:[%s582_s1 + $0x220] sm:$0xff]  ;;  %v85_v52 = vld [vmem:[%s582_s1 + $0x228] sm:$0xff]  ;;  %v86_v56 = vld [vmem:[%s582_s1 + $0x230] sm:$0xff]  ;;  %v88_v61 = vpack.c.bf16 %v24_v46, %v16_v45  ;;  %v89_v0 = vpack.c.bf16 %v25_v50, %v17_v47 }
   0xd   :  { %168 = vmatpush.bf16.msra.mxu0 %v104_v32  ;;  %181 = vmatpush.bf16.msra.mxu1 %v105_v33  ;;  %v87_v57 = vld [vmem:[%s582_s1 + $0x238] sm:$0xff]  ;;  %v26_v58 = vld [vmem:[%s582_s1 + $0x50] sm:$0xff]  ;;  %v124_v62 = vpack.c.bf16 %v84_v51, %v84_v51  ;;  %v125_v63 = vpack.c.bf16 %v85_v52, %v85_v52  ;;  %v126_v1 = vpack.c.bf16 %v86_v56, %v86_v56  ;;  %v68_v5 = vld [vmem:[%s582_s1 + $0x1a0] sm:$0xff] }
   0xe   :  { %194 = vmatpush.bf16.msra.mxu2 %v106_v36  ;;  %207 = vmatpush.bf16.msra.mxu3 %v107_v37  ;;  %v19_v59 = vld [vmem:[%s582_s1 + $0x18] sm:$0xff]  ;;  %v127_v2 = vpack.c.bf16 %v87_v57, %v87_v57  ;;  %v90_v3 = vpack.c.bf16 %v26_v58, %v18_v55  ;;  %v76_v6 = vld [vmem:[%s582_s1 + $0x1e0] sm:$0xff]  ;;  %v69_v9 = vld [vmem:[%s582_s1 + $0x1a8] sm:$0xff] }
   0xf   :  { %v27_v60 = vld [vmem:[%s582_s1 + $0x58] sm:$0xff]  ;;  %v152_v7 = vsel %vm138_vm0, %v124_v62, 0  ;;  %v155_v8 = vsel %vm138_vm0, %v125_v63, 0  ;;  %v77_v10 = vld [vmem:[%s582_s1 + $0x1e8] sm:$0xff]  ;;  %v70_v11 = vld [vmem:[%s582_s1 + $0x1b0] sm:$0xff]  ;;  %v158_v12 = vsel %vm138_vm0, %v126_v1, 0  ;;  %v116_v18 = vpack.c.bf16 %v76_v6, %v68_v5 }
  0x10   :  { %v91_v4 = vpack.c.bf16 %v27_v60, %v19_v59  ;;  %v161_v13 = vsel %vm138_vm0, %v127_v2, 0  ;;  %v78_v14 = vld [vmem:[%s582_s1 + $0x1f0] sm:$0xff]  ;;  %v71_v15 = vld [vmem:[%s582_s1 + $0x1b8] sm:$0xff]  ;;  %v465_v17 = vld [vmem:[%s583_s0] sm:$0xf]  ;;  %v117_v19 = vpack.c.bf16 %v77_v10, %v69_v9 }
  0x11   :  { %169 = vmatpush.bf16.msra.mxu0 %v96_v48  ;;  %182 = vmatpush.bf16.msra.mxu1 %v97_v49  ;;  %v79_v16 = vld [vmem:[%s582_s1 + $0x1f8] sm:$0xff]  ;;  %v52_v20 = vld [vmem:[%s582_s1 + $0x120] sm:$0xff]  ;;  %v118_v22 = vpack.c.bf16 %v78_v14, %v70_v11  ;;  %v53_v24 = vld [vmem:[%s582_s1 + $0x128] sm:$0xff] }
  0x12   :  { %195 = vmatpush.bf16.msra.mxu2 %v98_v53  ;;  %208 = vmatpush.bf16.msra.mxu3 %v99_v54  ;;  %v60_v21 = vld [vmem:[%s582_s1 + $0x160] sm:$0xff]  ;;  %v119_v23 = vpack.c.bf16 %v79_v16, %v71_v15  ;;  %v61_v25 = vld [vmem:[%s582_s1 + $0x168] sm:$0xff]  ;;  %v54_v26 = vld [vmem:[%s582_s1 + $0x130] sm:$0xff] }
  0x13   :  { %v62_v27 = vld [vmem:[%s582_s1 + $0x170] sm:$0xff]  ;;  %v55_v28 = vld [vmem:[%s582_s1 + $0x138] sm:$0xff]  ;;  %v128_v30 = vld [vmem:[%s584_s2] sm:$0xff]  ;;  %v108_v31 = vpack.c.bf16 %v60_v21, %v52_v20  ;;  %v109_v32 = vpack.c.bf16 %v61_v25, %v53_v24 }
  0x14   :  { %v63_v29 = vld [vmem:[%s582_s1 + $0x178] sm:$0xff]  ;;  %v36_v33 = vld [vmem:[%s582_s1 + $0xa0] sm:$0xff]  ;;  %v110_v35 = vpack.c.bf16 %v62_v27, %v54_v26  ;;  %v37_v37 = vld [vmem:[%s582_s1 + $0xa8] sm:$0xff]  ;;  %131 = vperm.xlu0 %288, %v128_v30  }
  0x15   :  { %170 = vmatpush.bf16.msra.mxu0 %v88_v61  ;;  %183 = vmatpush.bf16.msra.mxu1 %v89_v0  ;;  %v44_v34 = vld [vmem:[%s582_s1 + $0xe0] sm:$0xff]  ;;  %v111_v36 = vpack.c.bf16 %v63_v29, %v55_v28  ;;  %v45_v38 = vld [vmem:[%s582_s1 + $0xe8] sm:$0xff]  ;;  %v38_v39 = vld [vmem:[%s582_s1 + $0xb0] sm:$0xff] }
  0x16   :  { %196 = vmatpush.bf16.msra.mxu2 %v90_v3  ;;  %209 = vmatpush.bf16.msra.mxu3 %v91_v4  ;;  %v46_v40 = vld [vmem:[%s582_s1 + $0xf0] sm:$0xff]  ;;  %v39_v41 = vld [vmem:[%s582_s1 + $0xb8] sm:$0xff]  ;;  %v100_v43 = vpack.c.bf16 %v44_v34, %v36_v33  ;;  %v101_v44 = vpack.c.bf16 %v45_v38, %v37_v37  ;;  %v20_v45 = vld [vmem:[%s582_s1 + $0x20] sm:$0xff] }
  0x17   :  { %v47_v42 = vld [vmem:[%s582_s1 + $0xf8] sm:$0xff]  ;;  %v28_v46 = vld [vmem:[%s582_s1 + $0x60] sm:$0xff]  ;;  %v102_v47 = vpack.c.bf16 %v46_v40, %v38_v39  ;;  %v21_v49 = vld [vmem:[%s582_s1 + $0x28] sm:$0xff] }
  0x18   :  { %279 = vmatmul.msk.bf16.vlgmr.msra.gmra.mxu0 %vm134_vm1, %v465_v17  ;;  %280 = vmatmul.msk.bf16.vlgmr.msra.gmra.mxu1 %vm134_vm1, %v465_v17  ;;  %v103_v48 = vpack.c.bf16 %v47_v42, %v39_v41  ;;  %v29_v50 = vld [vmem:[%s582_s1 + $0x68] sm:$0xff]  ;;  %v22_v51 = vld [vmem:[%s582_s1 + $0x30] sm:$0xff]  ;;  %v23_v53 = vld [vmem:[%s582_s1 + $0x38] sm:$0xff]  ;;  %v92_v55 = vpack.c.bf16 %v28_v46, %v20_v45 }
  0x19   :  { %218 = vmatpush.bf16.msrb.mxu0 %v152_v7  ;;  %231 = vmatpush.bf16.msrb.mxu1 %v155_v8  ;;  %v30_v52 = vld [vmem:[%s582_s1 + $0x70] sm:$0xff]  ;;  %v31_v54 = vld [vmem:[%s582_s1 + $0x78] sm:$0xff]  ;;  %v93_v56 = vpack.c.bf16 %v29_v50, %v21_v49 }
  0x1a   :  { %244 = vmatpush.bf16.msrb.mxu2 %v158_v12  ;;  %257 = vmatpush.bf16.msrb.mxu3 %v161_v13  ;;  %v94_v57 = vpack.c.bf16 %v30_v52, %v22_v51  ;;  %v95_v58 = vpack.c.bf16 %v31_v54, %v23_v53 }
  0x1b   :  { %281 = vmatmul.msk.bf16.vlgmr.msra.gmra.mxu2 %vm134_vm1, %v465_v17  ;;  %282 = vmatmul.msk.bf16.vlgmr.msra.gmra.mxu3 %vm134_vm1, %v465_v17 }
  0x1d   :  { %219 = vmatpush.bf16.msrb.mxu0 %v116_v18  ;;  %232 = vmatpush.bf16.msrb.mxu1 %v117_v19 }
  0x1e   :  { %245 = vmatpush.bf16.msrb.mxu2 %v118_v22  ;;  %258 = vmatpush.bf16.msrb.mxu3 %v119_v23 }
  0x21   :  { %220 = vmatpush.bf16.msrb.mxu0 %v108_v31  ;;  %233 = vmatpush.bf16.msrb.mxu1 %v109_v32 }
  0x22   :  { %246 = vmatpush.bf16.msrb.mxu2 %v110_v35  ;;  %259 = vmatpush.bf16.msrb.mxu3 %v111_v36 }
  0x25   :  { %221 = vmatpush.bf16.msrb.mxu0 %v100_v43  ;;  %234 = vmatpush.bf16.msrb.mxu1 %v101_v44 }
  0x26   :  { %247 = vmatpush.bf16.msrb.mxu2 %v102_v47  ;;  %260 = vmatpush.bf16.msrb.mxu3 %v103_v48 }
  0x29   :  { %222 = vmatpush.bf16.msrb.mxu0 %v92_v55  ;;  %235 = vmatpush.bf16.msrb.mxu1 %v93_v56 }
  0x2a   :  { %248 = vmatpush.bf16.msrb.mxu2 %v94_v57  ;;  %261 = vmatpush.bf16.msrb.mxu3 %v95_v58 }
  0x2c   :  { %283 = vmatmul.msk.bf16.vlgmr.msrb.gmra.mxu0 %vm134_vm1, %v465_v17  ;;  %284 = vmatmul.msk.bf16.vlgmr.msrb.gmra.mxu1 %vm134_vm1, %v465_v17 }
  0x2d   :  { %285 = vmatmul.msk.bf16.vlgmr.msrb.gmra.mxu2 %vm134_vm1, %v465_v17  ;;  %286 = vmatmul.msk.bf16.vlgmr.msrb.gmra.mxu3 %vm134_vm1, %v465_v17 }
  0x86   :  { %v132_v59 = vpop.permute.xlu0 %131 }
  0x95   :  { %v172_v60 = vpop.f32.mrf.mxu0  ;;  %v185_v61 = vpop.f32.mrf.mxu1 }
  0x96   :  { %v173_v62 = vadd.f32 %v172_v60, %v132_v59  ;;  %v186_v63 = vadd.f32 %v185_v61, %v132_v59 }
  0x98   :  { %267 = vst [vmem:[%s585_s3] sm:$0xff] %v173_v62 }
  0x99   :  { %268 = vst [vmem:[%s585_s3 + $0x8] sm:$0xff] %v186_v63 }
  0x9d   :  { %v174_v4 = vpop.f32.mrf.mxu0  ;;  %v187_v5 = vpop.f32.mrf.mxu1 }
  0x9e   :  { %v198_v0 = vpop.f32.mrf.mxu2  ;;  %v211_v1 = vpop.f32.mrf.mxu3 }
  0x9f   :  { %v199_v2 = vadd.f32 %v198_v0, %v132_v59  ;;  %v212_v3 = vadd.f32 %v211_v1, %v132_v59 }
  0xa1   :  { %269 = vst [vmem:[%s585_s3 + $0x10] sm:$0xff] %v199_v2 }
  0xa2   :  { %270 = vst [vmem:[%s585_s3 + $0x18] sm:$0xff] %v212_v3 }
  0xa6   :  { %v200_v6 = vpop.f32.mrf.mxu2  ;;  %v213_v7 = vpop.f32.mrf.mxu3 }
  0xa9   :  { %v224_v8 = vpop.f32.mrf.mxu0  ;;  %v237_v9 = vpop.f32.mrf.mxu1 }
  0xaa   :  { %v225_v10 = vadd.f32 %v224_v8, %v132_v59  ;;  %v238_v11 = vadd.f32 %v237_v9, %v132_v59 }
  0xac   :  { %271 = vst [vmem:[%s585_s3 + $0x20] sm:$0xff] %v225_v10 }
  0xad   :  { %272 = vst [vmem:[%s585_s3 + $0x28] sm:$0xff] %v238_v11 }
  0xb0   :  { %v250_v12 = vpop.f32.mrf.mxu2  ;;  %v263_v13 = vpop.f32.mrf.mxu3 }
  0xb1   :  { %v251_v14 = vadd.f32 %v250_v12, %v132_v59  ;;  %v264_v15 = vadd.f32 %v263_v13, %v132_v59  ;;  %v226_v16 = vpop.f32.mrf.mxu0  ;;  %v239_v17 = vpop.f32.mrf.mxu1 }
  0xb3   :  { %273 = vst [vmem:[%s585_s3 + $0x30] sm:$0xff] %v251_v14 }
  0xb4   :  { %274 = vst [vmem:[%s585_s3 + $0x38] sm:$0xff] %v264_v15 }
  0xb8   :  { %v252_v18 = vpop.f32.mrf.mxu2  ;;  %v265_v19 = vpop.f32.mrf.mxu3 }

// kernel: hifa_forward.21
= control target key start
LH: loop header
LB: loop body
LE: loop exit
PB: predicated region body
PF: predicated region fallthrough
CT: control target
= control target key end

     0   :  { %vm51_vm0 = vcmask 1043456   ;;  %v306_v3 = vmov 0   ;;  %vm47_vm1 = vcmask 64512   ;;  %s432_s1 = inlined_call_operand.vmem [shape: f32[8,512], index: 1, kind: input, shape index: {}]   ;;  %s433_s2 = inlined_call_operand.vmem [shape: f32[8,512], index: 2, kind: input, shape index: {}]   ;;  %s434_s3 = inlined_call_operand.vmem [shape: f32[8,512], index: 3, kind: input, shape index: {}]   ;;  %s435_s4 = inlined_call_operand.vmem [shape: bf16[8,8], index: 4, kind: input, shape index: {}]   ;;  %s436_s5 = inlined_call_operand.vmem [shape: f32[8,1], index: 5, kind: input, shape index: {}]   ;;  %s437_s0 = inlined_call_operand.vmem [shape: f32[8,512], index: 0, kind: input, shape index: {}]   ;;  %s438_s6 = inlined_call_operand.vmem [shape: f32[8,512], index: 6, kind: output, shape index: {}]  }
   0x1   :  { %v34_v0 = vld [vmem:[%s432_s1] sm:$0xff]  ;;  %v35_v1 = vld [vmem:[%s432_s1 + $0x8] sm:$0xff]  ;;  %v36_v2 = vld [vmem:[%s432_s1 + $0x10] sm:$0xff]  ;;  %305 = vset.pattern.permute.xlu0 %v306_v3 }
   0x2   :  { %v38_v4 = vpack.c.bf16 %v34_v0, %v34_v0  ;;  %v39_v5 = vpack.c.bf16 %v35_v1, %v35_v1  ;;  %v40_v6 = vpack.c.bf16 %v36_v2, %v36_v2  ;;  %v37_v7 = vld [vmem:[%s432_s1 + $0x18] sm:$0xff]  ;;  %v126_v8 = vld [vmem:[%s433_s2 + $0x10] sm:$0xff]  ;;  %v124_v12 = vld [vmem:[%s433_s2] sm:$0xff] }
   0x3   :  { %v41_v9 = vpack.c.bf16 %v37_v7, %v37_v7  ;;  %v130_v10 = vpack.c.bf16 %v126_v8, %v126_v8  ;;  %v127_v11 = vld [vmem:[%s433_s2 + $0x18] sm:$0xff]  ;;  %v125_v13 = vld [vmem:[%s433_s2 + $0x8] sm:$0xff]  ;;  %v206_v18 = vld [vmem:[%s434_s3 + $0x10] sm:$0xff]  ;;  %v128_v23 = vpack.c.bf16 %v124_v12, %v124_v12 }
   0x4   :  { %v53_v14 = vsel %vm51_vm0, %v38_v4, 0  ;;  %v56_v15 = vsel %vm51_vm0, %v39_v5, 0  ;;  %v59_v16 = vsel %vm51_vm0, %v40_v6, 0  ;;  %v131_v17 = vpack.c.bf16 %v127_v11, %v127_v11  ;;  %v207_v19 = vld [vmem:[%s434_s3 + $0x18] sm:$0xff]  ;;  %v24_v21 = vld [vmem:[%s435_s4] sm:$0xf] }
   0x5   :  { %71 = vmatpush.bf16.msra.mxu0 %v53_v14  ;;  %84 = vmatpush.bf16.msra.mxu1 %v56_v15  ;;  %v62_v20 = vsel %vm51_vm0, %v41_v9, 0  ;;  %v139_v22 = vsel %vm51_vm0, %v130_v10, 0  ;;  %v129_v24 = vpack.c.bf16 %v125_v13, %v125_v13  ;;  %v204_v25 = vld [vmem:[%s434_s3] sm:$0xff]  ;;  %v205_v26 = vld [vmem:[%s434_s3 + $0x8] sm:$0xff]  ;;  %v210_v28 = vpack.c.bf16 %v206_v18, %v206_v18  ;;  %v28_v8 = vld [vmem:[%s437_s0 + $0x10] sm:$0xff] }
   0x6   :  { %97 = vmatpush.bf16.msra.mxu2 %v59_v16  ;;  %110 = vmatpush.bf16.msra.mxu3 %v62_v20  ;;  %v142_v27 = vsel %vm51_vm0, %v131_v17, 0  ;;  %v211_v29 = vpack.c.bf16 %v207_v19, %v207_v19  ;;  %v208_v30 = vpack.c.bf16 %v204_v25, %v204_v25  ;;  %v133_v31 = vsel %vm51_vm0, %v128_v23, 0  ;;  %v25_v36 = vld [vmem:[%s436_s5] sm:$0xff]  ;;  %v27_v57 = vld [vmem:[%s437_s0 + $0x8] sm:$0xff]  ;;  %v29_v9 = vld [vmem:[%s437_s0 + $0x18] sm:$0xff] }
   0x7   :  { %v136_v32 = vsel %vm51_vm0, %v129_v24, 0  ;;  %v209_v33 = vpack.c.bf16 %v205_v26, %v205_v26  ;;  %v219_v34 = vsel %vm51_vm0, %v210_v28, 0  ;;  %44 = vperm.xlu0 %305, %v25_v36   ;;  %v26_v56 = vld [vmem:[%s437_s0] sm:$0xff]  ;;  %v31_v62 = vmax.f32 %v27_v57, 0.0 }
   0x8   :  { %292 = vmatmul.msk.bf16.vlgmr.msra.gmra.mxu0 %vm47_vm1, %v24_v21  ;;  %293 = vmatmul.msk.bf16.vlgmr.msra.gmra.mxu1 %vm47_vm1, %v24_v21  ;;  %v222_v35 = vsel %vm51_vm0, %v211_v29, 0  ;;  %v213_v37 = vsel %vm51_vm0, %v208_v30, 0  ;;  %v30_v60 = vmax.f32 %v26_v56, 0.0  ;;  %v32_v20 = vmax.f32 %v28_v8, 0.0 }
   0x9   :  { %294 = vmatmul.msk.bf16.vlgmr.msra.gmra.mxu2 %vm47_vm1, %v24_v21  ;;  %295 = vmatmul.msk.bf16.vlgmr.msra.gmra.mxu3 %vm47_vm1, %v24_v21  ;;  %v216_v38 = vsel %vm51_vm0, %v209_v33, 0 }
   0xa   :  { %177 = vmatpush.bf16.msrb.mxu2 %v139_v22  ;;  %190 = vmatpush.bf16.msrb.mxu3 %v142_v27  ;;  %v33_v22 = vmax.f32 %v29_v9, 0.0 }
   0xb   :  { %151 = vmatpush.bf16.msrb.mxu0 %v133_v31  ;;  %164 = vmatpush.bf16.msrb.mxu1 %v136_v32 }
   0xe   :  { %257 = vmatpush.bf16.msra.mxu2 %v219_v34  ;;  %270 = vmatpush.bf16.msra.mxu3 %v222_v35 }
   0xf   :  { %231 = vmatpush.bf16.msra.mxu0 %v213_v37  ;;  %244 = vmatpush.bf16.msra.mxu1 %v216_v38 }
  0x18   :  { %296 = vmatmul.msk.bf16.vlgmr.msrb.gmra.mxu0 %vm47_vm1, %v24_v21  ;;  %297 = vmatmul.msk.bf16.vlgmr.msrb.gmra.mxu1 %vm47_vm1, %v24_v21 }
  0x19   :  { %298 = vmatmul.msk.bf16.vlgmr.msrb.gmra.mxu2 %vm47_vm1, %v24_v21  ;;  %299 = vmatmul.msk.bf16.vlgmr.msrb.gmra.mxu3 %vm47_vm1, %v24_v21 }
  0x28   :  { %300 = vmatmul.msk.bf16.vlgmr.msra.gmra.mxu0 %vm47_vm1, %v24_v21  ;;  %301 = vmatmul.msk.bf16.vlgmr.msra.gmra.mxu1 %vm47_vm1, %v24_v21 }
  0x29   :  { %302 = vmatmul.msk.bf16.vlgmr.msra.gmra.mxu2 %vm47_vm1, %v24_v21  ;;  %303 = vmatmul.msk.bf16.vlgmr.msra.gmra.mxu3 %vm47_vm1, %v24_v21 }
  0x79   :  { %v45_v49 = vpop.permute.xlu0 %44 }
  0x85   :  { %v73_v39 = vpop.f32.mrf.mxu0  ;;  %v86_v40 = vpop.f32.mrf.mxu1 }
  0x86   :  { %v74_v54 = vadd.f32 %v73_v39, %v45_v49  ;;  %v87_v55 = vadd.f32 %v86_v40, %v45_v49 }
  0x88   :  { %v116_v61 = vmax.f32 %v74_v54, 0.0  ;;  %v117_v63 = vmax.f32 %v87_v55, 0.0 }
  0x8a   :  { %v120_v10 = vadd.f32 %v116_v61, %v30_v60  ;;  %v121_v11 = vadd.f32 %v117_v63, %v31_v62 }
  0x8c   :  { %v99_v41 = vpop.f32.mrf.mxu2  ;;  %v112_v42 = vpop.f32.mrf.mxu3 }
  0x8d   :  { %v75_v43 = vpop.f32.mrf.mxu0  ;;  %v88_v44 = vpop.f32.mrf.mxu1  ;;  %v100_v4 = vadd.f32 %v99_v41, %v45_v49  ;;  %v113_v5 = vadd.f32 %v112_v42, %v45_v49 }
  0x8f   :  { %v118_v21 = vmax.f32 %v100_v4, 0.0  ;;  %v119_v23 = vmax.f32 %v113_v5, 0.0 }
  0x91   :  { %v122_v30 = vadd.f32 %v118_v21, %v32_v20  ;;  %v123_v31 = vadd.f32 %v119_v23, %v33_v22 }
  0x94   :  { %v101_v45 = vpop.f32.mrf.mxu2  ;;  %v114_v46 = vpop.f32.mrf.mxu3 }
  0x95   :  { %v153_v47 = vpop.f32.mrf.mxu0  ;;  %v166_v48 = vpop.f32.mrf.mxu1 }
  0x96   :  { %v154_v58 = vadd.f32 %v153_v47, %v45_v49  ;;  %v167_v59 = vadd.f32 %v166_v48, %v45_v49 }
  0x98   :  { %v196_v0 = vmax.f32 %v154_v58, 0.0  ;;  %v197_v1 = vmax.f32 %v167_v59, 0.0 }
  0x9a   :  { %v200_v16 = vadd.f32 %v196_v0, %v120_v10  ;;  %v201_v17 = vadd.f32 %v197_v1, %v121_v11 }
  0x9c   :  { %v179_v50 = vpop.f32.mrf.mxu2  ;;  %v192_v51 = vpop.f32.mrf.mxu3 }
  0x9d   :  { %v155_v52 = vpop.f32.mrf.mxu0  ;;  %v168_v53 = vpop.f32.mrf.mxu1  ;;  %v180_v14 = vadd.f32 %v179_v50, %v45_v49  ;;  %v193_v15 = vadd.f32 %v192_v51, %v45_v49 }
  0x9f   :  { %v198_v26 = vmax.f32 %v180_v14, 0.0  ;;  %v199_v27 = vmax.f32 %v193_v15, 0.0 }
  0xa1   :  { %v202_v36 = vadd.f32 %v198_v26, %v122_v30  ;;  %v203_v37 = vadd.f32 %v199_v27, %v123_v31 }
  0xa4   :  { %v181_v2 = vpop.f32.mrf.mxu2  ;;  %v194_v3 = vpop.f32.mrf.mxu3 }
  0xa5   :  { %v233_v6 = vpop.f32.mrf.mxu0  ;;  %v246_v7 = vpop.f32.mrf.mxu1 }
  0xa6   :  { %v234_v12 = vadd.f32 %v233_v6, %v45_v49  ;;  %v247_v13 = vadd.f32 %v246_v7, %v45_v49 }
  0xa8   :  { %v276_v18 = vmax.f32 %v234_v12, 0.0  ;;  %v277_v19 = vmax.f32 %v247_v13, 0.0 }
  0xaa   :  { %v280_v24 = vadd.f32 %v276_v18, %v200_v16  ;;  %v281_v25 = vadd.f32 %v277_v19, %v201_v17 }
  0xac   :  { %284 = vst [vmem:[%s438_s6] sm:$0xff] %v280_v24  ;;  %v259_v28 = vpop.f32.mrf.mxu2  ;;  %v272_v29 = vpop.f32.mrf.mxu3 }
  0xad   :  { %285 = vst [vmem:[%s438_s6 + $0x8] sm:$0xff] %v281_v25  ;;  %v260_v32 = vadd.f32 %v259_v28, %v45_v49  ;;  %v273_v33 = vadd.f32 %v272_v29, %v45_v49  ;;  %v235_v34 = vpop.f32.mrf.mxu0  ;;  %v248_v35 = vpop.f32.mrf.mxu1 }
  0xaf   :  { %v278_v38 = vmax.f32 %v260_v32, 0.0  ;;  %v279_v39 = vmax.f32 %v273_v33, 0.0 }
  0xb1   :  { %v282_v40 = vadd.f32 %v278_v38, %v202_v36  ;;  %v283_v41 = vadd.f32 %v279_v39, %v203_v37 }
  0xb3   :  { %286 = vst [vmem:[%s438_s6 + $0x10] sm:$0xff] %v282_v40 }
  0xb4   :  { %287 = vst [vmem:[%s438_s6 + $0x18] sm:$0xff] %v283_v41  ;;  %v261_v42 = vpop.f32.mrf.mxu2  ;;  %v274_v43 = vpop.f32.mrf.mxu3 }

// kernel: hifa_forward.12
= control target key start
LH: loop header
LB: loop body
LE: loop exit
PB: predicated region body
PF: predicated region fallthrough
CT: control target
= control target key end

     0   :  { %v104_v3 = vmov 0   ;;  %vm34_vm0 = vcmask 130048   ;;  %s167_s1 = inlined_call_operand.vmem [shape: f32[16,512], index: 1, kind: input, shape index: {}]   ;;  %s168_s0 = inlined_call_operand.vmem [shape: bf16[8,16], index: 0, kind: input, shape index: {}]   ;;  %s169_s2 = inlined_call_operand.vmem [shape: f32[8,1], index: 2, kind: input, shape index: {}]   ;;  %s170_s3 = inlined_call_operand.vmem [shape: f32[8,512], index: 3, kind: output, shape index: {}]  }
   0x1   :  { %v16_v0 = vld [vmem:[%s167_s1] sm:$0xff]  ;;  %v17_v2 = vld [vmem:[%s167_s1 + $0x8] sm:$0xff]  ;;  %103 = vset.pattern.permute.xlu0 %v104_v3  ;;  %v18_v6 = vld [vmem:[%s167_s1 + $0x10] sm:$0xff] }
   0x2   :  { %v20_v1 = vld [vmem:[%s167_s1 + $0x20] sm:$0xff]  ;;  %v21_v5 = vld [vmem:[%s167_s1 + $0x28] sm:$0xff]  ;;  %v22_v7 = vld [vmem:[%s167_s1 + $0x30] sm:$0xff] }
   0x3   :  { %v24_v4 = vpack.c.bf16 %v20_v1, %v16_v0  ;;  %v25_v8 = vpack.c.bf16 %v21_v5, %v17_v2  ;;  %v26_v9 = vpack.c.bf16 %v22_v7, %v18_v6  ;;  %v19_v10 = vld [vmem:[%s167_s1 + $0x18] sm:$0xff]  ;;  %v15_v13 = vld [vmem:[%s168_s0] sm:$0xf] }
   0x4   :  { %v23_v11 = vld [vmem:[%s167_s1 + $0x38] sm:$0xff]  ;;  %v28_v14 = vld [vmem:[%s169_s2] sm:$0xff] }
   0x5   :  { %45 = vmatpush.bf16.msra.mxu0 %v24_v4  ;;  %v27_v12 = vpack.c.bf16 %v23_v11, %v19_v10  ;;  %58 = vmatpush.bf16.msra.mxu1 %v25_v8 }
   0x6   :  { %71 = vmatpush.bf16.msra.mxu2 %v26_v9  ;;  %31 = vperm.xlu0 %103, %v28_v14  }
   0x7   :  { %84 = vmatpush.bf16.msra.mxu3 %v27_v12 }
   0x8   :  { %98 = vmatmul.msk.bf16.vlgmr.msra.gmra.mxu0 %vm34_vm0, %v15_v13  ;;  %99 = vmatmul.msk.bf16.vlgmr.msra.gmra.mxu1 %vm34_vm0, %v15_v13 }
   0x9   :  { %100 = vmatmul.msk.bf16.vlgmr.msra.gmra.mxu2 %vm34_vm0, %v15_v13 }
   0xa   :  { %101 = vmatmul.msk.bf16.vlgmr.msra.gmra.mxu3 %vm34_vm0, %v15_v13 }
  0x78   :  { %v32_v15 = vpop.permute.xlu0 %31 }
  0x85   :  { %v47_v16 = vpop.f32.mrf.mxu0  ;;  %v60_v17 = vpop.f32.mrf.mxu1 }
  0x86   :  { %v48_v18 = vadd.f32 %v47_v16, %v32_v15  ;;  %v61_v19 = vadd.f32 %v60_v17, %v32_v15 }
  0x88   :  { %90 = vst [vmem:[%s170_s3] sm:$0xff] %v48_v18 }
  0x89   :  { %91 = vst [vmem:[%s170_s3 + $0x8] sm:$0xff] %v61_v19 }
  0x8c   :  { %v73_v20 = vpop.f32.mrf.mxu2 }
  0x8d   :  { %v74_v21 = vadd.f32 %v73_v20, %v32_v15  ;;  %v86_v22 = vpop.f32.mrf.mxu3  ;;  %v49_v23 = vpop.f32.mrf.mxu0 }
  0x8e   :  { %v87_v24 = vadd.f32 %v86_v22, %v32_v15  ;;  %v62_v25 = vpop.f32.mrf.mxu1 }
  0x8f   :  { %92 = vst [vmem:[%s170_s3 + $0x10] sm:$0xff] %v74_v21 }
  0x90   :  { %93 = vst [vmem:[%s170_s3 + $0x18] sm:$0xff] %v87_v24 }
  0x94   :  { %v75_v26 = vpop.f32.mrf.mxu2 }
  0x95   :  { %v88_v27 = vpop.f32.mrf.mxu3 }

// kernel: hifa_forward.23
= control target key start
LH: loop header
LB: loop body
LE: loop exit
PB: predicated region body
PF: predicated region fallthrough
CT: control target
= control target key end

     0   :  { %v370_v3 = vmov 0   ;;  %vm60_vm0 = vcmask 130048   ;;  %s536_s3 = inlined_call_operand.vmem [shape: f32[16,512], index: 3, kind: input, shape index: {}]   ;;  %s537_s2 = inlined_call_operand.vmem [shape: bf16[16,16], index: 2, kind: input, shape index: {}]   ;;  %s538_s1 = inlined_call_operand.vmem [shape: f32[16,512], index: 1, kind: input, shape index: {}]   ;;  %s539_s4 = inlined_call_operand.vmem [shape: f32[16,1], index: 4, kind: input, shape index: {}]   ;;  %s540_s0 = inlined_call_operand.vmem [shape: bf16[16,16], index: 0, kind: input, shape index: {}]   ;;  %s541_s5 = inlined_call_operand.vmem [shape: f32[16,1], index: 5, kind: input, shape index: {}]   ;;  %s542_s6 = inlined_call_operand.vmem [shape: f32[16,1], index: 6, kind: input, shape index: {}]   ;;  %s543_s7 = inlined_call_operand.vmem [shape: f32[16,512], index: 7, kind: output, shape index: {}]  }
   0x1   :  { %v43_v0 = vld [vmem:[%s536_s3] sm:$0xff]  ;;  %v44_v2 = vld [vmem:[%s536_s3 + $0x8] sm:$0xff]  ;;  %361 = vset.pattern.permute.xlu0 %v370_v3  ;;  %362 = vset.pattern.permute.xlu1 %v370_v3  ;;  %v45_v6 = vld [vmem:[%s536_s3 + $0x10] sm:$0xff] }
   0x2   :  { %v47_v1 = vld [vmem:[%s536_s3 + $0x20] sm:$0xff]  ;;  %v48_v5 = vld [vmem:[%s536_s3 + $0x28] sm:$0xff]  ;;  %v49_v7 = vld [vmem:[%s536_s3 + $0x30] sm:$0xff]  ;;  %363 = vset.pattern.permute.xlu2 %v370_v3 }
   0x3   :  { %v51_v4 = vpack.c.bf16 %v47_v1, %v43_v0  ;;  %v52_v8 = vpack.c.bf16 %v48_v5, %v44_v2  ;;  %v53_v9 = vpack.c.bf16 %v49_v7, %v45_v6  ;;  %v46_v10 = vld [vmem:[%s536_s3 + $0x18] sm:$0xff]  ;;  %v358_v12 = vld [vmem:[%s537_s2] sm:$0xff]  ;;  %v31_v14 = vld [vmem:[%s538_s1 + $0x10] sm:$0xff]  ;;  %v371_v7 = vmov 512.0  }
   0x4   :  { %v50_v11 = vld [vmem:[%s536_s3 + $0x38] sm:$0xff]  ;;  %v35_v15 = vld [vmem:[%s538_s1 + $0x30] sm:$0xff]  ;;  %v29_v19 = vld [vmem:[%s538_s1] sm:$0xff]  ;;  %364 = vrcp.f32 %v371_v7 }
   0x5   :  { %71 = vmatpush.bf16.msra.mxu0 %v51_v4  ;;  %v54_v13 = vpack.c.bf16 %v50_v11, %v46_v10  ;;  %v32_v16 = vld [vmem:[%s538_s1 + $0x18] sm:$0xff]  ;;  %85 = vmatpush.bf16.msra.mxu1 %v52_v8  ;;  %v39_v17 = vpack.c.bf16 %v35_v15, %v31_v14  ;;  %v33_v20 = vld [vmem:[%s538_s1 + $0x20] sm:$0xff]  ;;  %v30_v23 = vld [vmem:[%s538_s1 + $0x8] sm:$0xff] }
   0x6   :  { %99 = vmatpush.bf16.msra.mxu2 %v53_v9  ;;  %v36_v18 = vld [vmem:[%s538_s1 + $0x38] sm:$0xff]  ;;  %v37_v22 = vpack.c.bf16 %v33_v20, %v29_v19  ;;  %v34_v24 = vld [vmem:[%s538_s1 + $0x28] sm:$0xff]  ;;  %v184_v26 = vld [vmem:[%s539_s4] sm:$0xff] }
   0x7   :  { %113 = vmatpush.bf16.msra.mxu3 %v54_v13  ;;  %v40_v21 = vpack.c.bf16 %v36_v18, %v32_v16  ;;  %v38_v25 = vpack.c.bf16 %v34_v24, %v30_v23  ;;  %188 = vperm.xlu0 %361, %v184_v26   ;;  %v185_v27 = vld [vmem:[%s539_s4 + $0x8] sm:$0xff]  ;;  %v357_v28 = vld [vmem:[%s540_s0] sm:$0xff] }
   0x8   :  { %345 = vmatmul.msk.bf16.vlgmr.msra.gmra.mxu0 %vm60_vm0, %v358_v12  ;;  %346 = vmatmul.msk.bf16.vlgmr.msra.gmra.mxu1 %vm60_vm0, %v358_v12  ;;  %v204_v29 = vld [vmem:[%s541_s5] sm:$0xff]  ;;  %v207_v30 = vld [vmem:[%s542_s6 + $0x8] sm:$0xff] }
   0x9   :  { %347 = vmatmul.msk.bf16.vlgmr.msra.gmra.mxu2 %vm60_vm0, %v358_v12  ;;  %135 = vmatpush.bf16.msrb.mxu0 %v37_v22  ;;  %v205_v11 = vld [vmem:[%s541_s5 + $0x8] sm:$0xff] }
   0xa   :  { %163 = vmatpush.bf16.msrb.mxu2 %v39_v17  ;;  %348 = vmatmul.msk.bf16.vlgmr.msra.gmra.mxu3 %vm60_vm0, %v358_v12  ;;  %v365_v8 = vpop.eup %364 }
   0xb   :  { %177 = vmatpush.bf16.msrb.mxu3 %v40_v21  ;;  %149 = vmatpush.bf16.msrb.mxu1 %v38_v25  ;;  %v219_v9 = vmul.f32 512.0, %v365_v8  ;;  %vm223_vm1 = vweird.f32 %v365_v8 }
   0xd   :  { %v220_v10 = vsub.f32 1.0, %v219_v9 }
   0xf   :  { %193 = vperm.xlu0 %361, %v185_v27   ;;  %v221_v12 = vmul.f32 %v365_v8, %v220_v10 }
  0x11   :  { %v222_v13 = vadd.f32 %v365_v8, %v221_v12 }
  0x13   :  { %v224_v14 = vsel %vm223_vm1, %v365_v8, %v222_v13 }
  0x17   :  { %287 = vperm.xlu0 %361, %v204_v29  }
  0x18   :  { %353 = vmatmul.msk.bf16.vlgmr.msrb.gmra.mxu0 %vm60_vm0, %v357_v28  ;;  %354 = vmatmul.msk.bf16.vlgmr.msrb.gmra.mxu1 %vm60_vm0, %v357_v28 }
  0x19   :  { %355 = vmatmul.msk.bf16.vlgmr.msrb.gmra.mxu2 %vm60_vm0, %v357_v28 }
  0x1a   :  { %356 = vmatmul.msk.bf16.vlgmr.msrb.gmra.mxu3 %vm60_vm0, %v357_v28 }
  0x1f   :  { %310 = vperm.xlu0 %361, %v207_v30  }
  0x79   :  { %v189_v43 = vpop.permute.xlu0 %188 }
  0x81   :  { %v194_v58 = vpop.permute.xlu0 %193 }
  0x85   :  { %v73_v31 = vpop.f32.mrf.mxu0  ;;  %v87_v32 = vpop.f32.mrf.mxu1 }
  0x8c   :  { %v101_v33 = vpop.f32.mrf.mxu2 }
  0x8d   :  { %v115_v34 = vpop.f32.mrf.mxu3  ;;  %v75_v35 = vpop.f32.mrf.mxu0 }
  0x8e   :  { %v89_v36 = vpop.f32.mrf.mxu1 }
  0x94   :  { %v103_v37 = vpop.f32.mrf.mxu2 }
  0x95   :  { %v117_v38 = vpop.f32.mrf.mxu3  ;;  %v137_v39 = vpop.f32.mrf.mxu0 }
  0x96   :  { %v151_v40 = vpop.f32.mrf.mxu1  ;;  %v138_v41 = vadd.f32 %v137_v39, %v73_v31 }
  0x97   :  { %v152_v42 = vadd.f32 %v151_v40, %v87_v32 }
  0x98   :  { %v196_v44 = vadd.f32 %v189_v43, %v138_v41  ;;  %v206_v41 = vld [vmem:[%s542_s6] sm:$0xff] }
  0x99   :  { %v197_v45 = vadd.f32 %v189_v43, %v152_v42 }
  0x9b   :  { %v208_v55 = vadd.f32 %v197_v45, %v196_v44 }
  0x9c   :  { %v165_v46 = vpop.f32.mrf.mxu2 }
  0x9d   :  { %v166_v47 = vadd.f32 %v165_v46, %v101_v33  ;;  %v179_v48 = vpop.f32.mrf.mxu3  ;;  %v139_v49 = vpop.f32.mrf.mxu0 }
  0x9e   :  { %v180_v50 = vadd.f32 %v179_v48, %v115_v34  ;;  %v153_v51 = vpop.f32.mrf.mxu1  ;;  %v140_v53 = vadd.f32 %v139_v49, %v75_v35 }
  0x9f   :  { %v198_v52 = vadd.f32 %v189_v43, %v166_v47  ;;  %v154_v54 = vadd.f32 %v153_v51, %v89_v36 }
  0xa0   :  { %v199_v56 = vadd.f32 %v189_v43, %v180_v50  ;;  %v200_v59 = vadd.f32 %v194_v58, %v140_v53 }
  0xa1   :  { %v209_v57 = vadd.f32 %v208_v55, %v198_v52  ;;  %v201_v60 = vadd.f32 %v194_v58, %v154_v54 }
  0xa3   :  { %v210_v61 = vadd.f32 %v209_v57, %v199_v56  ;;  %v213_v2 = vadd.f32 %v201_v60, %v200_v59 }
  0xa4   :  { %v167_v62 = vpop.f32.mrf.mxu2 }
  0xa5   :  { %v168_v63 = vadd.f32 %v167_v62, %v103_v37  ;;  %v181_v0 = vpop.f32.mrf.mxu3  ;;  %211 = vadd.xlane.f32.xlu1 %v210_v61  ;;  %v288_v62 = vpop.permute.xlu0 %287 }
  0xa6   :  { %v182_v1 = vadd.f32 %v181_v0, %v117_v38 }
  0xa7   :  { %v202_v3 = vadd.f32 %v194_v58, %v168_v63 }
  0xa8   :  { %v203_v4 = vadd.f32 %v194_v58, %v182_v1 }
  0xa9   :  { %v214_v5 = vadd.f32 %v213_v2, %v202_v3 }
  0xab   :  { %v215_v6 = vadd.f32 %v214_v5, %v203_v4 }
  0xad   :  { %216 = vadd.xlane.f32.xlu1 %v215_v6 }
  0xc6   :  { %292 = vperm.xlu1 %362, %v205_v11  }
 0x118   :  { %v212_v15 = vpop.xlane.xlu1 %211 }
 0x119   :  { %v225_v16 = vmul.f32 %v224_v14, %v212_v15 }
 0x11b   :  { %v227_v17 = vsub.f32 %v196_v44, %v225_v16  ;;  %v228_v18 = vsub.f32 %v197_v45, %v225_v16  ;;  %v229_v19 = vsub.f32 %v198_v52, %v225_v16  ;;  %v230_v20 = vsub.f32 %v199_v56, %v225_v16 }
 0x11d   :  { %v235_v21 = vmul.f32 %v227_v17, %v227_v17  ;;  %v236_v22 = vmul.f32 %v228_v18, %v228_v18  ;;  %v237_v23 = vmul.f32 %v229_v19, %v229_v19  ;;  %v238_v27 = vmul.f32 %v230_v20, %v230_v20 }
 0x11f   :  { %v243_v24 = vadd.f32 %v236_v22, %v235_v21 }
 0x120   :  { %v217_v25 = vpop.xlane.xlu1 %216 }
 0x121   :  { %v226_v26 = vmul.f32 %v224_v14, %v217_v25  ;;  %v244_v28 = vadd.f32 %v243_v24, %v237_v23  ;;  %v311_v25 = vpop.permute.xlu0 %310 }
 0x123   :  { %v489_v29 = vsub.f32 %v200_v59, %v226_v26  ;;  %v491_v30 = vsub.f32 %v201_v60, %v226_v26  ;;  %v245_v31 = vadd.f32 %v244_v28, %v238_v27  ;;  %v493_v32 = vsub.f32 %v202_v3, %v226_v26 }
 0x124   :  { %v495_v33 = vsub.f32 %v203_v4, %v226_v26 }
 0x125   :  { %246 = vadd.xlane.f32.xlu2 %v245_v31  ;;  %v239_v34 = vmul.f32 %v489_v29, %v489_v29  ;;  %v240_v35 = vmul.f32 %v491_v30, %v491_v30  ;;  %v241_v36 = vmul.f32 %v493_v32, %v493_v32 }
 0x126   :  { %v242_v38 = vmul.f32 %v495_v33, %v495_v33 }
 0x127   :  { %v248_v37 = vadd.f32 %v240_v35, %v239_v34 }
 0x129   :  { %v249_v39 = vadd.f32 %v248_v37, %v241_v36 }
 0x12b   :  { %v250_v40 = vadd.f32 %v249_v39, %v242_v38 }
 0x12d   :  { %251 = vadd.xlane.f32.xlu2 %v250_v40 }
 0x138   :  { %v293_v16 = vpop.permute.xlu1 %292 }
 0x145   :  { %305 = vperm.xlu2 %363, %v206_v41  }
 0x198   :  { %v247_v42 = vpop.xlane.xlu2 %246 }
 0x199   :  { %v253_v43 = vmul.f32 %v247_v42, %v224_v14 }
 0x19b   :  { %v255_v44 = vadd.f32 1e-05, %v253_v43 }
 0x19d   :  { %366 = vrsqrt.f32 %v255_v44  ;;  %vm263_vm3 = vweird.f32 %v255_v44 }
 0x1a0   :  { %v252_v45 = vpop.xlane.xlu2 %251 }
 0x1a1   :  { %v254_v46 = vmul.f32 %v252_v45, %v224_v14 }
 0x1a3   :  { %v367_v47 = vpop.eup %366  ;;  %v256_v48 = vadd.f32 1e-05, %v254_v46 }
 0x1a4   :  { %v258_v49 = vmul.f32 %v367_v47, %v255_v44  ;;  %vm264_vm2 = vweird.f32 %v367_v47 }
 0x1a5   :  { %368 = vrsqrt.f32 %v256_v48  ;;  %vm265_vm4 = vmor %vm263_vm3, %vm264_vm2  ;;  %vm273_vm6 = vweird.f32 %v256_v48 }
 0x1a6   :  { %v259_v50 = vmul.f32 %v367_v47, %v258_v49 }
 0x1a8   :  { %v260_v51 = vmul.f32 0.5, %v259_v50  ;;  %v306_v0 = vpop.permute.xlu2 %305 }
 0x1aa   :  { %v261_v52 = vsub.f32 1.5, %v260_v51 }
 0x1ab   :  { %v369_v53 = vpop.eup %368 }
 0x1ac   :  { %v262_v54 = vmul.f32 %v367_v47, %v261_v52  ;;  %v268_v55 = vmul.f32 %v369_v53, %v256_v48  ;;  %vm274_vm5 = vweird.f32 %v369_v53 }
 0x1ad   :  { %vm275_vm7 = vmor %vm273_vm6, %vm274_vm5 }
 0x1ae   :  { %v266_v56 = vsel %vm265_vm4, %v367_v47, %v262_v54  ;;  %v269_v57 = vmul.f32 %v369_v53, %v268_v55 }
 0x1af   :  { %v277_v58 = vmul.f32 %v266_v56, %v227_v17  ;;  %v278_v59 = vmul.f32 %v266_v56, %v228_v18  ;;  %v279_v60 = vmul.f32 %v266_v56, %v229_v19  ;;  %v280_v61 = vmul.f32 %v266_v56, %v230_v20 }
 0x1b0   :  { %v270_v63 = vmul.f32 0.5, %v269_v57 }
 0x1b1   :  { %v295_v1 = vmul.f32 %v288_v62, %v277_v58  ;;  %v296_v2 = vmul.f32 %v288_v62, %v278_v59  ;;  %v297_v3 = vmul.f32 %v288_v62, %v279_v60  ;;  %v298_v4 = vmul.f32 %v288_v62, %v280_v61 }
 0x1b2   :  { %v271_v5 = vsub.f32 1.5, %v270_v63 }
 0x1b3   :  { %v313_v6 = vadd.f32 %v306_v0, %v295_v1  ;;  %v314_v7 = vadd.f32 %v306_v0, %v296_v2  ;;  %v315_v8 = vadd.f32 %v306_v0, %v297_v3  ;;  %v316_v9 = vadd.f32 %v306_v0, %v298_v4 }
 0x1b4   :  { %v272_v10 = vmul.f32 %v369_v53, %v271_v5 }
 0x1b5   :  { %v321_v11 = vmax.f32 %v313_v6, 0.0  ;;  %v322_v12 = vmax.f32 %v314_v7, 0.0  ;;  %v323_v13 = vmax.f32 %v315_v8, 0.0  ;;  %v324_v15 = vmax.f32 %v316_v9, 0.0 }
 0x1b6   :  { %v276_v14 = vsel %vm275_vm7, %v369_v53, %v272_v10 }
 0x1b7   :  { %329 = vst [vmem:[%s543_s7] sm:$0xff] %v321_v11  ;;  %v281_v17 = vmul.f32 %v276_v14, %v489_v29  ;;  %v282_v18 = vmul.f32 %v276_v14, %v491_v30  ;;  %v283_v19 = vmul.f32 %v276_v14, %v493_v32  ;;  %v284_v20 = vmul.f32 %v276_v14, %v495_v33 }
 0x1b8   :  { %330 = vst [vmem:[%s543_s7 + $0x8] sm:$0xff] %v322_v12 }
 0x1b9   :  { %331 = vst [vmem:[%s543_s7 + $0x10] sm:$0xff] %v323_v13  ;;  %v299_v21 = vmul.f32 %v293_v16, %v281_v17  ;;  %v300_v22 = vmul.f32 %v293_v16, %v282_v18  ;;  %v301_v23 = vmul.f32 %v293_v16, %v283_v19  ;;  %v302_v24 = vmul.f32 %v293_v16, %v284_v20 }
 0x1ba   :  { %332 = vst [vmem:[%s543_s7 + $0x18] sm:$0xff] %v324_v15 }
 0x1bb   :  { %v317_v26 = vadd.f32 %v311_v25, %v299_v21  ;;  %v318_v27 = vadd.f32 %v311_v25, %v300_v22  ;;  %v319_v28 = vadd.f32 %v311_v25, %v301_v23  ;;  %v320_v29 = vadd.f32 %v311_v25, %v302_v24 }
 0x1bd   :  { %v325_v30 = vmax.f32 %v317_v26, 0.0  ;;  %v326_v31 = vmax.f32 %v318_v27, 0.0  ;;  %v327_v32 = vmax.f32 %v319_v28, 0.0  ;;  %v328_v33 = vmax.f32 %v320_v29, 0.0 }
 0x1bf   :  { %333 = vst [vmem:[%s543_s7 + $0x20] sm:$0xff] %v325_v30 }
 0x1c0   :  { %334 = vst [vmem:[%s543_s7 + $0x28] sm:$0xff] %v326_v31 }
 0x1c1   :  { %335 = vst [vmem:[%s543_s7 + $0x30] sm:$0xff] %v327_v32 }
 0x1c2   :  { %336 = vst [vmem:[%s543_s7 + $0x38] sm:$0xff] %v328_v33 }

// kernel: hifa_forward.22
= control target key start
LH: loop header
LB: loop body
LE: loop exit
PB: predicated region body
PF: predicated region fallthrough
CT: control target
= control target key end

     0   :  { %s2068_s18 = smov 0   ;;  %s3259_s0 = inlined_call_operand.vmem [shape: f32[2,8,256], index: 0, kind: input, shape index: {}]   ;;  %s3260_s1 = inlined_call_operand.vmem [shape: f32[2,8,358], index: 1, kind: input, shape index: {}]   ;;  %s3261_s2 = inlined_call_operand.vmem [shape: f32[2,8,358], index: 2, kind: input, shape index: {}]   ;;  %s3262_s3 = inlined_call_operand.vmem [shape: bf16[16,8], index: 3, kind: input, shape index: {}]   ;;  %s3263_s4 = inlined_call_operand.vmem [shape: f32[16,1], index: 4, kind: input, shape index: {}]   ;;  %s3264_s5 = inlined_call_operand.vmem [shape: f32[2,16,256], index: 5, kind: output, shape index: {}]  }
   0x1 LB: > { %s1689_s19 = sadd.s32 4294967295, %s2035_s18   ;;  %p1693_p0 = scmp.ge.s32.totalorder %s2035_s18, 1  ;;  %s2035_s18 = sphi %s2068_s18, %s15_s18  }
   0x2   : > { %p207_p1 = scmp.lt.s32.totalorder %s2035_s18, 3 }
   0x4   : > { %p208_p2 = pnand %p1693_p0, %p207_p1 }
   0x6   : > { %211 = sbr.rel (%p208_p2) target bundleno = 1307 (0x51b), region = 40 }
   0xb   : > { %p245_p3 = scmp.lt.s32.totalorder %s1689_s19, 1  ;;  %vm357_vm0 = vcmask 1043456   ;;  %vm308_vm1 = vcmask 64512   ;;  %vm635_vm2 = vcmask 834560  }
   0xd   : > { %s3573_s19 = smov (!%p245_p3, %s1689_s19), 1 }
   0xe   : > { %s1758_s20 = sshll.u32 %s3573_s19, 4  ;;  %s1761_s21 = smul.u32 24, %s3573_s19 }
   0xf   : > { %s249_s24 = scalar_lea.vmem %s3259_s0, %s1758_s20  ;;  %s1759_s12 = sshll.u32 %s3573_s19, 5 }
  0x10   : > { %v266_v0 = vld [vmem:[%s249_s24] sm:$0xff]  ;;  %v267_v1 = vld [vmem:[%s249_s24 + $0x8] sm:$0xff]  ;;  %s254_s27 = scalar_lea.vmem %s3260_s1, %s1761_s21  ;;  %s3069_s30 = scalar_lea.vmem %s3261_s2, %s1761_s21 }
  0x11   : > { %v268_v2 = vmul.f32 0.35355338, %v266_v0  ;;  %v269_v3 = vmul.f32 0.35355338, %v267_v1  ;;  %v272_v4 = vld [vmem:[%s254_s27] sm:$0xff]  ;;  %v273_v5 = vld [vmem:[%s254_s27 + $0x8] sm:$0xff]  ;;  %s264_s15 = scalar_lea.vmem %s3264_s5, %s1759_s12 }
  0x12   : > { %v275_v6 = vpack.c.bf16 %v272_v4, %v272_v4  ;;  %v276_v7 = vpack.c.bf16 %v273_v5, %v273_v5  ;;  %v274_v8 = vld [vmem:[%s254_s27 + $0x10] sm:$0xff] }
  0x13   : > { %v270_v9 = vpack.c.bf16 %v268_v2, %v268_v2  ;;  %v271_v10 = vpack.c.bf16 %v269_v3, %v269_v3  ;;  %v277_v11 = vpack.c.bf16 %v274_v8, %v274_v8 }
  0x14   : > { %v359_v12 = vsel %vm357_vm0, %v275_v6, 0  ;;  %v362_v13 = vsel %vm357_vm0, %v276_v7, 0 }
  0x15   : > { %284 = vxpose.binary.xlu0.c.b16.start.end [1/2] (short) %v271_v10, %v270_v9, 128  ;;  %v365_v14 = vsel %vm357_vm0, %v277_v11, 0 }
  0x16   : > { %374 = vmatpush.bf16.msra.mxu0 %v359_v12  ;;  %463 = vmatpush.bf16.msra.mxu1 %v362_v13 }
  0x17   : > { %552 = vmatpush.bf16.msra.mxu2 %v365_v14 }
  0xc1   : > { %v292_v15 = vpop.trf.xlu0 }
  0xc2   : > { %1700 = vmatmul.msk.bf16.vlgmr.msra.gmra.mxu0 %vm308_vm1, %v292_v15  ;;  %1716 = vmatmul.msk.bf16.vlgmr.msra.gmra.mxu1 %vm308_vm1, %v292_v15 }
  0xc3   : > { %1732 = vmatmul.msk.bf16.vlgmr.msra.gmra.mxu2 %vm308_vm1, %v292_v15 }
  0xc9   : > { %v293_v16 = vpop.trf.xlu0 }
  0xd1   : > { %v294_v17 = vpop.trf.xlu0 }
  0xd2   : > { %1701 = vmatmul.msk.bf16.gmra.mxu0 %vm308_vm1, %v294_v17  ;;  %1717 = vmatmul.msk.bf16.gmra.mxu1 %vm308_vm1, %v294_v17 }
  0xd3   : > { %1733 = vmatmul.msk.bf16.gmra.mxu2 %vm308_vm1, %v294_v17 }
  0xd9   : > { %v295_v18 = vpop.trf.xlu0 }
  0xe1   : > { %v296_v19 = vpop.trf.xlu0 }
  0xe2   : > { %1702 = vmatmul.msk.bf16.gmra.mxu0 %vm308_vm1, %v296_v19  ;;  %1718 = vmatmul.msk.bf16.gmra.mxu1 %vm308_vm1, %v296_v19 }
  0xe3   : > { %1734 = vmatmul.msk.bf16.gmra.mxu2 %vm308_vm1, %v296_v19 }
  0xe9   : > { %v297_v20 = vpop.trf.xlu0 }
  0xf1   : > { %v298_v21 = vpop.trf.xlu0 }
  0xf2   : > { %1703 = vmatmul.msk.bf16.gmra.mxu0 %vm308_vm1, %v298_v21  ;;  %1719 = vmatmul.msk.bf16.gmra.mxu1 %vm308_vm1, %v298_v21 }
  0xf3   : > { %1735 = vmatmul.msk.bf16.gmra.mxu2 %vm308_vm1, %v298_v21 }
  0xf9   : > { %v299_v22 = vpop.trf.xlu0 }
 0x101   : > { %v300_v23 = vpop.trf.xlu0 }
 0x102   : > { %1704 = vmatmul.msk.bf16.gmra.mxu0 %vm308_vm1, %v300_v23  ;;  %1720 = vmatmul.msk.bf16.gmra.mxu1 %vm308_vm1, %v300_v23 }
 0x103   : > { %1736 = vmatmul.msk.bf16.gmra.mxu2 %vm308_vm1, %v300_v23 }
 0x109   : > { %v301_v24 = vpop.trf.xlu0 }
 0x111   : > { %v302_v25 = vpop.trf.xlu0 }
 0x112   : > { %1705 = vmatmul.msk.bf16.gmra.mxu0 %vm308_vm1, %v302_v25  ;;  %1721 = vmatmul.msk.bf16.gmra.mxu1 %vm308_vm1, %v302_v25 }
 0x113   : > { %1737 = vmatmul.msk.bf16.gmra.mxu2 %vm308_vm1, %v302_v25 }
 0x119   : > { %v303_v26 = vpop.trf.xlu0 }
 0x121   : > { %v304_v27 = vpop.trf.xlu0 }
 0x122   : > { %1706 = vmatmul.msk.bf16.gmra.mxu0 %vm308_vm1, %v304_v27  ;;  %1722 = vmatmul.msk.bf16.gmra.mxu1 %vm308_vm1, %v304_v27 }
 0x123   : > { %1738 = vmatmul.msk.bf16.gmra.mxu2 %vm308_vm1, %v304_v27 }
 0x129   : > { %v2112_v28 = vpop.trf.xlu0 }
 0x131   : > { %v306_v29 = vpop.trf.xlu0 }
 0x132   : > { %1707 = vmatmul.msk.bf16.gmra.mxu0 %vm308_vm1, %v306_v29  ;;  %1723 = vmatmul.msk.bf16.gmra.mxu1 %vm308_vm1, %v306_v29 }
 0x133   : > { %1739 = vmatmul.msk.bf16.gmra.mxu2 %vm308_vm1, %v306_v29 }
 0x139   : > { %v307_v29 = vpop.trf.xlu0 }
 0x13f   : > { %v2117_v30 = vpop.f32.mrf.mxu0  ;;  %v2119_v31 = vpop.f32.mrf.mxu1 }
 0x140   : > { %3357 = vst [vmem:[#allocation2_spill] sm:$0xff] %v2117_v30 }
 0x141   : > { %3358 = vst [vmem:[#allocation3_spill] sm:$0xff] %v2119_v31 }
 0x142   : > { %1708 = vmatmul.msk.bf16.gmra.mxu0 %vm308_vm1, %v293_v16  ;;  %1724 = vmatmul.msk.bf16.gmra.mxu1 %vm308_vm1, %v293_v16 }
 0x143   : > { %1740 = vmatmul.msk.bf16.gmra.mxu2 %vm308_vm1, %v293_v16 }
 0x146   : > { %v2124_v32 = vpop.f32.mrf.mxu2 }
 0x147   : > { %3359 = vst [vmem:[#allocation4_spill] sm:$0xff] %v2124_v32  ;;  %v2126_v33 = vpop.f32.mrf.mxu0  ;;  %v2128_v34 = vpop.f32.mrf.mxu1 }
 0x14e   : > { %v2130_v35 = vpop.f32.mrf.mxu2 }
 0x14f   : > { %v2132_v36 = vpop.f32.mrf.mxu0  ;;  %v2134_v37 = vpop.f32.mrf.mxu1 }
 0x152   : > { %1709 = vmatmul.msk.bf16.gmra.mxu0 %vm308_vm1, %v295_v18  ;;  %1725 = vmatmul.msk.bf16.gmra.mxu1 %vm308_vm1, %v295_v18 }
 0x153   : > { %1741 = vmatmul.msk.bf16.gmra.mxu2 %vm308_vm1, %v295_v18 }
 0x156   : > { %v2139_v38 = vpop.f32.mrf.mxu2 }
 0x157   : > { %v2141_v39 = vpop.f32.mrf.mxu0  ;;  %v2143_v40 = vpop.f32.mrf.mxu1 }
 0x15e   : > { %v2145_v41 = vpop.f32.mrf.mxu2 }
 0x15f   : > { %v2147_v42 = vpop.f32.mrf.mxu0  ;;  %v2149_v43 = vpop.f32.mrf.mxu1 }
 0x162   : > { %1710 = vmatmul.msk.bf16.gmra.mxu0 %vm308_vm1, %v297_v20  ;;  %1726 = vmatmul.msk.bf16.gmra.mxu1 %vm308_vm1, %v297_v20 }
 0x163   : > { %1742 = vmatmul.msk.bf16.gmra.mxu2 %vm308_vm1, %v297_v20 }
 0x166   : > { %v2154_v44 = vpop.f32.mrf.mxu2 }
 0x167   : > { %v2156_v45 = vpop.f32.mrf.mxu0  ;;  %v2158_v46 = vpop.f32.mrf.mxu1 }
 0x16e   : > { %v2160_v47 = vpop.f32.mrf.mxu2 }
 0x16f   : > { %v2162_v48 = vpop.f32.mrf.mxu0  ;;  %v2164_v49 = vpop.f32.mrf.mxu1 }
 0x172   : > { %1711 = vmatmul.msk.bf16.gmra.mxu0 %vm308_vm1, %v299_v22  ;;  %1727 = vmatmul.msk.bf16.gmra.mxu1 %vm308_vm1, %v299_v22 }
 0x173   : > { %1743 = vmatmul.msk.bf16.gmra.mxu2 %vm308_vm1, %v299_v22 }
 0x176   : > { %v2169_v50 = vpop.f32.mrf.mxu2 }
 0x177   : > { %v2171_v51 = vpop.f32.mrf.mxu0  ;;  %v2173_v52 = vpop.f32.mrf.mxu1 }
 0x17e   : > { %v2175_v53 = vpop.f32.mrf.mxu2 }
 0x17f   : > { %v2177_v54 = vpop.f32.mrf.mxu0  ;;  %v2179_v55 = vpop.f32.mrf.mxu1 }
 0x182   : > { %1712 = vmatmul.msk.bf16.gmra.mxu0 %vm308_vm1, %v301_v24  ;;  %1728 = vmatmul.msk.bf16.gmra.mxu1 %vm308_vm1, %v301_v24 }
 0x183   : > { %1744 = vmatmul.msk.bf16.gmra.mxu2 %vm308_vm1, %v301_v24 }
 0x186   : > { %v2184_v56 = vpop.f32.mrf.mxu2 }
 0x187   : > { %v2186_v57 = vpop.f32.mrf.mxu0  ;;  %v2188_v58 = vpop.f32.mrf.mxu1 }
 0x188   : > { %v680_v24 = vmax.f32 %v2186_v57, %v2188_v58 }
 0x18e   : > { %v2190_v59 = vpop.f32.mrf.mxu2 }
 0x18f   : > { %v2192_v60 = vpop.f32.mrf.mxu0  ;;  %v2194_v61 = vpop.f32.mrf.mxu1  ;;  %v681_v21 = vsel %vm635_vm2, %v2190_v59, -inf }
 0x190   : > { %v685_v22 = vmax.f32 %v2192_v60, %v2194_v61 }
 0x192   : > { %1713 = vmatmul.msk.bf16.gmra.mxu0 %vm308_vm1, %v303_v26  ;;  %1729 = vmatmul.msk.bf16.gmra.mxu1 %vm308_vm1, %v303_v26 }
 0x193   : > { %1745 = vmatmul.msk.bf16.gmra.mxu2 %vm308_vm1, %v303_v26  ;;  %v682_v26 = vmax.f32 %v680_v24, %v681_v21 }
 0x196   : > { %v2199_v62 = vpop.f32.mrf.mxu2 }
 0x197   : > { %v2201_v63 = vpop.f32.mrf.mxu0  ;;  %v2203_v0 = vpop.f32.mrf.mxu1  ;;  %v686_v20 = vsel %vm635_vm2, %v2199_v62, -inf }
 0x198   : > { %v690_v11 = vmax.f32 %v2201_v63, %v2203_v0  ;;  %v687_v27 = vmax.f32 %v685_v22, %v686_v20  ;;  %v660_v20 = vmax.f32 %v2156_v45, %v2158_v46 }
 0x19e   : > { %v2205_v1 = vpop.f32.mrf.mxu2 }
 0x19f   : > { %v2207_v2 = vpop.f32.mrf.mxu0  ;;  %v2209_v3 = vpop.f32.mrf.mxu1  ;;  %v691_v10 = vsel %vm635_vm2, %v2205_v1, -inf }
 0x1a0   : > { %v695_v4 = vmax.f32 %v2207_v2, %v2209_v3  ;;  %v692_v15 = vmax.f32 %v690_v11, %v691_v10  ;;  %v670_v10 = vmax.f32 %v2171_v51, %v2173_v52 }
 0x1a2   : > { %1714 = vmatmul.msk.bf16.gmra.mxu0 %vm308_vm1, %v2112_v28  ;;  %1730 = vmatmul.msk.bf16.gmra.mxu1 %vm308_vm1, %v2112_v28 }
 0x1a3   : > { %1746 = vmatmul.msk.bf16.gmra.mxu2 %vm308_vm1, %v2112_v28 }
 0x1a6   : > { %v2219_v5 = vpop.f32.mrf.mxu2 }
 0x1a7   : > { %v696_v6 = vsel %vm635_vm2, %v2219_v5, -inf  ;;  %v2223_v8 = vpop.f32.mrf.mxu0  ;;  %v2225_v9 = vpop.f32.mrf.mxu1 }
 0x1a8   : > { %v697_v7 = vmax.f32 %v695_v4, %v696_v6  ;;  %v700_v12 = vmax.f32 %v2223_v8, %v2225_v9  ;;  %v676_v4 = vsel %vm635_vm2, %v2184_v56, -inf  ;;  %v671_v6 = vsel %vm635_vm2, %v2175_v53, -inf }
 0x1a9   : > { %v672_v11 = vmax.f32 %v670_v10, %v671_v6 }
 0x1aa   : > { %698 = vmax.xlane.f32.xlu1 %v697_v7  ;;  %v675_v7 = vmax.f32 %v2177_v54, %v2179_v55 }
 0x1ae   : > { %v2233_v13 = vpop.f32.mrf.mxu2 }
 0x1af   : > { %v701_v14 = vsel %vm635_vm2, %v2233_v13, -inf  ;;  %v2237_v17 = vpop.f32.mrf.mxu0  ;;  %v2239_v18 = vpop.f32.mrf.mxu1 }
 0x1b0   : > { %v702_v16 = vmax.f32 %v700_v12, %v701_v14  ;;  %v705_v19 = vmax.f32 %v2237_v17, %v2239_v18  ;;  %v677_v12 = vmax.f32 %v675_v7, %v676_v4  ;;  %v666_v14 = vsel %vm635_vm2, %v2169_v50, -inf }
 0x1b2   : > { %693 = vmax.xlane.f32.xlu1 %v692_v15  ;;  %703 = vmax.xlane.f32.xlu2 %v702_v16  ;;  %v661_v15 = vsel %vm635_vm2, %v2160_v47, -inf  ;;  %v665_v16 = vmax.f32 %v2162_v48, %v2164_v49 }
 0x1b3   : > { %1747 = vmatmul.msk.bf16.gmra.mxu2 %vm308_vm1, %v307_v29  ;;  %1715 = vmatmul.msk.bf16.gmra.mxu0 %vm308_vm1, %v307_v29  ;;  %v662_v24 = vmax.f32 %v660_v20, %v661_v15  ;;  %v645_v15 = vmax.f32 %v2132_v36, %v2134_v37 }
 0x1b4   : > { %1731 = vmatmul.msk.bf16.gmra.mxu1 %vm308_vm1, %v307_v29  ;;  %v650_v29 = vmax.f32 %v2141_v39, %v2143_v40 }
 0x1b6   : > { %v2249_v23 = vpop.f32.mrf.mxu2 }
 0x1b7   : > { %v706_v25 = vsel %vm635_vm2, %v2249_v23, -inf  ;;  %v2276_v21 = vpop.f32.mrf.mxu1 }
 0x1b8   : > { %v707_v28 = vmax.f32 %v705_v19, %v706_v25  ;;  %v2272_v19 = vpop.f32.mrf.mxu0  ;;  %v667_v25 = vmax.f32 %v665_v16, %v666_v14  ;;  %v641_v14 = vsel %vm635_vm2, %v2130_v35, -inf  ;;  %v640_v16 = vmax.f32 %v2126_v33, %v2128_v34 }
 0x1ba   : > { %683 = vmax.xlane.f32.xlu1 %v682_v26  ;;  %688 = vmax.xlane.f32.xlu2 %v687_v27  ;;  %v656_v26 = vsel %vm635_vm2, %v2154_v44, -inf  ;;  %v651_v27 = vsel %vm635_vm2, %v2145_v41, -inf  ;;  %v642_v20 = vmax.f32 %v640_v16, %v641_v14 }
 0x1bb   : > { %708 = vmax.xlane.f32.xlu0 %v707_v28  ;;  %v655_v28 = vmax.f32 %v2147_v42, %v2149_v43  ;;  %v652_v6 = vmax.f32 %v650_v29, %v651_v27 }
 0x1bd   : > { %v657_v7 = vmax.f32 %v655_v28, %v656_v26 }
 0x1be   : > { %v2278_v22 = vpop.f32.mrf.mxu2 }
 0x1bf   : > { %v2290_v10 = vpop.f32.mrf.mxu1  ;;  %v711_v27 = vsel %vm635_vm2, %v2278_v22, -inf }
 0x1c0   : > { %v2288_v4 = vpop.f32.mrf.mxu0  ;;  %3361 = vst [vmem:[#allocation6_spill] sm:$0xff] %v2290_v10 }
 0x1c1   : > { %3360 = vst [vmem:[#allocation5_spill] sm:$0xff] %v2288_v4 }
 0x1c2   : > { %673 = vmax.xlane.f32.xlu1 %v672_v11  ;;  %678 = vmax.xlane.f32.xlu2 %v677_v12  ;;  %v646_v12 = vsel %vm635_vm2, %v2139_v38, -inf }
 0x1c6   : > { %v2292_v11 = vpop.f32.mrf.mxu2 }
 0x1c7   : > { %3362 = vst [vmem:[#allocation7_spill] sm:$0xff] %v2292_v11  ;;  %v2308_v28 = vpop.f32.mrf.mxu1 }
 0x1c8   : > { %v2304_v26 = vpop.f32.mrf.mxu0  ;;  %3364 = vst [vmem:[#allocation9_spill] sm:$0xff] %v2308_v28 }
 0x1c9   : > { %3363 = vst [vmem:[#allocation8_spill] sm:$0xff] %v2304_v26 }
 0x1ca   : > { %663 = vmax.xlane.f32.xlu1 %v662_v24  ;;  %668 = vmax.xlane.f32.xlu2 %v667_v25  ;;  %v647_v24 = vmax.f32 %v645_v15, %v646_v12  ;;  %v710_v25 = vmax.f32 %v2272_v19, %v2276_v21 }
 0x1cc   : > { %v712_v12 = vmax.f32 %v710_v25, %v711_v27 }
 0x1ce   : > { %v2310_v29 = vpop.f32.mrf.mxu2 }
 0x1cf   : > { %3365 = vst [vmem:[#allocation10_spill] sm:$0xff] %v2310_v29  ;;  %v2318_v16 = vpop.f32.mrf.mxu1 }
 0x1d0   : > { %v2316_v15 = vpop.f32.mrf.mxu0  ;;  %3367 = vst [vmem:[#allocation12_spill] sm:$0xff] %v2318_v16 }
 0x1d1   : > { %3366 = vst [vmem:[#allocation11_spill] sm:$0xff] %v2316_v15 }
 0x1d2   : > { %653 = vmax.xlane.f32.xlu1 %v652_v6  ;;  %658 = vmax.xlane.f32.xlu2 %v657_v7  ;;  %v636_v6 = vsel %vm635_vm2, %v2124_v32, -inf  ;;  %v634_v7 = vmax.f32 %v2117_v30, %v2119_v31 }
 0x1d4   : > { %v637_v14 = vmax.f32 %v634_v7, %v636_v6 }
 0x1d7   : > { %v2324_v4 = vpop.f32.mrf.mxu1 }
 0x1d8   : > { %3370 = vst [vmem:[#allocation15_spill] sm:$0xff] %v2324_v4 }
 0x1da   : > { %643 = vmax.xlane.f32.xlu1 %v642_v20  ;;  %648 = vmax.xlane.f32.xlu2 %v647_v24  ;;  %v2320_v20 = vpop.f32.mrf.mxu2  ;;  %v2322_v24 = vpop.f32.mrf.mxu0 }
 0x1db   : > { %3368 = vst [vmem:[#allocation13_spill] sm:$0xff] %v2320_v20 }
 0x1dc   : > { %3369 = vst [vmem:[#allocation14_spill] sm:$0xff] %v2322_v24 }
 0x1df   : > { %v2330_v26 = vpop.f32.mrf.mxu1 }
 0x1e0   : > { %3373 = vst [vmem:[#allocation18_spill] sm:$0xff] %v2330_v26 }
 0x1e2   : > { %638 = vmax.xlane.f32.xlu2 %v637_v14  ;;  %713 = vmax.xlane.f32.xlu1 %v712_v12  ;;  %v2326_v10 = vpop.f32.mrf.mxu2  ;;  %v2328_v11 = vpop.f32.mrf.mxu0 }
 0x1e3   : > { %3371 = vst [vmem:[#allocation16_spill] sm:$0xff] %v2326_v10 }
 0x1e4   : > { %3372 = vst [vmem:[#allocation17_spill] sm:$0xff] %v2328_v11 }
 0x1e7   : > { %v2336_v6 = vpop.f32.mrf.mxu1 }
 0x1e8   : > { %3376 = vst [vmem:[#allocation21_spill] sm:$0xff] %v2336_v6 }
 0x1ea   : > { %v2332_v25 = vpop.f32.mrf.mxu2  ;;  %v2334_v27 = vpop.f32.mrf.mxu0 }
 0x1eb   : > { %3374 = vst [vmem:[#allocation19_spill] sm:$0xff] %v2332_v25 }
 0x1ec   : > { %3375 = vst [vmem:[#allocation20_spill] sm:$0xff] %v2334_v27 }
 0x1ef   : > { %v2342_v14 = vpop.f32.mrf.mxu1 }
 0x1f0   : > { %3379 = vst [vmem:[#allocation24_spill] sm:$0xff] %v2342_v14 }
 0x1f2   : > { %v2338_v7 = vpop.f32.mrf.mxu2  ;;  %v2340_v12 = vpop.f32.mrf.mxu0 }
 0x1f3   : > { %3377 = vst [vmem:[#allocation22_spill] sm:$0xff] %v2338_v7 }
 0x1f4   : > { %3378 = vst [vmem:[#allocation23_spill] sm:$0xff] %v2340_v12 }
 0x1f7   : > { %v2348_v20 = vpop.f32.mrf.mxu1 }
 0x1f8   : > { %3382 = vst [vmem:[#allocation27_spill] sm:$0xff] %v2348_v20 }
 0x1fa   : > { %v2344_v15 = vpop.f32.mrf.mxu2  ;;  %v2346_v16 = vpop.f32.mrf.mxu0 }
 0x1fb   : > { %3380 = vst [vmem:[#allocation25_spill] sm:$0xff] %v2344_v15 }
 0x1fc   : > { %3381 = vst [vmem:[#allocation26_spill] sm:$0xff] %v2346_v16 }
 0x1ff   : > { %v2356_v26 = vpop.f32.mrf.mxu1 }
 0x200   : > { %3385 = vst [vmem:[#allocation30_spill] sm:$0xff] %v2356_v26 }
 0x202   : > { %v2350_v28 = vpop.f32.mrf.mxu2  ;;  %v2354_v11 = vpop.f32.mrf.mxu0 }
 0x203   : > { %3383 = vst [vmem:[#allocation28_spill] sm:$0xff] %v2350_v28 }
 0x204   : > { %3384 = vst [vmem:[#allocation29_spill] sm:$0xff] %v2354_v11 }
 0x207   : > { %v2364_v12 = vpop.f32.mrf.mxu1 }
 0x208   : > { %3388 = vst [vmem:[#allocation33_spill] sm:$0xff] %v2364_v12 }
 0x20a   : > { %v2358_v25 = vpop.f32.mrf.mxu2  ;;  %v2362_v10 = vpop.f32.mrf.mxu0 }
 0x20b   : > { %3386 = vst [vmem:[#allocation31_spill] sm:$0xff] %v2358_v25 }
 0x20c   : > { %3387 = vst [vmem:[#allocation32_spill] sm:$0xff] %v2362_v10 }
 0x20f   : > { %v2372_v20 = vpop.f32.mrf.mxu1 }
 0x210   : > { %3391 = vst [vmem:[#allocation36_spill] sm:$0xff] %v2372_v20 }
 0x212   : > { %v2366_v14 = vpop.f32.mrf.mxu2  ;;  %v2370_v6 = vpop.f32.mrf.mxu0 }
 0x213   : > { %3389 = vst [vmem:[#allocation34_spill] sm:$0xff] %v2366_v14 }
 0x214   : > { %3390 = vst [vmem:[#allocation35_spill] sm:$0xff] %v2370_v6 }
 0x21a   : > { %v2377_v25 = vpop.f32.mrf.mxu2 }
 0x21b   : > { %3392 = vst [vmem:[#allocation37_spill] sm:$0xff] %v2377_v25  ;;  %v2385_v25 = vpop.f32.mrf.mxu0 }
 0x21d   : > { %v2352_v29 = vpop.xlane.xlu1 %698 }
 0x225   : > { %v694_v24 = vpop.xlane.xlu1 %693  ;;  %v2360_v4 = vpop.xlane.xlu2 %703 }
 0x226   : > { %v828_v20 = vsub.f32 %v2201_v63, %v694_v24  ;;  %v829_v63 = vsub.f32 %v2203_v0, %v694_v24 }
 0x22d   : > { %v684_v15 = vpop.xlane.xlu1 %683  ;;  %v2368_v27 = vpop.xlane.xlu2 %688 }
 0x22e   : > { %v822_v32 = vsub.f32 %v2186_v57, %v684_v15  ;;  %v823_v31 = vsub.f32 %v2188_v58, %v684_v15  ;;  %v824_v30 = vsub.f32 %v2190_v59, %v684_v15 }
 0x230   : > { %v945_v6 = vmul.f32 1.442695, %v822_v32  ;;  %v2390_v32 = vpop.f32.mrf.mxu1 }
 0x235   : > { %v674_v7 = vpop.xlane.xlu1 %673  ;;  %v679_v16 = vpop.xlane.xlu2 %678 }
 0x236   : > { %v816_v28 = vsub.f32 %v2171_v51, %v674_v7  ;;  %v817_v11 = vsub.f32 %v2173_v52, %v674_v7  ;;  %v818_v26 = vsub.f32 %v2175_v53, %v674_v7  ;;  %v947_v51 = vmul.f32 1.442695, %v823_v31 }
 0x237   : > { %v949_v52 = vmul.f32 1.442695, %v824_v30  ;;  %v957_v31 = vmul.f32 1.442695, %v828_v20  ;;  %v820_v15 = vsub.f32 %v2179_v55, %v679_v16 }
 0x238   : > { %v933_v10 = vmul.f32 1.442695, %v816_v28  ;;  %v935_v12 = vmul.f32 1.442695, %v817_v11  ;;  %v937_v14 = vmul.f32 1.442695, %v818_v26  ;;  %v830_v11 = vsub.f32 %v2205_v1, %v694_v24 }
 0x23a   : > { %1773 = vpow2.f32 %v933_v10  ;;  %v2395_v10 = vpop.f32.mrf.mxu2 }
 0x23b   : > { %1775 = vpow2.f32 %v935_v12  ;;  %v821_v12 = vsub.f32 %v2184_v56, %v679_v16 }
 0x23c   : > { %1777 = vpow2.f32 %v937_v14  ;;  %v961_v14 = vmul.f32 1.442695, %v830_v11 }
 0x23d   : > { %v669_v53 = vpop.xlane.xlu2 %668  ;;  %v2383_v7 = vpop.xlane.xlu1 %663  ;;  %1779 = vpow2.f32 %v945_v6  ;;  %v959_v6 = vmul.f32 1.442695, %v829_v63 }
 0x23e   : > { %v813_v57 = vsub.f32 %v2162_v48, %v669_v53  ;;  %v814_v58 = vsub.f32 %v2164_v49, %v669_v53  ;;  %v815_v59 = vsub.f32 %v2169_v50, %v669_v53  ;;  %1781 = vpow2.f32 %v947_v51  ;;  %v2423_v63 = vpop.f32.mrf.mxu1 }
 0x23f   : > { %1783 = vpow2.f32 %v949_v52  ;;  %v819_v48 = vsub.f32 %v2177_v54, %v679_v16  ;;  %v941_v53 = vmul.f32 1.442695, %v820_v15  ;;  %v2417_v16 = vpop.f32.mrf.mxu0 }
 0x240   : > { %v2393_v30 = vpop.eup %1773  ;;  %v927_v26 = vmul.f32 1.442695, %v813_v57  ;;  %v929_v49 = vmul.f32 1.442695, %v814_v58  ;;  %v931_v0 = vmul.f32 1.442695, %v815_v59  ;;  %1785 = vpow2.f32 %v957_v31 }
 0x241   : > { %v2398_v28 = vpop.eup %1775  ;;  %v939_v52 = vmul.f32 1.442695, %v819_v48  ;;  %v943_v57 = vmul.f32 1.442695, %v821_v12  ;;  %v825_v31 = vsub.f32 %v2192_v60, %v2368_v27 }
 0x242   : > { %v2401_v50 = vpop.eup %1777  ;;  %v1118_v20 = vadd.f32 %v2398_v28, %v2393_v30  ;;  %1787 = vpow2.f32 %v927_v26  ;;  %v2431_v48 = vpop.f32.mrf.mxu2 }
 0x243   : > { %v1119_v1 = vsel %vm635_vm2, %v2401_v50, 0.0  ;;  %v2409_v24 = vpop.eup %1779  ;;  %1789 = vpow2.f32 %v929_v49  ;;  %v826_v49 = vsub.f32 %v2194_v61, %v2368_v27  ;;  %v834_v61 = vsub.f32 %v2223_v8, %v2360_v4 }
 0x244   : > { %v1120_v54 = vadd.f32 %v1119_v1, %v1118_v20  ;;  %v2411_v51 = vpop.eup %1781  ;;  %1791 = vpow2.f32 %v931_v0  ;;  %v827_v0 = vsub.f32 %v2199_v62, %v2368_v27  ;;  %v951_v1 = vmul.f32 1.442695, %v825_v31 }
 0x245   : > { %v2413_v55 = vpop.eup %1783  ;;  %1793 = vpow2.f32 %v959_v6  ;;  %v2415_v56 = vpop.xlane.xlu1 %653  ;;  %v1128_v58 = vadd.f32 %v2411_v51, %v2409_v24  ;;  %v835_v27 = vsub.f32 %v2225_v9, %v2360_v4  ;;  %v836_v31 = vsub.f32 %v2233_v13, %v2360_v4 }
 0x246   : > { %3393 = vst [vmem:[#allocation38_spill] sm:$0xff] %v2413_v55  ;;  %1121 = vadd.xlane.f32.xlu1 %v1120_v54  ;;  %1795 = vpow2.f32 %v961_v14  ;;  %v2421_v59 = vpop.eup %1785  ;;  %v1129_v11 = vsel %vm635_vm2, %v2413_v55, 0.0  ;;  %v953_v54 = vmul.f32 1.442695, %v826_v49  ;;  %v969_v9 = vmul.f32 1.442695, %v834_v61 }
 0x247   : > { %3394 = vst [vmem:[#allocation39_spill] sm:$0xff] %v2421_v59  ;;  %1797 = vpow2.f32 %v939_v52  ;;  %v1130_v6 = vadd.f32 %v1129_v11, %v1128_v58  ;;  %v973_v4 = vmul.f32 1.442695, %v836_v31  ;;  %v831_v31 = vsub.f32 %v2207_v2, %v2352_v29 }
 0x248   : > { %v2429_v26 = vpop.eup %1787  ;;  %1799 = vpow2.f32 %v941_v53  ;;  %v955_v53 = vmul.f32 1.442695, %v827_v0  ;;  %v2467_v0 = vpop.f32.mrf.mxu0 }
 0x249   : > { %v2435_v15 = vpop.eup %1789  ;;  %1801 = vpow2.f32 %v943_v57  ;;  %3398 = vst [vmem:[#allocation43_spill] sm:$0xff] %v2467_v0 }
 0x24a   : > { %v2439_v20 = vpop.eup %1791  ;;  %v1113_v60 = vadd.f32 %v2435_v15, %v2429_v26  ;;  %1803 = vpow2.f32 %v951_v1 }
 0x24b   : > { %v2443_v12 = vpop.eup %1793  ;;  %v1114_v52 = vsel %vm635_vm2, %v2439_v20, 0.0  ;;  %1805 = vpow2.f32 %v953_v54 }
 0x24c   : > { %3395 = vst [vmem:[#allocation40_spill] sm:$0xff] %v2443_v12  ;;  %v2445_v14 = vpop.eup %1795  ;;  %v1115_v57 = vadd.f32 %v1114_v52, %v1113_v60  ;;  %v1138_v8 = vadd.f32 %v2443_v12, %v2421_v59  ;;  %v971_v60 = vmul.f32 1.442695, %v835_v27  ;;  %v2469_v52 = vpop.f32.mrf.mxu1  ;;  %1807 = vpow2.f32 %v955_v53 }
 0x24d   : > { %3396 = vst [vmem:[#allocation41_spill] sm:$0xff] %v2445_v14  ;;  %v2451_v62 = vpop.eup %1797  ;;  %v2463_v49 = vpop.xlane.xlu1 %643  ;;  %1809 = vpow2.f32 %v969_v9 }
 0x24e   : > { %1131 = vadd.xlane.f32.xlu1 %v1130_v6  ;;  %v2455_v58 = vpop.eup %1799  ;;  %1116 = vadd.xlane.f32.xlu2 %v1115_v57  ;;  %v1139_v6 = vsel %vm635_vm2, %v2445_v14, 0.0  ;;  %3399 = vst [vmem:[#allocation44_spill] sm:$0xff] %v2469_v52  ;;  %v2473_v12 = vpop.f32.mrf.mxu2  ;;  %1811 = vpow2.f32 %v971_v60  ;;  %v833_v60 = vsub.f32 %v2219_v5, %v2352_v29 }
 0x24f   : > { %v2461_v11 = vpop.eup %1801  ;;  %v1123_v13 = vadd.f32 %v2455_v58, %v2451_v62  ;;  %3400 = vst [vmem:[#allocation45_spill] sm:$0xff] %v2473_v12  ;;  %v1140_v57 = vadd.f32 %v1139_v6, %v1138_v8  ;;  %1813 = vpow2.f32 %v973_v4  ;;  %v781_v59 = vsel %vm635_vm2, %v2473_v12, -inf }
 0x250   : > { %3397 = vst [vmem:[#allocation42_spill] sm:$0xff] %v2461_v11  ;;  %v1124_v1 = vsel %vm635_vm2, %v2461_v11, 0.0  ;;  %v2477_v61 = vpop.eup %1803  ;;  %v832_v8 = vsub.f32 %v2209_v3, %v2352_v29  ;;  %v780_v6 = vmax.f32 %v2467_v0, %v2469_v52  ;;  %v2491_v9 = vpop.f32.mrf.mxu0  ;;  %v963_v52 = vmul.f32 1.442695, %v831_v31 }
 0x251   : > { %3401 = vst [vmem:[#allocation46_spill] sm:$0xff] %v2477_v61  ;;  %v1125_v54 = vadd.f32 %v1124_v1, %v1123_v13  ;;  %v2479_v27 = vpop.eup %1805  ;;  %v967_v14 = vmul.f32 1.442695, %v833_v60 }
 0x252   : > { %3402 = vst [vmem:[#allocation47_spill] sm:$0xff] %v2479_v27  ;;  %v2481_v53 = vpop.eup %1807  ;;  %v1133_v2 = vadd.f32 %v2479_v27, %v2477_v61  ;;  %v965_v5 = vmul.f32 1.442695, %v832_v8  ;;  %1815 = vpow2.f32 %v963_v52  ;;  %v709_v52 = vpop.xlane.xlu0 %708 }
 0x253   : > { %v2499_v1 = vpop.eup %1809  ;;  %v1134_v3 = vsel %vm635_vm2, %v2481_v53, 0.0 }
 0x254   : > { %v2495_v4 = vpop.f32.mrf.mxu1  ;;  %v2505_v12 = vpop.eup %1811  ;;  %v1135_v61 = vadd.f32 %v1134_v3, %v1133_v2  ;;  %1817 = vpow2.f32 %v965_v5  ;;  %v812_v3 = vsub.f32 %v2160_v47, %v2383_v7  ;;  %v837_v5 = vsub.f32 %v2237_v17, %v709_v52 }
 0x255   : > { %v714_v13 = vpop.xlane.xlu1 %713  ;;  %3403 = vst [vmem:[#allocation48_spill] sm:$0xff] %v2505_v12  ;;  %v2507_v0 = vpop.eup %1813  ;;  %v1148_v11 = vadd.f32 %v2505_v12, %v2499_v1  ;;  %1819 = vpow2.f32 %v967_v14 }
 0x256   : > { %1141 = vadd.xlane.f32.xlu1 %v1140_v57  ;;  %1126 = vadd.xlane.f32.xlu2 %v1125_v54  ;;  %v2501_v57 = vpop.f32.mrf.mxu2  ;;  %v782_v54 = vmax.f32 %v780_v6, %v781_v59  ;;  %v840_v29 = vsub.f32 %v2272_v19, %v714_v13  ;;  %v841_v27 = vsub.f32 %v2276_v21, %v714_v13  ;;  %v1149_v59 = vsel %vm635_vm2, %v2507_v0, 0.0 }
 0x257   : > { %v842_v55 = vsub.f32 %v2278_v22, %v714_v13  ;;  %v776_v19 = vsel %vm635_vm2, %v2431_v48, -inf  ;;  %v1150_v21 = vadd.f32 %v1149_v59, %v1148_v11  ;;  %v775_v22 = vmax.f32 %v2417_v16, %v2423_v63 }
 0x258   : > { %v981_v31 = vmul.f32 1.442695, %v840_v29  ;;  %v983_v8 = vmul.f32 1.442695, %v841_v27  ;;  %v2520_v60 = vpop.f32.mrf.mxu0  ;;  %v2528_v14 = vpop.eup %1815 }
 0x259   : > { %v985_v6 = vmul.f32 1.442695, %v842_v55  ;;  %v811_v55 = vsub.f32 %v2158_v46, %v2383_v7  ;;  %v777_v11 = vmax.f32 %v775_v22, %v776_v19  ;;  %v838_v46 = vsub.f32 %v2239_v18, %v709_v52 }
 0x25a   : > { %1821 = vpow2.f32 %v981_v31  ;;  %v2532_v27 = vpop.eup %1817  ;;  %v839_v31 = vsub.f32 %v2249_v23, %v709_v52  ;;  %v925_v19 = vmul.f32 1.442695, %v812_v3  ;;  %v975_v22 = vmul.f32 1.442695, %v837_v5 }
 0x25b   : > { %1823 = vpow2.f32 %v983_v8  ;;  %3404 = vst [vmem:[#allocation49_spill] sm:$0xff] %v2532_v27  ;;  %v923_v8 = vmul.f32 1.442695, %v811_v55  ;;  %v1143_v47 = vadd.f32 %v2532_v27, %v2528_v14  ;;  %v977_v18 = vmul.f32 1.442695, %v838_v46 }
 0x25c   : > { %v2522_v13 = vpop.f32.mrf.mxu1  ;;  %1825 = vpow2.f32 %v985_v6  ;;  %v979_v23 = vmul.f32 1.442695, %v839_v31  ;;  %v785_v46 = vmax.f32 %v2491_v9, %v2495_v4  ;;  %v786_v31 = vsel %vm635_vm2, %v2501_v57, -inf }
 0x25e   : > { %783 = vmax.xlane.f32.xlu1 %v782_v54  ;;  %1136 = vadd.xlane.f32.xlu2 %v1135_v61  ;;  %v810_v61 = vsub.f32 %v2156_v45, %v2383_v7  ;;  %v2526_v2 = vpop.f32.mrf.mxu2  ;;  %v790_v45 = vmax.f32 %v2520_v60, %v2522_v13  ;;  %v2538_v54 = vpop.eup %1819 }
 0x25f   : > { %v791_v29 = vsel %vm635_vm2, %v2526_v2, -inf  ;;  %v1144_v6 = vsel %vm635_vm2, %v2538_v54, 0.0 }
 0x260   : > { %v921_v59 = vmul.f32 1.442695, %v810_v61  ;;  %v2547_v7 = vpop.eup %1821  ;;  %v792_v17 = vmax.f32 %v790_v45, %v791_v29  ;;  %v659_v61 = vpop.xlane.xlu2 %658  ;;  %v1145_v52 = vadd.f32 %v1144_v6, %v1143_v47 }
 0x261   : > { %v807_v3 = vsub.f32 %v2147_v42, %v659_v61  ;;  %v808_v5 = vsub.f32 %v2149_v43, %v659_v61  ;;  %v809_v29 = vsub.f32 %v2154_v44, %v659_v61  ;;  %v804_v43 = vsub.f32 %v2141_v39, %v2415_v56 }
 0x262   : > { %1827 = vpow2.f32 %v921_v59 }
 0x263   : > { %1829 = vpow2.f32 %v923_v8  ;;  %v915_v47 = vmul.f32 1.442695, %v807_v3  ;;  %v917_v6 = vmul.f32 1.442695, %v808_v5  ;;  %v909_v3 = vmul.f32 1.442695, %v804_v43 }
 0x264   : > { %1831 = vpow2.f32 %v925_v19  ;;  %v771_v43 = vsel %vm635_vm2, %v2395_v10, -inf }
 0x265   : > { %1833 = vpow2.f32 %v975_v22  ;;  %v919_v22 = vmul.f32 1.442695, %v809_v29 }
 0x266   : > { %1151 = vadd.xlane.f32.xlu1 %v1150_v21  ;;  %778 = vmax.xlane.f32.xlu2 %v777_v11  ;;  %v2551_v21 = vpop.eup %1823  ;;  %1835 = vpow2.f32 %v977_v18  ;;  %v787_v18 = vmax.f32 %v785_v46, %v786_v31 }
 0x267   : > { %3405 = vst [vmem:[#allocation50_spill] sm:$0xff] %v2551_v21  ;;  %v2553_v11 = vpop.eup %1825  ;;  %v1158_v55 = vadd.f32 %v2551_v21, %v2547_v7  ;;  %1837 = vpow2.f32 %v979_v23  ;;  %v806_v23 = vsub.f32 %v2145_v41, %v2415_v56 }
 0x268   : > { %v1159_v45 = vsel %vm635_vm2, %v2553_v11, 0.0  ;;  %v2564_v59 = vpop.eup %1827  ;;  %1839 = vpow2.f32 %v915_v47 }
 0x269   : > { %3406 = vst [vmem:[#allocation51_spill] sm:$0xff] %v2564_v59  ;;  %v1160_v8 = vadd.f32 %v1159_v45, %v1158_v55  ;;  %v2568_v42 = vpop.eup %1829  ;;  %1841 = vpow2.f32 %v917_v6  ;;  %v913_v5 = vmul.f32 1.442695, %v806_v23 }
 0x26a   : > { %3407 = vst [vmem:[#allocation52_spill] sm:$0xff] %v2568_v42  ;;  %v2570_v19 = vpop.eup %1831  ;;  %1843 = vpow2.f32 %v919_v22 }
 0x26b   : > { %v2574_v44 = vpop.eup %1833  ;;  %v1109_v39 = vsel %vm635_vm2, %v2570_v19, 0.0  ;;  %1845 = vpow2.f32 %v909_v3 }
 0x26c   : > { %v2578_v61 = vpop.eup %1835 }
 0x26d   : > { %3408 = vst [vmem:[#allocation53_spill] sm:$0xff] %v2578_v61  ;;  %v2584_v55 = vpop.eup %1837  ;;  %v1153_v45 = vadd.f32 %v2578_v61, %v2574_v44  ;;  %v3429_v61 = vld [vmem:[#allocation29_spill] sm:$0xff] }
 0x26e   : > { %793 = vmax.xlane.f32.xlu1 %v792_v17  ;;  %1146 = vadd.xlane.f32.xlu2 %v1145_v52  ;;  %v805_v17 = vsub.f32 %v2143_v40, %v2415_v56  ;;  %v1108_v52 = vadd.f32 %v2568_v42, %v2564_v59  ;;  %v1154_v41 = vsel %vm635_vm2, %v2584_v55, 0.0  ;;  %v649_v56 = vpop.xlane.xlu2 %648  ;;  %v2592_v46 = vpop.eup %1839  ;;  %v3423_v42 = vld [vmem:[#allocation4_spill] sm:$0xff] }
 0x26f   : > { %3409 = vst [vmem:[#allocation54_spill] sm:$0xff] %v2592_v46  ;;  %v1155_v31 = vadd.f32 %v1154_v41, %v1153_v45  ;;  %v801_v6 = vsub.f32 %v2132_v36, %v649_v56  ;;  %v802_v22 = vsub.f32 %v2134_v37, %v649_v56 }
 0x270   : > { %v911_v40 = vmul.f32 1.442695, %v805_v17  ;;  %v1110_v29 = vadd.f32 %v1109_v39, %v1108_v52  ;;  %v770_v17 = vmax.f32 %v2385_v25, %v2390_v32 }
 0x271   : > { %v903_v36 = vmul.f32 1.442695, %v801_v6  ;;  %v905_v37 = vmul.f32 1.442695, %v802_v22 }
 0x272   : > { %1847 = vpow2.f32 %v911_v40  ;;  %v772_v39 = vmax.f32 %v770_v17, %v771_v43  ;;  %v3413_v17 = vld [vmem:[#allocation37_spill] sm:$0xff] }
 0x273   : > { %1849 = vpow2.f32 %v913_v5  ;;  %v798_v5 = vsub.f32 %v2126_v33, %v2463_v49 }
 0x274   : > { %1851 = vpow2.f32 %v903_v36 }
 0x275   : > { %v897_v6 = vmul.f32 1.442695, %v798_v5  ;;  %1853 = vpow2.f32 %v905_v37  ;;  %v3418_v37 = vld [vmem:[#allocation34_spill] sm:$0xff] }
 0x276   : > { %1161 = vadd.xlane.f32.xlu1 %v1160_v8  ;;  %788 = vmax.xlane.f32.xlu2 %v787_v18  ;;  %v2594_v8 = vpop.eup %1841  ;;  %v803_v18 = vsub.f32 %v2139_v38, %v649_v56  ;;  %v799_v38 = vsub.f32 %v2128_v34, %v2463_v49  ;;  %v800_v56 = vsub.f32 %v2130_v35, %v2463_v49  ;;  %v766_v34 = vsel %vm635_vm2, %v3413_v17, -inf  ;;  %v639_v49 = vpop.xlane.xlu2 %638 }
 0x277   : > { %3410 = vst [vmem:[#allocation55_spill] sm:$0xff] %v2594_v8  ;;  %v2596_v47 = vpop.eup %1843  ;;  %v1103_v23 = vadd.f32 %v2594_v8, %v2592_v46  ;;  %v797_v8 = vsub.f32 %v3423_v42, %v639_v49 }
 0x278   : > { %v2607_v52 = vpop.eup %1845  ;;  %v1104_v3 = vsel %vm635_vm2, %v2596_v47, 0.0  ;;  %v899_v33 = vmul.f32 1.442695, %v799_v38  ;;  %v901_v22 = vmul.f32 1.442695, %v800_v56  ;;  %v761_v38 = vsel %vm635_vm2, %v3418_v37, -inf }
 0x279   : > { %3411 = vst [vmem:[#allocation56_spill] sm:$0xff] %v2607_v52  ;;  %v2611_v40 = vpop.eup %1847  ;;  %v1105_v41 = vadd.f32 %v1104_v3, %v1103_v23  ;;  %v3414_v23 = vld [vmem:[#allocation36_spill] sm:$0xff]  ;;  %v895_v21 = vmul.f32 1.442695, %v797_v8 }
 0x27a   : > { %3412 = vst [vmem:[#allocation57_spill] sm:$0xff] %v2611_v40  ;;  %v2613_v45 = vpop.eup %1849 }
 0x27b   : > { %v1099_v43 = vsel %vm635_vm2, %v2613_v45, 0.0  ;;  %v2629_v3 = vpop.eup %1851 }
 0x27c   : > { %3416 = vst [vmem:[#allocation37_spill] sm:$0xff] %v2629_v3 }
 0x27e   : > { %1111 = vadd.xlane.f32.xlu1 %v1110_v29  ;;  %1156 = vadd.xlane.f32.xlu2 %v1155_v31  ;;  %v907_v29 = vmul.f32 1.442695, %v803_v18  ;;  %v1098_v31 = vadd.f32 %v2611_v40, %v2607_v52  ;;  %v3422_v40 = vld [vmem:[#allocation3_spill] sm:$0xff]  ;;  %v3437_v52 = vld [vmem:[#allocation21_spill] sm:$0xff] }
 0x280   : > { %1855 = vpow2.f32 %v907_v29  ;;  %v1100_v18 = vadd.f32 %v1099_v43, %v1098_v31  ;;  %v3419_v29 = vld [vmem:[#allocation2_spill] sm:$0xff]  ;;  %v3420_v31 = vld [vmem:[#allocation33_spill] sm:$0xff]  ;;  %v3421_v43 = vld [vmem:[#allocation32_spill] sm:$0xff] }
 0x281   : > { %1857 = vpow2.f32 %v897_v6  ;;  %v795_v56 = vsub.f32 %v3419_v29, %v639_v49  ;;  %v760_v6 = vmax.f32 %v3421_v43, %v3420_v31 }
 0x282   : > { %1859 = vpow2.f32 %v899_v33 }
 0x283   : > { %1861 = vpow2.f32 %v901_v22  ;;  %v762_v22 = vmax.f32 %v760_v6, %v761_v38  ;;  %v891_v29 = vmul.f32 1.442695, %v795_v56  ;;  %v3427_v38 = vld [vmem:[#allocation31_spill] sm:$0xff] }
 0x284   : > { %v756_v6 = vsel %vm635_vm2, %v3427_v38, -inf }
 0x285   : > { %1863 = vpow2.f32 %v891_v29  ;;  %v3433_v29 = vld [vmem:[#allocation28_spill] sm:$0xff] }
 0x286   : > { %773 = vmax.xlane.f32.xlu1 %v772_v39  ;;  %1106 = vadd.xlane.f32.xlu2 %v1105_v41  ;;  %v3415_v39 = vld [vmem:[#allocation35_spill] sm:$0xff]  ;;  %v2631_v41 = vpop.eup %1853 }
 0x287   : > { %v765_v35 = vmax.f32 %v3415_v39, %v3414_v23  ;;  %3417 = vst [vmem:[#allocation36_spill] sm:$0xff] %v2631_v41  ;;  %v2633_v5 = vpop.eup %1855  ;;  %v1093_v33 = vadd.f32 %v2631_v41, %v2629_v3  ;;  %v3428_v41 = vld [vmem:[#allocation30_spill] sm:$0xff]  ;;  %v3438_v3 = vld [vmem:[#allocation20_spill] sm:$0xff] }
 0x289   : > { %v767_v36 = vmax.f32 %v765_v35, %v766_v34  ;;  %v2644_v34 = vpop.eup %1857  ;;  %v1094_v35 = vsel %vm635_vm2, %v2633_v5, 0.0 }
 0x28a   : > { %3424 = vst [vmem:[#allocation35_spill] sm:$0xff] %v2644_v34  ;;  %v2648_v12 = vpop.eup %1859 }
 0x28b   : > { %3425 = vst [vmem:[#allocation34_spill] sm:$0xff] %v2648_v12  ;;  %v1088_v42 = vadd.f32 %v2648_v12, %v2644_v34 }
 0x28e   : > { %1101 = vadd.xlane.f32.xlu1 %v1100_v18  ;;  %768 = vmax.xlane.f32.xlu2 %v767_v36  ;;  %v796_v18 = vsub.f32 %v3422_v40, %v639_v49  ;;  %v2650_v36 = vpop.eup %1861  ;;  %v1095_v40 = vadd.f32 %v1094_v35, %v1093_v33 }
 0x28f   : > { %3426 = vst [vmem:[#allocation2_spill] sm:$0xff] %v2650_v36  ;;  %v1089_v49 = vsel %vm635_vm2, %v2650_v36, 0.0  ;;  %v2660_v8 = vpop.eup %1863  ;;  %v740_v36 = vmax.f32 %v3438_v3, %v3437_v52  ;;  %v3446_v52 = vld [vmem:[#allocation18_spill] sm:$0xff]  ;;  %v3447_v3 = vld [vmem:[#allocation17_spill] sm:$0xff] }
 0x290   : > { %v893_v27 = vmul.f32 1.442695, %v796_v18  ;;  %v1090_v56 = vadd.f32 %v1089_v49, %v1088_v42  ;;  %v755_v18 = vmax.f32 %v3429_v61, %v3428_v41  ;;  %3430 = vst [vmem:[#allocation33_spill] sm:$0xff] %v2660_v8 }
 0x292   : > { %1865 = vpow2.f32 %v893_v27  ;;  %v757_v33 = vmax.f32 %v755_v18, %v756_v6  ;;  %v3434_v27 = vld [vmem:[#allocation27_spill] sm:$0xff]  ;;  %v3436_v18 = vld [vmem:[#allocation22_spill] sm:$0xff] }
 0x293   : > { %1867 = vpow2.f32 %v895_v21  ;;  %v3435_v21 = vld [vmem:[#allocation26_spill] sm:$0xff]  ;;  %v741_v34 = vsel %vm635_vm2, %v3436_v18, -inf }
 0x294   : > { %v750_v12 = vmax.f32 %v3435_v21, %v3434_v27  ;;  %v742_v46 = vmax.f32 %v740_v36, %v741_v34  ;;  %v3441_v27 = vld [vmem:[#allocation23_spill] sm:$0xff]  ;;  %v3448_v36 = vld [vmem:[#allocation10_spill] sm:$0xff] }
 0x296   : > { %763 = vmax.xlane.f32.xlu1 %v762_v22  ;;  %1096 = vadd.xlane.f32.xlu2 %v1095_v40  ;;  %v751_v40 = vsel %vm635_vm2, %v3433_v29, -inf  ;;  %v3440_v29 = vld [vmem:[#allocation24_spill] sm:$0xff] }
 0x297   : > { %v752_v49 = vmax.f32 %v750_v12, %v751_v40  ;;  %v3442_v40 = vld [vmem:[#allocation16_spill] sm:$0xff] }
 0x298   : > { %v2662_v22 = vpop.eup %1865 }
 0x299   : > { %3431 = vst [vmem:[#allocation32_spill] sm:$0xff] %v2662_v22  ;;  %v2664_v35 = vpop.eup %1867  ;;  %v1083_v42 = vadd.f32 %v2662_v22, %v2660_v8  ;;  %v745_v22 = vmax.f32 %v3441_v27, %v3440_v29  ;;  %v3451_v29 = vld [vmem:[#allocation13_spill] sm:$0xff]  ;;  %v3452_v27 = vld [vmem:[#allocation12_spill] sm:$0xff] }
 0x29a   : > { %3432 = vst [vmem:[#allocation3_spill] sm:$0xff] %v2664_v35 }
 0x29e   : > { %1091 = vadd.xlane.f32.xlu1 %v1090_v56  ;;  %758 = vmax.xlane.f32.xlu2 %v757_v33  ;;  %v1084_v56 = vsel %vm635_vm2, %v2664_v35, 0.0  ;;  %v3439_v33 = vld [vmem:[#allocation25_spill] sm:$0xff] }
 0x29f   : > { %v1085_v6 = vadd.f32 %v1084_v56, %v1083_v42  ;;  %v746_v59 = vsel %vm635_vm2, %v3439_v33, -inf  ;;  %v3443_v42 = vld [vmem:[#allocation15_spill] sm:$0xff]  ;;  %v3444_v56 = vld [vmem:[#allocation14_spill] sm:$0xff]  ;;  %v735_v33 = vmax.f32 %v3447_v3, %v3446_v52  ;;  %v3456_v52 = vld [vmem:[#allocation5_spill] sm:$0xff] }
 0x2a0   : > { %v747_v12 = vmax.f32 %v745_v22, %v746_v59  ;;  %v730_v8 = vmax.f32 %v3444_v56, %v3443_v42  ;;  %v3449_v22 = vld [vmem:[#allocation9_spill] sm:$0xff]  ;;  %v726_v42 = vsel %vm635_vm2, %v3451_v29, -inf }
 0x2a6   : > { %753 = vmax.xlane.f32.xlu1 %v752_v49  ;;  %1086 = vadd.xlane.f32.xlu2 %v1085_v6  ;;  %v731_v49 = vsel %vm635_vm2, %v3442_v40, -inf  ;;  %v3445_v6 = vld [vmem:[#allocation19_spill] sm:$0xff]  ;;  %v3450_v40 = vld [vmem:[#allocation8_spill] sm:$0xff] }
 0x2a7   : > { %v736_v35 = vsel %vm635_vm2, %v3445_v6, -inf  ;;  %v732_v18 = vmax.f32 %v730_v8, %v731_v49  ;;  %v3453_v6 = vld [vmem:[#allocation11_spill] sm:$0xff] }
 0x2a8   : > { %v737_v34 = vmax.f32 %v735_v33, %v736_v35  ;;  %v725_v8 = vmax.f32 %v3453_v6, %v3452_v27  ;;  %v3454_v35 = vld [vmem:[#allocation7_spill] sm:$0xff] }
 0x2a9   : > { %v716_v33 = vsel %vm635_vm2, %v3454_v35, -inf  ;;  %v3470_v35 = vld [vmem:[#allocation45_spill] sm:$0xff] }
 0x2aa   : > { %v727_v49 = vmax.f32 %v725_v8, %v726_v42 }
 0x2ae   : > { %743 = vmax.xlane.f32.xlu1 %v742_v46  ;;  %748 = vmax.xlane.f32.xlu2 %v747_v12  ;;  %v721_v46 = vsel %vm635_vm2, %v3448_v36, -inf  ;;  %v720_v12 = vmax.f32 %v3450_v40, %v3449_v22  ;;  %v3455_v36 = vld [vmem:[#allocation6_spill] sm:$0xff] }
 0x2af   : > { %v715_v3 = vmax.f32 %v3456_v52, %v3455_v36 }
 0x2b0   : > { %v722_v56 = vmax.f32 %v720_v12, %v721_v46 }
 0x2b1   : > { %v717_v22 = vmax.f32 %v715_v3, %v716_v33 }
 0x2b6   : > { %733 = vmax.xlane.f32.xlu1 %v732_v18  ;;  %738 = vmax.xlane.f32.xlu2 %v737_v34 }
 0x2b9   : > { %v1122_v59 = vpop.xlane.xlu1 %1121 }
 0x2ba   : > { %1869 = vrcp.f32 %v1122_v59 }
 0x2be   : > { %723 = vmax.xlane.f32.xlu1 %v722_v56  ;;  %728 = vmax.xlane.f32.xlu2 %v727_v49 }
 0x2c0   : > { %v1870_v40 = vpop.eup %1869 }
 0x2c1   : > { %v1132_v18 = vpop.xlane.xlu1 %1131  ;;  %v1117_v34 = vpop.xlane.xlu2 %1116  ;;  %v2703_v56 = vmul.f32 %v1870_v40, %v2393_v30  ;;  %v2706_v42 = vmul.f32 %v1870_v40, %v2398_v28  ;;  %v3465_v28 = vld [vmem:[#allocation38_spill] sm:$0xff] }
 0x2c2   : > { %1871 = vrcp.f32 %v1117_v34 }
 0x2c3   : > { %1873 = vrcp.f32 %v1132_v18  ;;  %3457 = vst [vmem:[#allocation4_spill] sm:$0xff] %v2706_v42 }
 0x2c6   : > { %718 = vmax.xlane.f32.xlu2 %v717_v22  ;;  %v2718_v22 = vmul.f32 %v1870_v40, %v2401_v50 }
 0x2c8   : > { %v1872_v12 = vpop.eup %1871  ;;  %3460 = vst [vmem:[#allocation29_spill] sm:$0xff] %v2718_v22 }
 0x2c9   : > { %v1142_v46 = vpop.xlane.xlu1 %1141  ;;  %v1127_v59 = vpop.xlane.xlu2 %1126  ;;  %v2709_v8 = vmul.f32 %v1872_v12, %v2429_v26  ;;  %v2712_v49 = vmul.f32 %v1872_v12, %v2435_v15  ;;  %v2715_v3 = vmul.f32 %v1872_v12, %v2439_v20 }
 0x2ca   : > { %1875 = vrcp.f32 %v1127_v59  ;;  %v1874_v18 = vpop.eup %1873  ;;  %v3463_v59 = vld [vmem:[#allocation42_spill] sm:$0xff] }
 0x2cb   : > { %3458 = vst [vmem:[#allocation31_spill] sm:$0xff] %v2712_v49  ;;  %1877 = vrcp.f32 %v1142_v46  ;;  %v2730_v50 = vmul.f32 %v1874_v18, %v2409_v24  ;;  %v2733_v40 = vmul.f32 %v1874_v18, %v2411_v51  ;;  %v2742_v30 = vmul.f32 %v1874_v18, %v3465_v28  ;;  %v3467_v28 = vld [vmem:[#allocation41_spill] sm:$0xff]  ;;  %v3469_v49 = vld [vmem:[#allocation44_spill] sm:$0xff] }
 0x2cc   : > { %3459 = vst [vmem:[#allocation30_spill] sm:$0xff] %v2715_v3 }
 0x2cd   : > { %3461 = vst [vmem:[#allocation26_spill] sm:$0xff] %v2733_v40 }
 0x2ce   : > { %3466 = vst [vmem:[#allocation11_spill] sm:$0xff] %v2742_v30 }
 0x2d0   : > { %v1876_v15 = vpop.eup %1875 }
 0x2d1   : > { %v784_v33 = vpop.xlane.xlu1 %783  ;;  %v1137_v34 = vpop.xlane.xlu2 %1136  ;;  %v2727_v20 = vmul.f32 %v1876_v15, %v2451_v62  ;;  %v2736_v12 = vmul.f32 %v1876_v15, %v2455_v58  ;;  %v2739_v26 = vmul.f32 %v1876_v15, %v3463_v59 }
 0x2d2   : > { %1879 = vrcp.f32 %v1137_v34  ;;  %v2750_v46 = vpop.eup %1877  ;;  %v884_v36 = vsub.f32 %v3470_v35, %v784_v33 }
 0x2d3   : > { %3462 = vst [vmem:[#allocation13_spill] sm:$0xff] %v2736_v12  ;;  %v2760_v18 = vmul.f32 %v2750_v46, %v3467_v28 }
 0x2d4   : > { %3464 = vst [vmem:[#allocation12_spill] sm:$0xff] %v2739_v26  ;;  %v3468_v26 = vld [vmem:[#allocation43_spill] sm:$0xff] }
 0x2d5   : > { %v882_v30 = vsub.f32 %v3468_v26, %v784_v33 }
 0x2d7   : > { %v1065_v59 = vmul.f32 1.442695, %v882_v30 }
 0x2d8   : > { %v2752_v58 = vpop.eup %1879 }
 0x2d9   : > { %v1152_v34 = vpop.xlane.xlu1 %1151  ;;  %v779_v3 = vpop.xlane.xlu2 %778  ;;  %v2756_v15 = vmul.f32 %v2752_v58, %v2481_v53  ;;  %v883_v53 = vsub.f32 %v3469_v49, %v784_v33 }
 0x2da   : > { %1881 = vrcp.f32 %v1152_v34 }
 0x2e1   : > { %v794_v24 = vpop.xlane.xlu1 %793  ;;  %v1147_v42 = vpop.xlane.xlu2 %1146 }
 0x2e2   : > { %v888_v51 = vsub.f32 %v2520_v60, %v794_v24  ;;  %v889_v62 = vsub.f32 %v2522_v13, %v794_v24  ;;  %v890_v22 = vsub.f32 %v2526_v2, %v794_v24  ;;  %1883 = vrcp.f32 %v1147_v42  ;;  %v2770_v13 = vpop.eup %1881 }
 0x2e3   : > { %v1067_v60 = vmul.f32 1.442695, %v883_v53  ;;  %v1069_v2 = vmul.f32 1.442695, %v884_v36  ;;  %v2783_v42 = vmul.f32 %v2770_v13, %v2507_v0 }
 0x2e4   : > { %v1077_v12 = vmul.f32 1.442695, %v888_v51  ;;  %v1079_v40 = vmul.f32 1.442695, %v889_v62  ;;  %v1081_v28 = vmul.f32 1.442695, %v890_v22  ;;  %v879_v22 = vsub.f32 %v2417_v16, %v779_v3 }
 0x2e5   : > { %v880_v16 = vsub.f32 %v2423_v63, %v779_v3  ;;  %v881_v51 = vsub.f32 %v2431_v48, %v779_v3 }
 0x2e6   : > { %1885 = vpow2.f32 %v1077_v12 }
 0x2e7   : > { %1887 = vpow2.f32 %v1079_v40  ;;  %v1063_v48 = vmul.f32 1.442695, %v881_v51 }
 0x2e8   : > { %1889 = vpow2.f32 %v1081_v28  ;;  %v2772_v26 = vpop.eup %1883 }
 0x2e9   : > { %v1162_v24 = vpop.xlane.xlu1 %1161  ;;  %1891 = vpow2.f32 %v1065_v59  ;;  %v789_v62 = vpop.xlane.xlu2 %788  ;;  %v2779_v35 = vmul.f32 %v2772_v26, %v2538_v54 }
 0x2ea   : > { %1893 = vpow2.f32 %v1067_v60  ;;  %v885_v36 = vsub.f32 %v2491_v9, %v789_v62  ;;  %v886_v33 = vsub.f32 %v2495_v4, %v789_v62  ;;  %v887_v40 = vsub.f32 %v2501_v57, %v789_v62 }
 0x2eb   : > { %1895 = vpow2.f32 %v1069_v2  ;;  %v1059_v9 = vmul.f32 1.442695, %v879_v22  ;;  %v1061_v2 = vmul.f32 1.442695, %v880_v16 }
 0x2ec   : > { %v2774_v49 = vpop.eup %1885  ;;  %v1071_v34 = vmul.f32 1.442695, %v885_v36  ;;  %v1073_v59 = vmul.f32 1.442695, %v886_v33  ;;  %v1075_v53 = vmul.f32 1.442695, %v887_v40  ;;  %1897 = vrcp.f32 %v1162_v24 }
 0x2ed   : > { %3471 = vst [vmem:[#allocation5_spill] sm:$0xff] %v2774_v49  ;;  %v2785_v30 = vpop.eup %1887 }
 0x2ee   : > { %v2790_v12 = vpop.eup %1889  ;;  %v1238_v54 = vadd.f32 %v2785_v30, %v2774_v49  ;;  %1899 = vpow2.f32 %v1071_v34 }
 0x2ef   : > { %v1239_v4 = vsel %vm635_vm2, %v2790_v12, 0.0  ;;  %v2800_v57 = vpop.eup %1891  ;;  %1901 = vpow2.f32 %v1073_v59 }
 0x2f0   : > { %3472 = vst [vmem:[#allocation42_spill] sm:$0xff] %v2800_v57  ;;  %v1240_v63 = vadd.f32 %v1239_v4, %v1238_v54  ;;  %v2802_v60 = vpop.eup %1893  ;;  %1903 = vpow2.f32 %v1075_v53 }
 0x2f1   : > { %v1112_v28 = vpop.xlane.xlu1 %1111  ;;  %v2804_v62 = vpop.eup %1895  ;;  %1905 = vpow2.f32 %v1059_v9  ;;  %v1228_v24 = vadd.f32 %v2802_v60, %v2800_v57 }
 0x2f2   : > { %1241 = vadd.xlane.f32.xlu1 %v1240_v63  ;;  %v1157_v3 = vpop.xlane.xlu2 %1156  ;;  %v2808_v22 = vpop.eup %1897  ;;  %v1229_v36 = vsel %vm635_vm2, %v2804_v62, 0.0 }
 0x2f3   : > { %1907 = vrcp.f32 %v1157_v3  ;;  %v1230_v54 = vadd.f32 %v1229_v36, %v1228_v24  ;;  %v1320_v3 = vmul.f32 %v2808_v22, %v2547_v7  ;;  %v2843_v7 = vmul.f32 %v2808_v22, %v2553_v11 }
 0x2f4   : > { %1909 = vpow2.f32 %v1061_v2  ;;  %v2812_v33 = vpop.eup %1899  ;;  %v1311_v11 = vmul.f32 %v2772_v26, %v2528_v14 }
 0x2f5   : > { %3473 = vst [vmem:[#allocation38_spill] sm:$0xff] %v2812_v33  ;;  %1911 = vpow2.f32 %v1063_v48  ;;  %v2814_v40 = vpop.eup %1901 }
 0x2f6   : > { %v2816_v16 = vpop.eup %1903  ;;  %v1233_v34 = vadd.f32 %v2814_v40, %v2812_v33  ;;  %1913 = vrcp.f32 %v1112_v28 }
 0x2f7   : > { %v2820_v59 = vpop.eup %1905  ;;  %v1234_v63 = vsel %vm635_vm2, %v2816_v16, 0.0 }
 0x2f8   : > { %3474 = vst [vmem:[#allocation41_spill] sm:$0xff] %v2820_v59  ;;  %v1235_v48 = vadd.f32 %v1234_v63, %v1233_v34  ;;  %v1314_v63 = vmul.f32 %v2770_v13, %v2499_v1 }
 0x2f9   : > { %v774_v51 = vpop.xlane.xlu1 %773  ;;  %v2827_v2 = vpop.eup %1907 }
 0x2fa   : > { %v876_v53 = vsub.f32 %v2385_v25, %v774_v51  ;;  %v877_v9 = vsub.f32 %v2390_v32, %v774_v51  ;;  %v878_v4 = vsub.f32 %v2395_v10, %v774_v51  ;;  %1231 = vadd.xlane.f32.xlu1 %v1230_v54  ;;  %v2831_v24 = vpop.eup %1909  ;;  %v1107_v57 = vpop.xlane.xlu2 %1106  ;;  %v1317_v32 = vmul.f32 %v2827_v2, %v2574_v44 }
 0x2fb   : > { %v2835_v10 = vpop.eup %1911  ;;  %1236 = vadd.xlane.f32.xlu2 %v1235_v48  ;;  %1915 = vrcp.f32 %v1107_v57  ;;  %v2839_v28 = vmul.f32 %v2827_v2, %v2584_v55  ;;  %v1223_v51 = vadd.f32 %v2831_v24, %v2820_v59  ;;  %v1389_v1 = vpack.c.bf16 %v1314_v63, %v1311_v11  ;;  %v3494_v59 = vld [vmem:[#allocation25_spill] sm:$0xff] }
 0x2fc   : > { %v1053_v36 = vmul.f32 1.442695, %v876_v53  ;;  %v1055_v0 = vmul.f32 1.442695, %v877_v9  ;;  %v1057_v25 = vmul.f32 1.442695, %v878_v4  ;;  %v1392_v54 = vpack.c.bf16 %v1320_v3, %v1317_v32  ;;  %v2851_v55 = vpop.eup %1913 }
 0x2fd   : > { %v1224_v57 = vsel %vm635_vm2, %v2835_v10, 0.0  ;;  %v2867_v3 = vmul.f32 %v2851_v55, %v2570_v19 }
 0x2fe   : > { %1917 = vpow2.f32 %v1053_v36  ;;  %1470 = vmatpush.bf16.xpose.msra.mxu3 %v1392_v54 }
 0x2ff   : > { %1919 = vpow2.f32 %v1055_v0  ;;  %v1225_v0 = vadd.f32 %v1224_v57, %v1223_v51  ;;  %v3477_v51 = vld [vmem:[#allocation39_spill] sm:$0xff] }
 0x300   : > { %1921 = vpow2.f32 %v1057_v25 }
 0x301   : > { %v1102_v34 = vpop.xlane.xlu1 %1101  ;;  %v2855_v53 = vpop.eup %1915 }
 0x302   : > { %v769_v4 = vpop.xlane.xlu2 %768  ;;  %v2863_v48 = vmul.f32 %v2855_v53, %v2596_v47  ;;  %1923 = vrcp.f32 %v1102_v34 }
 0x303   : > { %1226 = vadd.xlane.f32.xlu2 %v1225_v0  ;;  %v873_v14 = vsub.f32 %v3415_v39, %v769_v4  ;;  %v874_v25 = vsub.f32 %v3414_v23, %v769_v4  ;;  %v875_v32 = vsub.f32 %v3413_v17, %v769_v4  ;;  %v3476_v0 = vld [vmem:[#allocation46_spill] sm:$0xff] }
 0x304   : > { %v2857_v9 = vpop.eup %1917  ;;  %v1305_v11 = vmul.f32 %v2752_v58, %v3476_v0 }
 0x305   : > { %3475 = vst [vmem:[#allocation43_spill] sm:$0xff] %v2857_v9  ;;  %v2869_v36 = vpop.eup %1919  ;;  %v1047_v19 = vmul.f32 1.442695, %v873_v14  ;;  %v1049_v57 = vmul.f32 1.442695, %v874_v25 }
 0x306   : > { %v2874_v54 = vpop.eup %1921  ;;  %v1218_v47 = vadd.f32 %v2869_v36, %v2857_v9  ;;  %v1051_v44 = vmul.f32 1.442695, %v875_v32  ;;  %1471 = vmatpush.bf16.xpose.msra.mxu3 %v1389_v1  ;;  %v3482_v9 = vld [vmem:[#allocation28_spill] sm:$0xff] }
 0x307   : > { %v1219_v39 = vsel %vm635_vm2, %v2874_v54, 0.0  ;;  %1925 = vpow2.f32 %v1047_v19 }
 0x308   : > { %v1220_v23 = vadd.f32 %v1219_v39, %v1218_v47  ;;  %1927 = vpow2.f32 %v1049_v57  ;;  %v1308_v47 = vmul.f32 %v2750_v46, %v3477_v51  ;;  %v2889_v19 = vpop.eup %1923 }
 0x309   : > { %v764_v17 = vpop.xlane.xlu1 %763  ;;  %1929 = vpow2.f32 %v1051_v44 }
 0x30a   : > { %v870_v4 = vsub.f32 %v3421_v43, %v764_v17  ;;  %v871_v63 = vsub.f32 %v3420_v31, %v764_v17  ;;  %v872_v14 = vsub.f32 %v3418_v37, %v764_v17  ;;  %1221 = vadd.xlane.f32.xlu1 %v1220_v23  ;;  %v1097_v1 = vpop.xlane.xlu2 %1096  ;;  %v1386_v57 = vpack.c.bf16 %v1308_v47, %v1305_v11 }
 0x30b   : > { %1931 = vrcp.f32 %v1097_v1 }
 0x30c   : > { %v1041_v34 = vmul.f32 1.442695, %v870_v4  ;;  %v1043_v25 = vmul.f32 1.442695, %v871_v63  ;;  %v1045_v32 = vmul.f32 1.442695, %v872_v14  ;;  %v2911_v63 = vmul.f32 %v2889_v19, %v2613_v45 }
 0x30d   : > { %v2891_v39 = vpop.eup %1925 }
 0x30e   : > { %1933 = vpow2.f32 %v1041_v34  ;;  %3478 = vst [vmem:[#allocation44_spill] sm:$0xff] %v2891_v39  ;;  %v2893_v31 = vpop.eup %1927  ;;  %1472 = vmatpush.bf16.xpose.msra.mxu3 %v1386_v57 }
 0x30f   : > { %1935 = vpow2.f32 %v1043_v25  ;;  %v2895_v37 = vpop.eup %1929  ;;  %v1213_v44 = vadd.f32 %v2893_v31, %v2891_v39 }
 0x310   : > { %1937 = vpow2.f32 %v1045_v32  ;;  %v1214_v51 = vsel %vm635_vm2, %v2895_v37, 0.0 }
 0x311   : > { %v1092_v43 = vpop.xlane.xlu1 %1091  ;;  %v2901_v23 = vpop.eup %1931  ;;  %v1215_v17 = vadd.f32 %v1214_v51, %v1213_v44  ;;  %v3480_v51 = vpack.c.bf16 %v2730_v50, %v2727_v20 }
 0x312   : > { %v759_v11 = vpop.xlane.xlu2 %758  ;;  %v2907_v4 = vmul.f32 %v2901_v23, %v2633_v5 }
 0x313   : > { %1216 = vadd.xlane.f32.xlu2 %v1215_v17  ;;  %v867_v34 = vsub.f32 %v3429_v61, %v759_v11  ;;  %v868_v25 = vsub.f32 %v3428_v41, %v759_v11  ;;  %v869_v32 = vsub.f32 %v3427_v38, %v759_v11  ;;  %v3481_v11 = vld [vmem:[#allocation27_spill] sm:$0xff] }
 0x314   : > { %v2903_v0 = vpop.eup %1933 }
 0x315   : > { %3479 = vst [vmem:[#allocation45_spill] sm:$0xff] %v2903_v0  ;;  %v2913_v14 = vpop.eup %1935  ;;  %v1035_v57 = vmul.f32 1.442695, %v867_v34  ;;  %v1037_v45 = vmul.f32 1.442695, %v868_v25 }
 0x316   : > { %v2918_v1 = vpop.eup %1937  ;;  %v1208_v47 = vadd.f32 %v2913_v14, %v2903_v0  ;;  %v1039_v44 = vmul.f32 1.442695, %v869_v32  ;;  %1473 = vmatpush.bf16.xpose.msra.mxu3 %v3480_v51 }
 0x317   : > { %v1209_v61 = vsel %vm635_vm2, %v2918_v1, 0.0  ;;  %1939 = vpow2.f32 %v1035_v57 }
 0x318   : > { %v1210_v41 = vadd.f32 %v1209_v61, %v1208_v47  ;;  %1941 = vpow2.f32 %v1037_v45  ;;  %v3487_v61 = vld [vmem:[#allocation21_spill] sm:$0xff] }
 0x319   : > { %v754_v38 = vpop.xlane.xlu1 %753  ;;  %1943 = vpow2.f32 %v1039_v44  ;;  %v3486_v44 = vld [vmem:[#allocation20_spill] sm:$0xff] }
 0x31a   : > { %v864_v17 = vsub.f32 %v3435_v21, %v754_v38  ;;  %v865_v0 = vsub.f32 %v3481_v11, %v754_v38  ;;  %v866_v5 = vsub.f32 %v3482_v9, %v754_v38  ;;  %1211 = vadd.xlane.f32.xlu1 %v1210_v41  ;;  %1945 = vrcp.f32 %v1092_v43  ;;  %v1087_v50 = vpop.xlane.xlu2 %1086  ;;  %v3488_v38 = vld [vmem:[#allocation22_spill] sm:$0xff] }
 0x31b   : > { %1947 = vrcp.f32 %v1087_v50  ;;  %v3484_v21 = vpack.c.bf16 %v2703_v56, %v2709_v8 }
 0x31c   : > { %v1029_v34 = vmul.f32 1.442695, %v864_v17  ;;  %v1031_v25 = vmul.f32 1.442695, %v865_v0  ;;  %v1033_v20 = vmul.f32 1.442695, %v866_v5 }
 0x31d   : > { %v2932_v32 = vpop.eup %1939  ;;  %v3485_v0 = vld [vmem:[#allocation54_spill] sm:$0xff] }
 0x31e   : > { %1949 = vpow2.f32 %v1029_v34  ;;  %3483 = vst [vmem:[#allocation46_spill] sm:$0xff] %v2932_v32  ;;  %v2934_v47 = vpop.eup %1941  ;;  %1474 = vmatpush.bf16.xpose.msra.mxu3 %v3484_v21  ;;  %v1287_v5 = vmul.f32 %v2855_v53, %v3485_v0  ;;  %v3489_v34 = vld [vmem:[#allocation51_spill] sm:$0xff] }
 0x31f   : > { %1951 = vpow2.f32 %v1031_v25  ;;  %v2939_v9 = vpop.eup %1943  ;;  %v1203_v43 = vadd.f32 %v2934_v47, %v2932_v32  ;;  %v1290_v25 = vmul.f32 %v2851_v55, %v3489_v34 }
 0x320   : > { %1953 = vpow2.f32 %v1033_v20  ;;  %v2945_v45 = vpop.eup %1945  ;;  %v1204_v56 = vsel %vm635_vm2, %v2939_v9, 0.0 }
 0x321   : > { %v744_v57 = vpop.xlane.xlu1 %743  ;;  %v2952_v8 = vpop.eup %1947  ;;  %v1205_v11 = vadd.f32 %v1204_v56, %v1203_v43  ;;  %v1377_v33 = vpack.c.bf16 %v1290_v25, %v1287_v5 }
 0x322   : > { %v858_v51 = vsub.f32 %v3486_v44, %v744_v57  ;;  %v859_v41 = vsub.f32 %v3487_v61, %v744_v57  ;;  %v860_v17 = vsub.f32 %v3488_v38, %v744_v57  ;;  %v749_v32 = vpop.xlane.xlu2 %748  ;;  %v3492_v61 = vld [vmem:[#allocation23_spill] sm:$0xff]  ;;  %v3493_v38 = vld [vmem:[#allocation24_spill] sm:$0xff] }
 0x323   : > { %1206 = vadd.xlane.f32.xlu2 %v1205_v11  ;;  %v861_v57 = vsub.f32 %v3492_v61, %v749_v32  ;;  %v862_v39 = vsub.f32 %v3493_v38, %v749_v32  ;;  %v863_v49 = vsub.f32 %v3494_v59, %v749_v32 }
 0x324   : > { %v2956_v20 = vpop.eup %1949  ;;  %v1017_v50 = vmul.f32 1.442695, %v858_v51  ;;  %v1019_v21 = vmul.f32 1.442695, %v859_v41  ;;  %v1021_v0 = vmul.f32 1.442695, %v860_v17 }
 0x325   : > { %3490 = vst [vmem:[#allocation39_spill] sm:$0xff] %v2956_v20  ;;  %v2958_v44 = vpop.eup %1951  ;;  %v3496_v51 = vld [vmem:[#allocation3_spill] sm:$0xff]  ;;  %v3498_v17 = vld [vmem:[#allocation2_spill] sm:$0xff]  ;;  %v1023_v34 = vmul.f32 1.442695, %v861_v57 }
 0x326   : > { %3491 = vst [vmem:[#allocation27_spill] sm:$0xff] %v2958_v44  ;;  %v2963_v43 = vpop.eup %1953  ;;  %1955 = vpow2.f32 %v1017_v50  ;;  %v1198_v56 = vadd.f32 %v2958_v44, %v2956_v20  ;;  %v2969_v41 = vmul.f32 %v2952_v8, %v3496_v51  ;;  %v2973_v11 = vmul.f32 %v2945_v45, %v3498_v17  ;;  %1475 = vmatpush.bf16.xpose.msra.mxu3 %v1377_v33  ;;  %v3500_v50 = vld [vmem:[#allocation37_spill] sm:$0xff]  ;;  %v3501_v17 = vld [vmem:[#allocation14_spill] sm:$0xff]  ;;  %v3502_v57 = vld [vmem:[#allocation15_spill] sm:$0xff] }
 0x327   : > { %3495 = vst [vmem:[#allocation28_spill] sm:$0xff] %v2963_v43  ;;  %1957 = vpow2.f32 %v1019_v21  ;;  %v1025_v61 = vmul.f32 1.442695, %v862_v39  ;;  %v1027_v38 = vmul.f32 1.442695, %v863_v49  ;;  %v1199_v59 = vsel %vm635_vm2, %v2963_v43, 0.0 }
 0x328   : > { %3497 = vst [vmem:[#allocation54_spill] sm:$0xff] %v2969_v41  ;;  %1959 = vpow2.f32 %v1021_v0  ;;  %v1200_v5 = vadd.f32 %v1199_v59, %v1198_v56  ;;  %v1281_v51 = vmul.f32 %v2901_v23, %v3500_v50  ;;  %v3503_v49 = vld [vmem:[#allocation16_spill] sm:$0xff] }
 0x329   : > { %3499 = vst [vmem:[#allocation20_spill] sm:$0xff] %v2973_v11  ;;  %1961 = vpow2.f32 %v1023_v34  ;;  %v734_v25 = vpop.xlane.xlu1 %733  ;;  %v3505_v56 = vld [vmem:[#allocation56_spill] sm:$0xff] }
 0x32a   : > { %1963 = vpow2.f32 %v1025_v61  ;;  %v852_v21 = vsub.f32 %v3501_v17, %v734_v25  ;;  %v853_v39 = vsub.f32 %v3502_v57, %v734_v25  ;;  %v854_v0 = vsub.f32 %v3503_v49, %v734_v25  ;;  %1201 = vadd.xlane.f32.xlu1 %v1200_v5  ;;  %v739_v34 = vpop.xlane.xlu2 %738  ;;  %v3507_v61 = vld [vmem:[#allocation17_spill] sm:$0xff]  ;;  %v3508_v17 = vld [vmem:[#allocation18_spill] sm:$0xff]  ;;  %v3509_v57 = vld [vmem:[#allocation19_spill] sm:$0xff] }
 0x32b   : > { %1965 = vpow2.f32 %v1027_v38  ;;  %v1284_v59 = vmul.f32 %v2889_v19, %v3505_v56  ;;  %v855_v50 = vsub.f32 %v3507_v61, %v739_v34  ;;  %v856_v41 = vsub.f32 %v3508_v17, %v739_v34 }
 0x32c   : > { %v2984_v33 = vpop.eup %1955  ;;  %v1005_v20 = vmul.f32 1.442695, %v852_v21  ;;  %v1007_v43 = vmul.f32 1.442695, %v853_v39  ;;  %v1009_v32 = vmul.f32 1.442695, %v854_v0  ;;  %v857_v11 = vsub.f32 %v3509_v57, %v739_v34 }
 0x32d   : > { %3504 = vst [vmem:[#allocation21_spill] sm:$0xff] %v2984_v33  ;;  %v2988_v44 = vpop.eup %1957  ;;  %v1374_v38 = vpack.c.bf16 %v1284_v59, %v1281_v51  ;;  %v1011_v39 = vmul.f32 1.442695, %v855_v50  ;;  %v1013_v49 = vmul.f32 1.442695, %v856_v41  ;;  %v3513_v59 = vld [vmem:[#allocation33_spill] sm:$0xff] }
 0x32e   : > { %3506 = vst [vmem:[#allocation22_spill] sm:$0xff] %v2988_v44  ;;  %v2993_v25 = vpop.eup %1959  ;;  %1967 = vpow2.f32 %v1005_v20  ;;  %v1188_v5 = vadd.f32 %v2988_v44, %v2984_v33  ;;  %v1015_v0 = vmul.f32 1.442695, %v857_v11  ;;  %v3514_v41 = vld [vmem:[#allocation53_spill] sm:$0xff]  ;;  %v3518_v33 = vld [vmem:[#allocation8_spill] sm:$0xff] }
 0x32f   : > { %3510 = vst [vmem:[#allocation51_spill] sm:$0xff] %v2993_v25  ;;  %v2997_v21 = vpop.eup %1961  ;;  %1969 = vpow2.f32 %v1007_v43  ;;  %1476 = vmatpush.bf16.xpose.msra.mxu3 %v1374_v38  ;;  %v1189_v34 = vsel %vm635_vm2, %v2993_v25, 0.0  ;;  %v1275_v43 = vmul.f32 %v2952_v8, %v3513_v59  ;;  %v1318_v11 = vmul.f32 %v2827_v2, %v3514_v41 }
 0x330   : > { %3511 = vst [vmem:[#allocation23_spill] sm:$0xff] %v2997_v21  ;;  %v2999_v56 = vpop.eup %1963  ;;  %1971 = vpow2.f32 %v1009_v32  ;;  %v1190_v20 = vadd.f32 %v1189_v34, %v1188_v5  ;;  %v3516_v5 = vld [vmem:[#allocation35_spill] sm:$0xff] }
 0x331   : > { %v3003_v61 = vpop.eup %1965  ;;  %1973 = vpow2.f32 %v1011_v39  ;;  %v1193_v51 = vadd.f32 %v2999_v56, %v2997_v21  ;;  %v724_v32 = vpop.xlane.xlu1 %723  ;;  %v1278_v39 = vmul.f32 %v2945_v45, %v3516_v5 }
 0x332   : > { %3512 = vst [vmem:[#allocation24_spill] sm:$0xff] %v3003_v61  ;;  %1975 = vpow2.f32 %v1013_v49  ;;  %1191 = vadd.xlane.f32.xlu1 %v1190_v20  ;;  %v1194_v50 = vsel %vm635_vm2, %v3003_v61, 0.0  ;;  %v729_v38 = vpop.xlane.xlu2 %728  ;;  %v3517_v49 = vld [vmem:[#allocation50_spill] sm:$0xff]  ;;  %v846_v21 = vsub.f32 %v3518_v33, %v724_v32 }
 0x333   : > { %1977 = vpow2.f32 %v1015_v0  ;;  %v1195_v57 = vadd.f32 %v1194_v50, %v1193_v51  ;;  %v1321_v34 = vmul.f32 %v2808_v22, %v3517_v49  ;;  %v849_v2 = vsub.f32 %v3453_v6, %v729_v38  ;;  %v3520_v22 = vld [vmem:[#allocation9_spill] sm:$0xff] }
 0x334   : > { %v3013_v17 = vpop.eup %1967  ;;  %v850_v0 = vsub.f32 %v3452_v27, %v729_v38  ;;  %v851_v20 = vsub.f32 %v3451_v29, %v729_v38  ;;  %v1371_v51 = vpack.c.bf16 %v1278_v39, %v1275_v43  ;;  %v847_v49 = vsub.f32 %v3520_v22, %v724_v32  ;;  %v3521_v29 = vld [vmem:[#allocation10_spill] sm:$0xff] }
 0x335   : > { %3515 = vst [vmem:[#allocation25_spill] sm:$0xff] %v3013_v17  ;;  %v3019_v59 = vpop.eup %1969  ;;  %1196 = vadd.xlane.f32.xlu2 %v1195_v57  ;;  %v1393_v50 = vpack.c.bf16 %v1321_v34, %v1318_v11  ;;  %v999_v44 = vmul.f32 1.442695, %v849_v2  ;;  %v848_v38 = vsub.f32 %v3521_v29, %v724_v32  ;;  %v993_v39 = vmul.f32 1.442695, %v846_v21  ;;  %v3522_v2 = vld [vmem:[#allocation49_spill] sm:$0xff] }
 0x336   : > { %v3024_v41 = vpop.eup %1971  ;;  %v1178_v5 = vadd.f32 %v3019_v59, %v3013_v17  ;;  %v1001_v6 = vmul.f32 1.442695, %v850_v0  ;;  %v1003_v61 = vmul.f32 1.442695, %v851_v20  ;;  %v1312_v32 = vmul.f32 %v2772_v26, %v3522_v2  ;;  %v3524_v29 = vld [vmem:[#allocation6_spill] sm:$0xff] }
 0x337   : > { %v3029_v25 = vpop.eup %1973  ;;  %1477 = vmatpush.bf16.xpose.msra.mxu3 %v1371_v51  ;;  %v1179_v33 = vsel %vm635_vm2, %v3024_v41, 0.0  ;;  %1979 = vpow2.f32 %v999_v44  ;;  %v995_v0 = vmul.f32 1.442695, %v847_v49  ;;  %v997_v51 = vmul.f32 1.442695, %v848_v38  ;;  %v3523_v44 = vld [vmem:[#allocation48_spill] sm:$0xff] }
 0x338   : > { %3519 = vst [vmem:[#allocation3_spill] sm:$0xff] %v3029_v25  ;;  %v3032_v27 = vpop.eup %1975  ;;  %v1180_v11 = vadd.f32 %v1179_v33, %v1178_v5  ;;  %1981 = vpow2.f32 %v1001_v6  ;;  %v3525_v6 = vld [vmem:[#allocation7_spill] sm:$0xff] }
 0x339   : > { %v3037_v43 = vpop.eup %1977  ;;  %v1183_v57 = vadd.f32 %v3032_v27, %v3029_v25  ;;  %1983 = vpow2.f32 %v1003_v61 }
 0x33a   : > { %v1184_v34 = vsel %vm635_vm2, %v3037_v43, 0.0  ;;  %1181 = vadd.xlane.f32.xlu0 %v1180_v11  ;;  %v719_v22 = vpop.xlane.xlu2 %718  ;;  %1985 = vpow2.f32 %v993_v39  ;;  %v3526_v39 = vld [vmem:[#allocation47_spill] sm:$0xff] }
 0x33b   : > { %v1185_v20 = vadd.f32 %v1184_v34, %v1183_v57  ;;  %v843_v5 = vsub.f32 %v3456_v52, %v719_v22  ;;  %v844_v21 = vsub.f32 %v3524_v29, %v719_v22  ;;  %v845_v33 = vsub.f32 %v3525_v6, %v719_v22  ;;  %v278_v22 = vld [vmem:[%s3069_s30] sm:$0xff] }
 0x33c   : > { %1987 = vpow2.f32 %v995_v0  ;;  %v1306_v34 = vmul.f32 %v2752_v58, %v3526_v39 }
 0x33d   : > { %1186 = vadd.xlane.f32.xlu2 %v1185_v20  ;;  %v3050_v25 = vpop.eup %1979  ;;  %v987_v26 = vmul.f32 1.442695, %v843_v5  ;;  %v989_v61 = vmul.f32 1.442695, %v844_v21  ;;  %v991_v49 = vmul.f32 1.442695, %v845_v33  ;;  %1989 = vpow2.f32 %v997_v51 }
 0x33e   : > { %v3052_v38 = vpop.eup %1981  ;;  %v3084_v5 = vpack.c.bf16 %v278_v22, %v278_v22 }
 0x33f   : > { %1483 = vmatpush.bf16.xpose.msrb.mxu3 %v1393_v50  ;;  %v1315_v50 = vmul.f32 %v2770_v13, %v3523_v44  ;;  %v3054_v13 = vpop.eup %1983  ;;  %1991 = vpow2.f32 %v987_v26  ;;  %v1173_v52 = vadd.f32 %v3052_v38, %v3050_v25 }
 0x340   : > { %1993 = vpow2.f32 %v989_v61  ;;  %v1174_v11 = vsel %vm635_vm2, %v3054_v13, 0.0  ;;  %v3062_v2 = vpop.eup %1985  ;;  %1478 = vmatmul.bf16.vlgmr.msra.gmra.mxu3 %v3084_v5  ;;  %v3528_v61 = vld [vmem:[#allocation26_spill] sm:$0xff] }
 0x341   : > { %v1390_v17 = vpack.c.bf16 %v1315_v50, %v1312_v32  ;;  %1995 = vpow2.f32 %v991_v49  ;;  %v1175_v57 = vadd.f32 %v1174_v11, %v1173_v52  ;;  %v3527_v32 = vld [vmem:[#allocation40_spill] sm:$0xff]  ;;  %v3529_v49 = vld [vmem:[#allocation13_spill] sm:$0xff] }
 0x342   : > { %v1309_v0 = vmul.f32 %v2750_v46, %v3527_v32  ;;  %v3530_v52 = vpack.c.bf16 %v3528_v61, %v3529_v49  ;;  %v3531_v11 = vld [vmem:[#allocation4_spill] sm:$0xff] }
 0x343   : > { %v3538_v61 = vld [vmem:[#allocation32_spill] sm:$0xff] }
 0x344   : > { %v1387_v58 = vpack.c.bf16 %v1309_v0, %v1306_v34  ;;  %v3534_v34 = vld [vmem:[#allocation55_spill] sm:$0xff]  ;;  %v3535_v0 = vld [vmem:[#allocation52_spill] sm:$0xff]  ;;  %v1276_v49 = vmul.f32 %v2952_v8, %v3538_v61 }
 0x345   : > { %1176 = vadd.xlane.f32.xlu2 %v1175_v57  ;;  %v3532_v57 = vld [vmem:[#allocation31_spill] sm:$0xff]  ;;  %v1288_v32 = vmul.f32 %v2855_v53, %v3534_v34 }
 0x346   : > { %v3533_v39 = vpack.c.bf16 %v3531_v11, %v3532_v57 }
 0x347   : > { %1484 = vmatpush.bf16.xpose.msrb.mxu3 %v1390_v17  ;;  %v3071_v17 = vpop.eup %1987 }
 0x348   : > { %v3075_v20 = vpop.eup %1989  ;;  %v1168_v50 = vadd.f32 %v3071_v17, %v3062_v2 }
 0x349   : > { %v3077_v51 = vpop.eup %1991  ;;  %v1169_v46 = vsel %vm635_vm2, %v3075_v20, 0.0 }
 0x34a   : > { %v3080_v44 = vpop.eup %1993  ;;  %v1170_v26 = vadd.f32 %v1169_v46, %v1168_v50  ;;  %v3536_v50 = vld [vmem:[#allocation36_spill] sm:$0xff] }
 0x34b   : > { %v3086_v29 = vpop.eup %1995  ;;  %v1163_v21 = vadd.f32 %v3080_v44, %v3077_v51  ;;  %v1282_v46 = vmul.f32 %v2901_v23, %v3536_v50  ;;  %v3540_v23 = vpack.c.bf16 %v2843_v7, %v2839_v28 }
 0x34c   : > { %v1164_v6 = vsel %vm635_vm2, %v3086_v29, 0.0 }
 0x34d   : > { %v1165_v33 = vadd.f32 %v1164_v6, %v1163_v21  ;;  %1171 = vadd.xlane.f32.xlu2 %v1170_v26  ;;  %v3537_v21 = vld [vmem:[#allocation57_spill] sm:$0xff]  ;;  %v1444_v57 = vsel %vm635_vm2, %v3540_v23, 0 }
 0x34e   : > { %v1285_v6 = vmul.f32 %v2889_v19, %v3537_v21  ;;  %v279_v19 = vld [vmem:[%s3069_s30 + $0x8] sm:$0xff] }
 0x34f   : > { %1485 = vmatpush.bf16.xpose.msrb.mxu3 %v1387_v58  ;;  %1166 = vadd.xlane.f32.xlu1 %v1165_v33  ;;  %v1291_v58 = vmul.f32 %v2851_v55, %v3535_v0  ;;  %v3118_v34 = vpack.c.bf16 %v279_v19, %v279_v19 }
 0x350   : > { %v1375_v33 = vpack.c.bf16 %v1285_v6, %v1282_v46 }
 0x351   : > { %v1378_v22 = vpack.c.bf16 %v1291_v58, %v1288_v32 }
 0x357   : > { %1486 = vmatpush.bf16.xpose.msrb.mxu3 %v3530_v52  ;;  %v3539_v52 = vld [vmem:[#allocation34_spill] sm:$0xff] }
 0x358   : > { %v1279_v53 = vmul.f32 %v2945_v45, %v3539_v52 }
 0x35a   : > { %v1372_v55 = vpack.c.bf16 %v1279_v53, %v1276_v49  ;;  %v3544_v53 = vld [vmem:[#allocation12_spill] sm:$0xff] }
 0x35f   : > { %1487 = vmatpush.bf16.xpose.msrb.mxu3 %v3533_v39 }
 0x365   : > { %v1242_v26 = vpop.xlane.xlu1 %1241 }
 0x366   : > { %1997 = vrcp.f32 %v1242_v26 }
 0x367   : > { %1488 = vmatpush.bf16.xpose.msrb.mxu3 %v1378_v22  ;;  %v3541_v22 = vpack.c.bf16 %v2783_v42, %v2779_v35  ;;  %v3542_v42 = vpack.c.bf16 %v2760_v18, %v2756_v15 }
 0x369   : > { %v1441_v50 = vsel %vm635_vm2, %v3541_v22, 0  ;;  %v1438_v26 = vsel %vm635_vm2, %v3542_v42, 0 }
 0x36c   : > { %v3120_v32 = vpop.eup %1997 }
 0x36d   : > { %v1232_v39 = vpop.xlane.xlu1 %1231  ;;  %v1369_v28 = vmul.f32 %v3120_v32, %v2785_v30  ;;  %v1370_v58 = vmul.f32 %v3120_v32, %v2790_v12 }
 0x36e   : > { %v1237_v11 = vpop.xlane.xlu2 %1236 }
 0x36f   : > { %1489 = vmatpush.bf16.xpose.msrb.mxu3 %v1375_v33  ;;  %1999 = vrcp.f32 %v1237_v11 }
 0x370   : > { %2001 = vrcp.f32 %v1232_v39  ;;  %v3546_v39 = vld [vmem:[#allocation29_spill] sm:$0xff] }
 0x375   : > { %v3122_v8 = vpop.eup %1999 }
 0x376   : > { %v1227_v45 = vpop.xlane.xlu2 %1226  ;;  %v1366_v0 = vmul.f32 %v3122_v8, %v2814_v40  ;;  %v1367_v7 = vmul.f32 %v3122_v8, %v2816_v16  ;;  %v3138_v6 = vpop.eup %2001 }
 0x377   : > { %1490 = vmatpush.bf16.xpose.msrb.mxu3 %v1372_v55  ;;  %2003 = vrcp.f32 %v1227_v45  ;;  %v1363_v12 = vmul.f32 %v3138_v6, %v2802_v60  ;;  %v1364_v35 = vmul.f32 %v3138_v6, %v2804_v62  ;;  %v3547_v45 = vld [vmem:[#allocation30_spill] sm:$0xff] }
 0x378   : > { %v1417_v46 = vpack.c.bf16 %v1369_v28, %v1366_v0  ;;  %v1418_v21 = vpack.c.bf16 %v1370_v58, %v1367_v7  ;;  %v3548_v0 = vpack.c.bf16 %v3546_v39, %v3547_v45  ;;  %v3558_v45 = vld [vmem:[#allocation27_spill] sm:$0xff] }
 0x37a   : > { %1522 = vmatpush.bf16.xpose.msrb.mxu0 %v1417_v46  ;;  %v1468_v40 = vsel %vm635_vm2, %v1418_v21, 0  ;;  %v1432_v28 = vsel %vm635_vm2, %v3548_v0, 0 }
 0x37b   : > { %1535 = vmatpush.bf16.xpose.msrb.mxu1 %v1468_v40 }
 0x37d   : > { %v2004_v30 = vpop.eup %2003  ;;  %v1222_v52 = vpop.xlane.xlu1 %1221 }
 0x37e   : > { %1491 = vmatmul.bf16.vlgmr.msrb.gmra.mxu3 %v3118_v34  ;;  %v1360_v16 = vmul.f32 %v2004_v30, %v2831_v24  ;;  %v1361_v33 = vmul.f32 %v2004_v30, %v2835_v10  ;;  %2005 = vrcp.f32 %v1222_v52  ;;  %v3543_v10 = vld [vmem:[#allocation11_spill] sm:$0xff] }
 0x37f   : > { %1496 = vmatpush.bf16.xpose.msra.mxu3 %v1444_v57  ;;  %v3545_v55 = vpack.c.bf16 %v3543_v10, %v3544_v53  ;;  %v3556_v10 = vld [vmem:[#allocation41_spill] sm:$0xff] }
 0x380   : > { %v1414_v61 = vpack.c.bf16 %v1363_v12, %v1360_v16  ;;  %v1415_v49 = vpack.c.bf16 %v1364_v35, %v1361_v33  ;;  %v1359_v53 = vmul.f32 %v2004_v30, %v3556_v10 }
 0x381   : > { %v1435_v62 = vsel %vm635_vm2, %v3545_v55, 0 }
 0x382   : > { %1523 = vmatpush.bf16.xpose.msrb.mxu0 %v1414_v61  ;;  %v1465_v24 = vsel %vm635_vm2, %v1415_v49, 0  ;;  %v3553_v49 = vld [vmem:[#allocation20_spill] sm:$0xff] }
 0x383   : > { %1536 = vmatpush.bf16.xpose.msrb.mxu1 %v1465_v24 }
 0x384   : > { %v3155_v15 = vpop.eup %2005 }
 0x385   : > { %v1357_v23 = vmul.f32 %v3155_v15, %v2869_v36  ;;  %v1358_v19 = vmul.f32 %v3155_v15, %v2874_v54 }
 0x386   : > { %v1217_v60 = vpop.xlane.xlu2 %1216 }
 0x387   : > { %1497 = vmatpush.bf16.xpose.msra.mxu3 %v1441_v50  ;;  %2007 = vrcp.f32 %v1217_v60  ;;  %v280_v60 = vld [vmem:[%s3069_s30 + $0x10] sm:$0xff] }
 0x388   : > { %v3195_v55 = vpack.c.bf16 %v280_v60, %v280_v60 }
 0x38d   : > { %v2008_v18 = vpop.eup %2007  ;;  %v1212_v22 = vpop.xlane.xlu1 %1211 }
 0x38e   : > { %v1354_v11 = vmul.f32 %v2008_v18, %v2893_v31  ;;  %v1355_v57 = vmul.f32 %v2008_v18, %v2895_v37  ;;  %2009 = vrcp.f32 %v1212_v22  ;;  %v3549_v37 = vpack.c.bf16 %v2867_v3, %v2863_v48 }
 0x38f   : > { %1498 = vmatpush.bf16.xpose.msra.mxu3 %v1438_v26  ;;  %v3550_v48 = vpack.c.bf16 %v2911_v63, %v2907_v4  ;;  %v3552_v26 = vld [vmem:[#allocation5_spill] sm:$0xff]  ;;  %v3554_v4 = vld [vmem:[#allocation54_spill] sm:$0xff] }
 0x390   : > { %v1411_v7 = vpack.c.bf16 %v1357_v23, %v1354_v11  ;;  %v1412_v58 = vpack.c.bf16 %v1358_v19, %v1355_v57  ;;  %v1429_v54 = vsel %vm635_vm2, %v3549_v37, 0  ;;  %v1368_v61 = vmul.f32 %v3120_v32, %v3552_v26  ;;  %v3557_v11 = vld [vmem:[#allocation42_spill] sm:$0xff] }
 0x391   : > { %v1426_v3 = vsel %vm635_vm2, %v3550_v48, 0  ;;  %v3555_v63 = vpack.c.bf16 %v3553_v49, %v3554_v4  ;;  %v1362_v32 = vmul.f32 %v3138_v6, %v3557_v11  ;;  %v3565_v26 = vld [vmem:[#allocation46_spill] sm:$0xff]  ;;  %v3566_v49 = vld [vmem:[#allocation45_spill] sm:$0xff]  ;;  %v3567_v11 = vld [vmem:[#allocation23_spill] sm:$0xff] }
 0x392   : > { %1524 = vmatpush.bf16.xpose.msrb.mxu0 %v1411_v7  ;;  %v1462_v31 = vsel %vm635_vm2, %v1412_v58, 0  ;;  %v3560_v7 = vld [vmem:[#allocation28_spill] sm:$0xff] }
 0x393   : > { %1537 = vmatpush.bf16.xpose.msrb.mxu1 %v1462_v31  ;;  %v1423_v52 = vsel %vm635_vm2, %v3555_v63, 0  ;;  %v1413_v57 = vpack.c.bf16 %v1362_v32, %v1359_v53 }
 0x394   : > { %v3172_v50 = vpop.eup %2009 }
 0x395   : > { %v1351_v40 = vmul.f32 %v3172_v50, %v2913_v14  ;;  %v1352_v12 = vmul.f32 %v3172_v50, %v2918_v1  ;;  %v3551_v14 = vld [vmem:[#allocation38_spill] sm:$0xff] }
 0x396   : > { %v1207_v36 = vpop.xlane.xlu2 %1206 }
 0x397   : > { %1499 = vmatpush.bf16.xpose.msra.mxu3 %v1435_v62  ;;  %2011 = vrcp.f32 %v1207_v36  ;;  %v3561_v36 = vld [vmem:[#allocation44_spill] sm:$0xff] }
 0x398   : > { %v1353_v37 = vmul.f32 %v2008_v18, %v3561_v36 }
 0x39d   : > { %v2012_v46 = vpop.eup %2011  ;;  %v1202_v42 = vpop.xlane.xlu1 %1201 }
 0x39e   : > { %v1348_v21 = vmul.f32 %v2012_v46, %v2934_v47  ;;  %v1349_v16 = vmul.f32 %v2012_v46, %v2939_v9  ;;  %v1365_v9 = vmul.f32 %v3122_v8, %v3551_v14  ;;  %2013 = vrcp.f32 %v1202_v42 }
 0x39f   : > { %1500 = vmatpush.bf16.xpose.msra.mxu3 %v1432_v28  ;;  %v3559_v28 = vld [vmem:[#allocation24_spill] sm:$0xff] }
 0x3a0   : > { %v1408_v33 = vpack.c.bf16 %v1351_v40, %v1348_v21  ;;  %v1409_v35 = vpack.c.bf16 %v1352_v12, %v1349_v16  ;;  %v1416_v24 = vpack.c.bf16 %v1368_v61, %v1365_v9  ;;  %v3562_v40 = vld [vmem:[#allocation43_spill] sm:$0xff]  ;;  %v1347_v61 = vmul.f32 %v2012_v46, %v3565_v26 }
 0x3a2   : > { %1525 = vmatpush.bf16.xpose.msrb.mxu0 %v1408_v33  ;;  %v1459_v47 = vsel %vm635_vm2, %v1409_v35, 0  ;;  %v3563_v33 = vld [vmem:[#allocation22_spill] sm:$0xff] }
 0x3a3   : > { %1538 = vmatpush.bf16.xpose.msrb.mxu1 %v1459_v47  ;;  %v3564_v47 = vld [vmem:[#allocation51_spill] sm:$0xff] }
 0x3a4   : > { %v2014_v62 = vpop.eup %2013 }
 0x3a5   : > { %v1192_v8 = vpop.xlane.xlu1 %1191  ;;  %v1345_v0 = vmul.f32 %v2014_v62, %v3558_v45  ;;  %v1346_v58 = vmul.f32 %v2014_v62, %v3560_v7  ;;  %v3569_v7 = vld [vmem:[#allocation3_spill] sm:$0xff] }
 0x3a7   : > { %1501 = vmatpush.bf16.xpose.msra.mxu3 %v1429_v54 }
 0x3a8   : > { %v1197_v1 = vpop.xlane.xlu2 %1196 }
 0x3a9   : > { %2015 = vrcp.f32 %v1197_v1 }
 0x3aa   : > { %2017 = vrcp.f32 %v1192_v8 }
 0x3ad   : > { %v1182_v6 = vpop.xlane.xlu0 %1181 }
 0x3af   : > { %1502 = vmatpush.bf16.xpose.msra.mxu3 %v1426_v3  ;;  %v2016_v23 = vpop.eup %2015 }
 0x3b0   : > { %v1187_v19 = vpop.xlane.xlu2 %1186  ;;  %v1342_v39 = vmul.f32 %v2016_v23, %v2999_v56  ;;  %v1343_v30 = vmul.f32 %v2016_v23, %v3559_v28  ;;  %v2018_v21 = vpop.eup %2017  ;;  %v1356_v56 = vmul.f32 %v3155_v15, %v3562_v40  ;;  %v1341_v32 = vmul.f32 %v2016_v23, %v3567_v11 }
 0x3b1   : > { %2019 = vrcp.f32 %v1187_v19  ;;  %v1339_v35 = vmul.f32 %v2018_v21, %v3563_v33  ;;  %v1340_v18 = vmul.f32 %v2018_v21, %v3564_v47 }
 0x3b2   : > { %v1405_v22 = vpack.c.bf16 %v1345_v0, %v1342_v39  ;;  %v1406_v31 = vpack.c.bf16 %v1346_v58, %v1343_v30  ;;  %2021 = vrcp.f32 %v1182_v6  ;;  %v1410_v12 = vpack.c.bf16 %v1356_v56, %v1353_v37 }
 0x3b4   : > { %1526 = vmatpush.bf16.xpose.msrb.mxu0 %v1405_v22  ;;  %v1456_v54 = vsel %vm635_vm2, %v1406_v31, 0 }
 0x3b5   : > { %1539 = vmatpush.bf16.xpose.msrb.mxu1 %v1456_v54 }
 0x3b7   : > { %1503 = vmatpush.bf16.xpose.msra.mxu3 %v1423_v52  ;;  %v2020_v16 = vpop.eup %2019 }
 0x3b8   : > { %v1177_v48 = vpop.xlane.xlu2 %1176  ;;  %v1336_v3 = vmul.f32 %v2020_v16, %v3032_v27  ;;  %v1337_v42 = vmul.f32 %v2020_v16, %v3037_v43  ;;  %v2022_v1 = vpop.eup %2021  ;;  %v1350_v27 = vmul.f32 %v3172_v50, %v3566_v49  ;;  %v1335_v58 = vmul.f32 %v2020_v16, %v3569_v7 }
 0x3b9   : > { %2023 = vrcp.f32 %v1177_v48  ;;  %v1333_v43 = vmul.f32 %v2022_v1, %v3019_v59  ;;  %v1334_v46 = vmul.f32 %v2022_v1, %v3024_v41  ;;  %v3568_v59 = vld [vmem:[#allocation39_spill] sm:$0xff] }
 0x3ba   : > { %v1402_v14 = vpack.c.bf16 %v1339_v35, %v1336_v3  ;;  %v1403_v9 = vpack.c.bf16 %v1340_v18, %v1337_v42  ;;  %v1407_v52 = vpack.c.bf16 %v1350_v27, %v1347_v61  ;;  %v1344_v19 = vmul.f32 %v2014_v62, %v3568_v59  ;;  %v3570_v62 = vld [vmem:[#allocation21_spill] sm:$0xff] }
 0x3bb   : > { %v1338_v31 = vmul.f32 %v2018_v21, %v3570_v62  ;;  %v2037_v42 = vmov 0  }
 0x3bc   : > { %1527 = vmatpush.bf16.xpose.msrb.mxu0 %v1402_v14  ;;  %v1453_v15 = vsel %vm635_vm2, %v1403_v9, 0  ;;  %v1404_v45 = vpack.c.bf16 %v1344_v19, %v1341_v32  ;;  %1772 = vset.pattern.permute.xlu1 %v2037_v42 }
 0x3bd   : > { %1540 = vmatpush.bf16.xpose.msrb.mxu1 %v1453_v15  ;;  %1771 = vset.pattern.permute.xlu0 %v2037_v42 }
 0x3be   : > { %1748 = vmatmul.msk.bf16.vlgmr.msra.gmra.mxu3 %vm635_vm2, %v3195_v55 }
 0x3bf   : > { %1509 = vmatpush.bf16.xpose.msrb.mxu3 %v1416_v24  ;;  %v2024_v4 = vpop.eup %2023 }
 0x3c0   : > { %v1172_v24 = vpop.xlane.xlu2 %1171  ;;  %v1330_v60 = vmul.f32 %v2024_v4, %v3052_v38  ;;  %v1331_v10 = vmul.f32 %v2024_v4, %v3054_v13 }
 0x3c2   : > { %v1167_v63 = vpop.xlane.xlu1 %1166  ;;  %v1399_v53 = vpack.c.bf16 %v1333_v43, %v1330_v60  ;;  %v1400_v8 = vpack.c.bf16 %v1334_v46, %v1331_v10 }
 0x3c3   : > { %2025 = vrcp.f32 %v1167_v63  ;;  %v1479_v22 = vpop.f32.mrf.mxu3 }
 0x3c4   : > { %2027 = vrcp.f32 %v1172_v24  ;;  %1528 = vmatpush.bf16.xpose.msrb.mxu0 %v1399_v53  ;;  %v1450_v50 = vsel %vm635_vm2, %v1400_v8, 0 }
 0x3c5   : > { %1541 = vmatpush.bf16.xpose.msrb.mxu1 %v1450_v50 }
 0x3c7   : > { %1510 = vmatpush.bf16.xpose.msrb.mxu3 %v1413_v57 }
 0x3c9   : > { %v2026_v57 = vpop.eup %2025 }
 0x3ca   : > { %v2028_v39 = vpop.eup %2027  ;;  %v1324_v38 = vmul.f32 %v2026_v57, %v3080_v44  ;;  %v1325_v13 = vmul.f32 %v2026_v57, %v3086_v29  ;;  %v1401_v44 = vpack.c.bf16 %v1338_v31, %v1335_v58  ;;  %v1323_v37 = vmul.f32 %v2026_v57, %v3077_v51  ;;  %v1552_v51 = vld [vmem:[%s3263_s4] sm:$0xff] }
 0x3cb   : > { %v1327_v41 = vmul.f32 %v2028_v39, %v3071_v17  ;;  %v1328_v0 = vmul.f32 %v2028_v39, %v3075_v20  ;;  %v1329_v17 = vmul.f32 %v2024_v4, %v3050_v25  ;;  %v1481_v29 = vpop.f32.mrf.mxu3  ;;  %v3571_v20 = vld [vmem:[#allocation25_spill] sm:$0xff]  ;;  %v1326_v54 = vmul.f32 %v2028_v39, %v3062_v2  ;;  %v1760_v2 = vld [vmem:[%s3262_s3] sm:$0xff]  ;;  %1556 = vperm.xlu0 %1771, %v1552_v51  }
 0x3cc   : > { %v1332_v6 = vmul.f32 %v2022_v1, %v3571_v20 }
 0x3cd   : > { %v1396_v28 = vpack.c.bf16 %v1327_v41, %v1324_v38  ;;  %v1397_v30 = vpack.c.bf16 %v1328_v0, %v1325_v13  ;;  %v1395_v40 = vpack.c.bf16 %v1326_v54, %v1323_v37 }
 0x3ce   : > { %v1398_v36 = vpack.c.bf16 %v1332_v6, %v1329_v17 }
 0x3cf   : > { %1511 = vmatpush.bf16.xpose.msrb.mxu3 %v1410_v12  ;;  %1529 = vmatpush.bf16.xpose.msrb.mxu0 %v1396_v28  ;;  %v1447_v23 = vsel %vm635_vm2, %v1397_v30, 0 }
 0x3d0   : > { %1542 = vmatpush.bf16.xpose.msrb.mxu1 %v1447_v23 }
 0x3d6   : > { %1530 = vmatmul.bf16.vlgmr.msrb.gmra.mxu0 %v3118_v34 }
 0x3d7   : > { %1512 = vmatpush.bf16.xpose.msrb.mxu3 %v1407_v52  ;;  %1749 = vmatmul.msk.bf16.vlgmr.msrb.gmra.mxu1 %vm635_vm2, %v3195_v55 }
 0x3df   : > { %1513 = vmatpush.bf16.xpose.msrb.mxu3 %v1404_v45 }
 0x3e7   : > { %1514 = vmatpush.bf16.xpose.msrb.mxu3 %v1401_v44 }
 0x3ef   : > { %1515 = vmatpush.bf16.xpose.msrb.mxu3 %v1398_v36 }
 0x3f7   : > { %1516 = vmatpush.bf16.xpose.msrb.mxu3 %v1395_v40 }
 0x3fe   : > { %1517 = vmatmul.bf16.vlgmr.msrb.gmra.mxu3 %v3084_v5  ;;  %v1553_v5 = vld [vmem:[%s3263_s4 + $0x8] sm:$0xff] }
 0x3ff   : > { %1561 = vperm.xlu1 %1772, %v1553_v5  }
 0x401   : > { %v1492_v21 = vpop.f32.mrf.mxu3 }
 0x402   : > { %v1493_v56 = vadd.f32 %v1492_v21, %v1479_v22 }
 0x409   : > { %v1494_v34 = vpop.f32.mrf.mxu3 }
 0x43d   : > { %v1557_v4 = vpop.permute.xlu0 %1556 }
 0x441   : > { %v1505_v25 = vpop.f32.mrf.mxu3 }
 0x442   : > { %v1506_v16 = vadd.f32 %v1505_v25, %v1493_v56 }
 0x444   : > { %v1550_v12 = vpack.c.bf16 %v1506_v16, %v1506_v16 }
 0x446   : > { %v1573_v55 = vsel %vm357_vm0, %v1550_v12, 0 }
 0x447   : > { %1585 = vmatpush.bf16.msrb.mxu2 %v1573_v55 }
 0x449   : > { %v1507_v48 = vpop.f32.mrf.mxu3 }
 0x44a   : > { %1754 = vmatmul.msk.bf16.vlgmr.msrb.gmra.mxu2 %vm308_vm1, %v1760_v2 }
 0x453   : > { %v1531_v3 = vpop.f32.mrf.mxu0 }
 0x454   : > { %v1544_v33 = vpop.f32.mrf.mxu1 }
 0x45b   : > { %v1533_v35 = vpop.f32.mrf.mxu0 }
 0x45c   : > { %v1546_v47 = vpop.f32.mrf.mxu1 }
 0x471   : > { %v1562_v49 = vpop.permute.xlu1 %1561 }
 0x481   : > { %v1518_v18 = vpop.f32.mrf.mxu3 }
 0x482   : > { %v1532_v14 = vadd.f32 %v1531_v3, %v1518_v18 }
 0x484   : > { %v1545_v9 = vadd.f32 %v1544_v33, %v1532_v14 }
 0x486   : > { %v1551_v26 = vpack.c.bf16 %v1545_v9, %v1545_v9 }
 0x488   : > { %v1576_v61 = vsel %vm357_vm0, %v1551_v26, 0 }
 0x489   : > { %v1520_v1 = vpop.f32.mrf.mxu3  ;;  %1599 = vmatpush.bf16.msra.mxu3 %v1576_v61 }
 0x48c   : > { %1755 = vmatmul.msk.bf16.vlgmr.msra.gmra.mxu3 %vm308_vm1, %v1760_v2 }
 0x4cd   : > { %v1587_v15 = vpop.f32.mrf.mxu2 }
 0x4ce   : > { %v1588_v52 = vadd.f32 %v1587_v15, %v1557_v4 }
 0x4d0   : > { %1606 = vst [vmem:[%s264_s15] sm:$0xff] %v1588_v52 }
 0x4d5   : > { %v1589_v27 = vpop.f32.mrf.mxu2 }
 0x4d6   : > { %v1590_v63 = vadd.f32 %v1589_v27, %v1562_v49 }
 0x4d8   : > { %1608 = vst [vmem:[%s264_s15 + $0x10] sm:$0xff] %v1590_v63 }
 0x50f   : > { %v1601_v43 = vpop.f32.mrf.mxu3 }
 0x510   : > { %v1602_v24 = vadd.f32 %v1601_v43, %v1557_v4 }
 0x512   : > { %1607 = vst [vmem:[%s264_s15 + $0x8] sm:$0xff] %v1602_v24 }
 0x517   : > { %v1603_v60 = vpop.f32.mrf.mxu3 }
 0x518   : > { %v1604_v10 = vadd.f32 %v1603_v60, %v1562_v49 }
 0x51a   : > { %1609 = vst [vmem:[%s264_s15 + $0x18] sm:$0xff] %v1604_v10 }
 0x51b PF: > { %s15_s18 = sadd.s32 1, %s2035_s18  }
 0x51c   : > { %p12_p4 = scmp.ge.s32.totalorder %s15_s18, 4  }
 0x51e   :  { %14 = sbr.rel (!%p12_p4) target bundleno = 1 (0x1), region = 76 }

</bundles_post_ra>
